<compile_context>
chip_gen: v5e
topology: v5e:2x2
jax: 0.10.0
libtpu: 0.0.40
codegen_flags: <defaults>
</compile_context>

<pallas_src>
import jax
import jax.numpy as jnp
from jax import lax
from jax.experimental import pallas as pl
from jax.experimental.pallas import tpu as pltpu

EMB_DIM = 512
BN_EPS = 1e-5


def _memn2n_kernel(max_hops):
    def kernel(story_ref, query_ref, w_ref, gamma_ref, beta_ref, out_ref):
        story = story_ref[...]            # (B, M, D) bf16
        w = w_ref[...]                    # (D, D)    bf16  (in, out) layout
        gamma = gamma_ref[...]            # (1, D)    f32
        beta = beta_ref[...]              # (1, D)    f32
        u = query_ref[...]                # (B, D)    f32

        B, M, D = story.shape
        inv_batch = 1.0 / B

        # max_hops is a static Python int; hops are inherently sequential
        # (each depends on the previous u) and 3 unrolled hops keep codegen
        # simple.  Switch to lax.fori_loop(carry=u) if max_hops ever grows.
        for _ in range(max_hops):
            # --- attention scores on the MXU: (B,1,D) x (B,M,D) -> (B,1,M) ---
            u3 = u.reshape(B, 1, D).astype(jnp.bfloat16)
            scores = jnp.einsum('bqd,bmd->bqm', u3, story,
                                preferred_element_type=jnp.float32)    # (B,1,M)

            # --- softmax over memory slots (f32; EUP exp + approx recip) -----
            scores = scores - jnp.max(scores, axis=-1, keepdims=True)
            e = jnp.exp(scores)
            prob = e * pl.reciprocal(jnp.sum(e, axis=-1, keepdims=True),
                                     approx=True)                      # (B,1,M)

            # --- weighted memory read on the MXU: (B,1,M) x (B,M,D) -> (B,1,D)
            o_k = jnp.einsum('bqm,bmd->bqd', prob.astype(jnp.bfloat16), story,
                             preferred_element_type=jnp.float32)
            o_k = o_k.reshape(B, D)                                     # (B, D) f32

            # --- fc Linear(512, 512) on the MXU.  The Linear bias is dropped
            # on purpose: BatchNorm subtracts the batch mean right after, so a
            # per-feature constant cancels exactly. ---------------------------
            h = jnp.dot(o_k.astype(jnp.bfloat16), w,
                        preferred_element_type=jnp.float32)             # (B, D)

            # --- BatchNorm1d, training mode (biased batch statistics), f32 ---
            mean = jnp.sum(h, axis=0, keepdims=True) * inv_batch
            diff = h - mean
            var = jnp.sum(diff * diff, axis=0, keepdims=True) * inv_batch
            h_bn = gamma * (diff * lax.rsqrt(var + BN_EPS)) + beta

            # --- ReLU + residual ---------------------------------------------
            u = u + jnp.maximum(h_bn, 0.0)

        out_ref[...] = u

    return kernel


def memn2n_forward(story, query, w, b, gamma, beta, *, max_hops):
    """story: (B, M, D), query: (B, D) -> (B, D) f32.

    `b` (the Linear bias) is accepted for API parity with the PyTorch module
    but is cancelled exactly by the training-mode BatchNorm that follows the
    Linear, so it is never sent to the kernel.
    """
    del b  # cancelled by BN mean subtraction (mathematically identical output)
    B, M, D = story.shape

    # Large operands travel as bf16 (halves HBM traffic / VMEM footprint); the
    # MXU accumulates in f32.  All batch-statistics math stays f32.
    story_bf = story.astype(jnp.bfloat16)
    w_bf = w.astype(jnp.bfloat16)
    gamma2 = gamma.reshape(1, D).astype(jnp.float32)
    beta2 = beta.reshape(1, D).astype(jnp.float32)

    # Whole problem fits comfortably in VMEM at these sizes -> single grid
    # step, full-array blocks (block shape == array shape satisfies the (8,128)
    # rule).  The full batch must live in one block because training-mode
    # BatchNorm couples every batch row.
    # TODO(synk): at scale (large B*M, especially v7x's 64 MiB VMEM) tile the
    # grid over M with an online-softmax accumulator and raise vmem_limit_bytes;
    # do NOT tile over B without reducing BN mean/var across tiles/cores.
    grid_spec = pl.GridSpec(
        grid=(1,),
        in_specs=[
            pl.BlockSpec((B, M, D), lambda i: (0, 0, 0)),   # story   (bf16)
            pl.BlockSpec((B, D), lambda i: (0, 0)),          # query   (f32)
            pl.BlockSpec((D, D), lambda i: (0, 0)),          # fc W    (bf16)
            pl.BlockSpec((1, D), lambda i: (0, 0)),          # BN gamma
            pl.BlockSpec((1, D), lambda i: (0, 0)),          # BN beta
        ],
        out_specs=pl.BlockSpec((B, D), lambda i: (0, 0)),
    )

    return pl.pallas_call(
        _memn2n_kernel(max_hops),
        out_shape=jax.ShapeDtypeStruct((B, D), jnp.float32),
        grid_spec=grid_spec,
        compiler_params=pltpu.CompilerParams(
            dimension_semantics=("arbitrary",)),
    )(story_bf, query.astype(jnp.float32), w_bf, gamma2, beta2)


def memn2n_reference(story, query, w, b, gamma, beta, *, max_hops,
                     compute_dtype=jnp.float32):
    """Pure-JAX reference mirroring the PyTorch module in training mode.

    With compute_dtype=float32 this is the exact PyTorch math (Linear bias
    included).  With compute_dtype=bfloat16 it quantizes exactly the operands
    the kernel quantizes, so kernel-vs-reference differences reduce to the
    approximate reciprocal and accumulation order.
    """
    story_c = story.astype(compute_dtype)
    w_c = w.astype(compute_dtype)
    u = query
    for _ in range(max_hops):
        scores = jnp.einsum('bmd,bd->bm', story_c, u.astype(compute_dtype),
                            preferred_element_type=jnp.float32)
        prob = jax.nn.softmax(scores, axis=1)
        o_k = jnp.einsum('bm,bmd->bd', prob.astype(compute_dtype), story_c,
                         preferred_element_type=jnp.float32)
        h = jnp.dot(o_k.astype(compute_dtype), w_c,
                    preferred_element_type=jnp.float32) + b
        mean = jnp.mean(h, axis=0, keepdims=True)
        var = jnp.mean((h - mean) ** 2, axis=0, keepdims=True)
        h_bn = gamma * (h - mean) / jnp.sqrt(var + BN_EPS) + beta
        u = u + jnp.maximum(h_bn, 0.0)
    return u


if __name__ == "__main__":
    key = jax.random.PRNGKey(0)
    k_story, k_query, k_w, k_b = jax.random.split(key, 4)

    B, M, D = 4, 8, EMB_DIM
    MAX_HOPS = 3

    story = jax.random.normal(k_story, (B, M, D), dtype=jnp.float32) * 0.1
    query = jax.random.normal(k_query, (B, D), dtype=jnp.float32) * 0.1

    # fc parameters (deterministic synthetic init; Linear weight stored (in, out)).
    w = jax.random.normal(k_w, (D, D), dtype=jnp.float32) * 0.02
    b = jax.random.normal(k_b, (D,), dtype=jnp.float32) * 0.02
    gamma = jnp.ones((D,), dtype=jnp.float32)   # BatchNorm1d weight init
    beta = jnp.zeros((D,), dtype=jnp.float32)   # BatchNorm1d bias init

    out = memn2n_forward(story, query, w, b, gamma, beta, max_hops=MAX_HOPS)
    out = jax.block_until_ready(out)

    # Matched-precision reference: same bf16 quantization of story / W / the
    # MXU inputs as the kernel, otherwise the full PyTorch semantics (Linear
    # bias included -- it must cancel).  Residual kernel-vs-reference error is
    # the approximate softmax reciprocal + accumulation order, amplified over
    # 3 hops of BatchNorm re-normalization, hence the 5e-2 tolerance.
    ref = memn2n_reference(story, query, w, b, gamma, beta,
                           max_hops=MAX_HOPS, compute_dtype=jnp.bfloat16)

    assert out.shape == (B, D)
    assert bool(jnp.all(jnp.isfinite(out)))
    assert jnp.allclose(out, ref, atol=5e-2, rtol=5e-2), \
        "mismatch vs matched-precision JAX reference"

    print("KERNEL_OK")
</pallas_src>

<mosaic_0001>
module attributes {stable_mosaic.version = 11 : i64} {
  func.func @kernel(%arg0: i32, %arg1: memref<4x8x512xbf16, #tpu.memory_space<vmem>>, %arg2: memref<4x512xf32, #tpu.memory_space<vmem>>, %arg3: memref<512x512xbf16, #tpu.memory_space<vmem>>, %arg4: memref<1x512xf32, #tpu.memory_space<vmem>>, %arg5: memref<1x512xf32, #tpu.memory_space<vmem>>, %arg6: memref<4x512xf32, #tpu.memory_space<vmem>>) attributes {dimension_semantics = [#tpu.dimension_semantics<arbitrary>], iteration_bounds = array<i64: 1>, scalar_prefetch = 0 : i64, scratch_operands = 0 : i64, tpu.core_type = #tpu.core_type<tc>, window_params = [{pipeline_mode = #tpu.pipeline_mode<synchronous>, transform_indices = @transform_0, window_bounds = array<i64: 4, 8, 512>}, {pipeline_mode = #tpu.pipeline_mode<synchronous>, transform_indices = @transform_1, window_bounds = array<i64: 4, 512>}, {pipeline_mode = #tpu.pipeline_mode<synchronous>, transform_indices = @transform_2, window_bounds = array<i64: 512, 512>}, {pipeline_mode = #tpu.pipeline_mode<synchronous>, transform_indices = @transform_3, window_bounds = array<i64: 1, 512>}, {pipeline_mode = #tpu.pipeline_mode<synchronous>, transform_indices = @transform_4, window_bounds = array<i64: 1, 512>}, {pipeline_mode = #tpu.pipeline_mode<synchronous>, transform_indices = @transform_5, window_bounds = array<i64: 4, 512>}]} {
    %c0 = arith.constant 0 : index
    %c0_0 = arith.constant 0 : index
    %c0_1 = arith.constant 0 : index
    %0 = vector.load %arg1[%c0, %c0_0, %c0_1] : memref<4x8x512xbf16, #tpu.memory_space<vmem>>, vector<4x8x512xbf16>
    %c0_2 = arith.constant 0 : index
    %c0_3 = arith.constant 0 : index
    %1 = vector.load %arg3[%c0_2, %c0_3] : memref<512x512xbf16, #tpu.memory_space<vmem>>, vector<512x512xbf16>
    %c0_4 = arith.constant 0 : index
    %c0_5 = arith.constant 0 : index
    %2 = vector.load %arg4[%c0_4, %c0_5] : memref<1x512xf32, #tpu.memory_space<vmem>>, vector<1x512xf32>
    %c0_6 = arith.constant 0 : index
    %c0_7 = arith.constant 0 : index
    %3 = vector.load %arg5[%c0_6, %c0_7] : memref<1x512xf32, #tpu.memory_space<vmem>>, vector<1x512xf32>
    %c0_8 = arith.constant 0 : index
    %c0_9 = arith.constant 0 : index
    %4 = vector.load %arg2[%c0_8, %c0_9] : memref<4x512xf32, #tpu.memory_space<vmem>>, vector<4x512xf32>
    %5 = vector.shape_cast %4 : vector<4x512xf32> to vector<4x1x512xf32>
    %6 = arith.truncf %5 : vector<4x1x512xf32> to vector<4x1x512xbf16>
    "tpu.trace_start"() <{level = 10 : i32, message = "bqd,bmd->bqm"}> : () -> ()
    %cst = arith.constant dense<0.000000e+00> : vector<4x1x8xf32>
    %7 = tpu.matmul %6, %0, %cst {dimension_numbers = #tpu.dot_dimension_numbers<[2], [2], [1], [1], [0, 0, 0, 1, 1, 1], [0], [0]>} : vector<4x1x512xbf16>, vector<4x8x512xbf16>, vector<4x1x8xf32> -> vector<4x1x8xf32>
    "tpu.trace_stop"() : () -> ()
    %cst_10 = arith.constant dense<0xFF800000> : vector<4x1xf32>
    %8 = vector.multi_reduction <maximumf>, %7, %cst_10 [2] : vector<4x1x8xf32> to vector<4x1xf32>
    %9 = vector.shape_cast %8 : vector<4x1xf32> to vector<4x1x1xf32>
    %10 = vector.broadcast %9 : vector<4x1x1xf32> to vector<4x1x8xf32>
    %11 = arith.subf %7, %10 : vector<4x1x8xf32>
    %12 = math.exp %11 : vector<4x1x8xf32>
    %cst_11 = arith.constant dense<0.000000e+00> : vector<4x1xf32>
    %13 = vector.multi_reduction <add>, %12, %cst_11 [2] : vector<4x1x8xf32> to vector<4x1xf32>
    %14 = vector.shape_cast %13 : vector<4x1xf32> to vector<4x1x1xf32>
    %15 = tpu.reciprocal %14 {approx = true} : vector<4x1x1xf32> -> vector<4x1x1xf32>
    %16 = vector.broadcast %15 : vector<4x1x1xf32> to vector<4x1x8xf32>
    %17 = arith.mulf %12, %16 : vector<4x1x8xf32>
    %18 = arith.truncf %17 : vector<4x1x8xf32> to vector<4x1x8xbf16>
    "tpu.trace_start"() <{level = 10 : i32, message = "bqm,bmd->bqd"}> : () -> ()
    %cst_12 = arith.constant dense<0.000000e+00> : vector<4x1x512xf32>
    %19 = tpu.matmul %18, %0, %cst_12 {dimension_numbers = #tpu.dot_dimension_numbers<[2], [1], [1], [2], [0, 0, 0, 1, 1, 2], [0], [0]>} : vector<4x1x8xbf16>, vector<4x8x512xbf16>, vector<4x1x512xf32> -> vector<4x1x512xf32>
    "tpu.trace_stop"() : () -> ()
    %20 = vector.shape_cast %19 : vector<4x1x512xf32> to vector<4x512xf32>
    %21 = arith.truncf %20 : vector<4x512xf32> to vector<4x512xbf16>
    %cst_13 = arith.constant dense<0.000000e+00> : vector<4x512xf32>
    %22 = tpu.matmul %21, %1, %cst_13 {dimension_numbers = #tpu.dot_dimension_numbers<[1], [0], [0], [1], [0, 0, 1, 1], [], []>} : vector<4x512xbf16>, vector<512x512xbf16>, vector<4x512xf32> -> vector<4x512xf32>
    %cst_14 = arith.constant dense<0.000000e+00> : vector<512xf32>
    %23 = vector.multi_reduction <add>, %22, %cst_14 [0] : vector<4x512xf32> to vector<512xf32>
    %24 = vector.shape_cast %23 : vector<512xf32> to vector<1x512xf32>
    %cst_15 = arith.constant 2.500000e-01 : f32
    %25 = vector.broadcast %cst_15 : f32 to vector<1x512xf32>
    %26 = arith.mulf %24, %25 : vector<1x512xf32>
    %27 = vector.broadcast %26 : vector<1x512xf32> to vector<4x512xf32>
    %28 = arith.subf %22, %27 : vector<4x512xf32>
    %29 = arith.mulf %28, %28 : vector<4x512xf32>
    %cst_16 = arith.constant dense<0.000000e+00> : vector<512xf32>
    %30 = vector.multi_reduction <add>, %29, %cst_16 [0] : vector<4x512xf32> to vector<512xf32>
    %31 = vector.shape_cast %30 : vector<512xf32> to vector<1x512xf32>
    %cst_17 = arith.constant 2.500000e-01 : f32
    %32 = vector.broadcast %cst_17 : f32 to vector<1x512xf32>
    %33 = arith.mulf %31, %32 : vector<1x512xf32>
    %cst_18 = arith.constant 9.99999974E-6 : f32
    %34 = vector.broadcast %cst_18 : f32 to vector<1x512xf32>
    %35 = arith.addf %33, %34 : vector<1x512xf32>
    %36 = math.rsqrt %35 : vector<1x512xf32>
    %37 = vector.broadcast %36 : vector<1x512xf32> to vector<4x512xf32>
    %38 = arith.mulf %28, %37 : vector<4x512xf32>
    %39 = vector.broadcast %2 : vector<1x512xf32> to vector<4x512xf32>
    %40 = arith.mulf %39, %38 : vector<4x512xf32>
    %41 = vector.broadcast %3 : vector<1x512xf32> to vector<4x512xf32>
    %42 = arith.addf %40, %41 : vector<4x512xf32>
    %cst_19 = arith.constant 0.000000e+00 : f32
    %43 = vector.broadcast %cst_19 : f32 to vector<4x512xf32>
    %44 = arith.maximumf %42, %43 : vector<4x512xf32>
    %45 = arith.addf %4, %44 : vector<4x512xf32>
    %46 = vector.shape_cast %45 : vector<4x512xf32> to vector<4x1x512xf32>
    %47 = arith.truncf %46 : vector<4x1x512xf32> to vector<4x1x512xbf16>
    "tpu.trace_start"() <{level = 10 : i32, message = "bqd,bmd->bqm"}> : () -> ()
    %cst_20 = arith.constant dense<0.000000e+00> : vector<4x1x8xf32>
    %48 = tpu.matmul %47, %0, %cst_20 {dimension_numbers = #tpu.dot_dimension_numbers<[2], [2], [1], [1], [0, 0, 0, 1, 1, 1], [0], [0]>} : vector<4x1x512xbf16>, vector<4x8x512xbf16>, vector<4x1x8xf32> -> vector<4x1x8xf32>
    "tpu.trace_stop"() : () -> ()
    %cst_21 = arith.constant dense<0xFF800000> : vector<4x1xf32>
    %49 = vector.multi_reduction <maximumf>, %48, %cst_21 [2] : vector<4x1x8xf32> to vector<4x1xf32>
    %50 = vector.shape_cast %49 : vector<4x1xf32> to vector<4x1x1xf32>
    %51 = vector.broadcast %50 : vector<4x1x1xf32> to vector<4x1x8xf32>
    %52 = arith.subf %48, %51 : vector<4x1x8xf32>
    %53 = math.exp %52 : vector<4x1x8xf32>
    %cst_22 = arith.constant dense<0.000000e+00> : vector<4x1xf32>
    %54 = vector.multi_reduction <add>, %53, %cst_22 [2] : vector<4x1x8xf32> to vector<4x1xf32>
    %55 = vector.shape_cast %54 : vector<4x1xf32> to vector<4x1x1xf32>
    %56 = tpu.reciprocal %55 {approx = true} : vector<4x1x1xf32> -> vector<4x1x1xf32>
    %57 = vector.broadcast %56 : vector<4x1x1xf32> to vector<4x1x8xf32>
    %58 = arith.mulf %53, %57 : vector<4x1x8xf32>
    %59 = arith.truncf %58 : vector<4x1x8xf32> to vector<4x1x8xbf16>
    "tpu.trace_start"() <{level = 10 : i32, message = "bqm,bmd->bqd"}> : () -> ()
    %cst_23 = arith.constant dense<0.000000e+00> : vector<4x1x512xf32>
    %60 = tpu.matmul %59, %0, %cst_23 {dimension_numbers = #tpu.dot_dimension_numbers<[2], [1], [1], [2], [0, 0, 0, 1, 1, 2], [0], [0]>} : vector<4x1x8xbf16>, vector<4x8x512xbf16>, vector<4x1x512xf32> -> vector<4x1x512xf32>
    "tpu.trace_stop"() : () -> ()
    %61 = vector.shape_cast %60 : vector<4x1x512xf32> to vector<4x512xf32>
    %62 = arith.truncf %61 : vector<4x512xf32> to vector<4x512xbf16>
    %cst_24 = arith.constant dense<0.000000e+00> : vector<4x512xf32>
    %63 = tpu.matmul %62, %1, %cst_24 {dimension_numbers = #tpu.dot_dimension_numbers<[1], [0], [0], [1], [0, 0, 1, 1], [], []>} : vector<4x512xbf16>, vector<512x512xbf16>, vector<4x512xf32> -> vector<4x512xf32>
    %cst_25 = arith.constant dense<0.000000e+00> : vector<512xf32>
    %64 = vector.multi_reduction <add>, %63, %cst_25 [0] : vector<4x512xf32> to vector<512xf32>
    %65 = vector.shape_cast %64 : vector<512xf32> to vector<1x512xf32>
    %cst_26 = arith.constant 2.500000e-01 : f32
    %66 = vector.broadcast %cst_26 : f32 to vector<1x512xf32>
    %67 = arith.mulf %65, %66 : vector<1x512xf32>
    %68 = vector.broadcast %67 : vector<1x512xf32> to vector<4x512xf32>
    %69 = arith.subf %63, %68 : vector<4x512xf32>
    %70 = arith.mulf %69, %69 : vector<4x512xf32>
    %cst_27 = arith.constant dense<0.000000e+00> : vector<512xf32>
    %71 = vector.multi_reduction <add>, %70, %cst_27 [0] : vector<4x512xf32> to vector<512xf32>
    %72 = vector.shape_cast %71 : vector<512xf32> to vector<1x512xf32>
    %cst_28 = arith.constant 2.500000e-01 : f32
    %73 = vector.broadcast %cst_28 : f32 to vector<1x512xf32>
    %74 = arith.mulf %72, %73 : vector<1x512xf32>
    %cst_29 = arith.constant 9.99999974E-6 : f32
    %75 = vector.broadcast %cst_29 : f32 to vector<1x512xf32>
    %76 = arith.addf %74, %75 : vector<1x512xf32>
    %77 = math.rsqrt %76 : vector<1x512xf32>
    %78 = vector.broadcast %77 : vector<1x512xf32> to vector<4x512xf32>
    %79 = arith.mulf %69, %78 : vector<4x512xf32>
    %80 = vector.broadcast %2 : vector<1x512xf32> to vector<4x512xf32>
    %81 = arith.mulf %80, %79 : vector<4x512xf32>
    %82 = vector.broadcast %3 : vector<1x512xf32> to vector<4x512xf32>
    %83 = arith.addf %81, %82 : vector<4x512xf32>
    %cst_30 = arith.constant 0.000000e+00 : f32
    %84 = vector.broadcast %cst_30 : f32 to vector<4x512xf32>
    %85 = arith.maximumf %83, %84 : vector<4x512xf32>
    %86 = arith.addf %45, %85 : vector<4x512xf32>
    %87 = vector.shape_cast %86 : vector<4x512xf32> to vector<4x1x512xf32>
    %88 = arith.truncf %87 : vector<4x1x512xf32> to vector<4x1x512xbf16>
    "tpu.trace_start"() <{level = 10 : i32, message = "bqd,bmd->bqm"}> : () -> ()
    %cst_31 = arith.constant dense<0.000000e+00> : vector<4x1x8xf32>
    %89 = tpu.matmul %88, %0, %cst_31 {dimension_numbers = #tpu.dot_dimension_numbers<[2], [2], [1], [1], [0, 0, 0, 1, 1, 1], [0], [0]>} : vector<4x1x512xbf16>, vector<4x8x512xbf16>, vector<4x1x8xf32> -> vector<4x1x8xf32>
    "tpu.trace_stop"() : () -> ()
    %cst_32 = arith.constant dense<0xFF800000> : vector<4x1xf32>
    %90 = vector.multi_reduction <maximumf>, %89, %cst_32 [2] : vector<4x1x8xf32> to vector<4x1xf32>
    %91 = vector.shape_cast %90 : vector<4x1xf32> to vector<4x1x1xf32>
    %92 = vector.broadcast %91 : vector<4x1x1xf32> to vector<4x1x8xf32>
    %93 = arith.subf %89, %92 : vector<4x1x8xf32>
    %94 = math.exp %93 : vector<4x1x8xf32>
    %cst_33 = arith.constant dense<0.000000e+00> : vector<4x1xf32>
    %95 = vector.multi_reduction <add>, %94, %cst_33 [2] : vector<4x1x8xf32> to vector<4x1xf32>
    %96 = vector.shape_cast %95 : vector<4x1xf32> to vector<4x1x1xf32>
    %97 = tpu.reciprocal %96 {approx = true} : vector<4x1x1xf32> -> vector<4x1x1xf32>
    %98 = vector.broadcast %97 : vector<4x1x1xf32> to vector<4x1x8xf32>
    %99 = arith.mulf %94, %98 : vector<4x1x8xf32>
    %100 = arith.truncf %99 : vector<4x1x8xf32> to vector<4x1x8xbf16>
    "tpu.trace_start"() <{level = 10 : i32, message = "bqm,bmd->bqd"}> : () -> ()
    %cst_34 = arith.constant dense<0.000000e+00> : vector<4x1x512xf32>
    %101 = tpu.matmul %100, %0, %cst_34 {dimension_numbers = #tpu.dot_dimension_numbers<[2], [1], [1], [2], [0, 0, 0, 1, 1, 2], [0], [0]>} : vector<4x1x8xbf16>, vector<4x8x512xbf16>, vector<4x1x512xf32> -> vector<4x1x512xf32>
    "tpu.trace_stop"() : () -> ()
    %102 = vector.shape_cast %101 : vector<4x1x512xf32> to vector<4x512xf32>
    %103 = arith.truncf %102 : vector<4x512xf32> to vector<4x512xbf16>
    %cst_35 = arith.constant dense<0.000000e+00> : vector<4x512xf32>
    %104 = tpu.matmul %103, %1, %cst_35 {dimension_numbers = #tpu.dot_dimension_numbers<[1], [0], [0], [1], [0, 0, 1, 1], [], []>} : vector<4x512xbf16>, vector<512x512xbf16>, vector<4x512xf32> -> vector<4x512xf32>
    %cst_36 = arith.constant dense<0.000000e+00> : vector<512xf32>
    %105 = vector.multi_reduction <add>, %104, %cst_36 [0] : vector<4x512xf32> to vector<512xf32>
    %106 = vector.shape_cast %105 : vector<512xf32> to vector<1x512xf32>
    %cst_37 = arith.constant 2.500000e-01 : f32
    %107 = vector.broadcast %cst_37 : f32 to vector<1x512xf32>
    %108 = arith.mulf %106, %107 : vector<1x512xf32>
    %109 = vector.broadcast %108 : vector<1x512xf32> to vector<4x512xf32>
    %110 = arith.subf %104, %109 : vector<4x512xf32>
    %111 = arith.mulf %110, %110 : vector<4x512xf32>
    %cst_38 = arith.constant dense<0.000000e+00> : vector<512xf32>
    %112 = vector.multi_reduction <add>, %111, %cst_38 [0] : vector<4x512xf32> to vector<512xf32>
    %113 = vector.shape_cast %112 : vector<512xf32> to vector<1x512xf32>
    %cst_39 = arith.constant 2.500000e-01 : f32
    %114 = vector.broadcast %cst_39 : f32 to vector<1x512xf32>
    %115 = arith.mulf %113, %114 : vector<1x512xf32>
    %cst_40 = arith.constant 9.99999974E-6 : f32
    %116 = vector.broadcast %cst_40 : f32 to vector<1x512xf32>
    %117 = arith.addf %115, %116 : vector<1x512xf32>
    %118 = math.rsqrt %117 : vector<1x512xf32>
    %119 = vector.broadcast %118 : vector<1x512xf32> to vector<4x512xf32>
    %120 = arith.mulf %110, %119 : vector<4x512xf32>
    %121 = vector.broadcast %2 : vector<1x512xf32> to vector<4x512xf32>
    %122 = arith.mulf %121, %120 : vector<4x512xf32>
    %123 = vector.broadcast %3 : vector<1x512xf32> to vector<4x512xf32>
    %124 = arith.addf %122, %123 : vector<4x512xf32>
    %cst_41 = arith.constant 0.000000e+00 : f32
    %125 = vector.broadcast %cst_41 : f32 to vector<4x512xf32>
    %126 = arith.maximumf %124, %125 : vector<4x512xf32>
    %127 = arith.addf %86, %126 : vector<4x512xf32>
    %c0_42 = arith.constant 0 : index
    %c0_43 = arith.constant 0 : index
    %128 = vector.load %arg6[%c0_42, %c0_43] : memref<4x512xf32, #tpu.memory_space<vmem>>, vector<4x512xf32>
    tpu.vector_store %arg6[%c0_42, %c0_43], %127 {strides = array<i32>} : memref<4x512xf32, #tpu.memory_space<vmem>>, vector<4x512xf32>,
    return
  }
  func.func @transform_0(%arg0: i32) -> (i32, i32, i32) {
    %c0_i32 = arith.constant 0 : i32
    %c0_i32_0 = arith.constant 0 : i32
    %c0_i32_1 = arith.constant 0 : i32
    %c0_i32_2 = arith.constant 0 : i32
    return %c0_i32, %c0_i32_0, %c0_i32_1 : i32, i32, i32
  }
  func.func @transform_1(%arg0: i32) -> (i32, i32) {
    %c0_i32 = arith.constant 0 : i32
    %c0_i32_0 = arith.constant 0 : i32
    %c0_i32_1 = arith.constant 0 : i32
    return %c0_i32, %c0_i32_0 : i32, i32
  }
  func.func @transform_2(%arg0: i32) -> (i32, i32) {
    %c0_i32 = arith.constant 0 : i32
    %c0_i32_0 = arith.constant 0 : i32
    %c0_i32_1 = arith.constant 0 : i32
    return %c0_i32, %c0_i32_0 : i32, i32
  }
  func.func @transform_3(%arg0: i32) -> (i32, i32) {
    %c0_i32 = arith.constant 0 : i32
    %c0_i32_0 = arith.constant 0 : i32
    %c0_i32_1 = arith.constant 0 : i32
    return %c0_i32, %c0_i32_0 : i32, i32
  }
  func.func @transform_4(%arg0: i32) -> (i32, i32) {
    %c0_i32 = arith.constant 0 : i32
    %c0_i32_0 = arith.constant 0 : i32
    %c0_i32_1 = arith.constant 0 : i32
    return %c0_i32, %c0_i32_0 : i32, i32
  }
  func.func @transform_5(%arg0: i32) -> (i32, i32) {
    %c0_i32 = arith.constant 0 : i32
    %c0_i32_0 = arith.constant 0 : i32
    %c0_i32_1 = arith.constant 0 : i32
    return %c0_i32, %c0_i32_0 : i32, i32
  }
}

</mosaic_0001>

<bundles_post_ra>
// kernel: tpu_custom_call.1
= control target key start
LH: loop header
LB: loop body
LE: loop exit
PB: predicated region body
PF: predicated region fallthrough
CT: control target
= control target key end

     0   :  { %10 = vsyncpa [#allocation3], 0  ;;  %s6391_s0 = inlined_call_operand.hbm [shape: bf16[4,8,512], index: 0, kind: input, shape index: {}]   ;;  %s6392_s1 = inlined_call_operand.hbm [shape: f32[4,512], index: 1, kind: input, shape index: {}]   ;;  %s6393_s2 = inlined_call_operand.hbm [shape: bf16[512,512], index: 2, kind: input, shape index: {}]   ;;  %s6394_s3 = inlined_call_operand.hbm [shape: f32[1,512], index: 3, kind: input, shape index: {}]   ;;  %s6395_s4 = inlined_call_operand.hbm [shape: f32[1,512], index: 4, kind: input, shape index: {}]   ;;  %s6396_s5 = inlined_call_operand.hbm [shape: f32[4,512], index: 5, kind: output, shape index: {}]  }
   0x1   :  { %11 = vsyncpa [#allocation6], 0 }
   0x2   :  { %12 = vsyncpa [#allocation9], 0  ;;  %s32_s20 = sshll.u32 %s6392_s1, 4  ;;  %s33_s20 = int_to_ptr.hbm [resolvable:$true] %s32_s20 }
   0x3   :  { %13 = vsyncpa [#allocation4], 0  ;;  %s5024_s21 = smov [#allocation5]   ;;  %s56_s25 = sshll.u32 %s6394_s3, 4  ;;  %s57_s25 = int_to_ptr.hbm [resolvable:$true] %s56_s25 }
   0x4   :  { %s34_s22 = sshll.u32 %s5024_s21, 4  ;;  %s5025_s26 = smov [#allocation8]   ;;  %s35_s22 = int_to_ptr.vmem [resolvable:$true] %s34_s22 }
   0x5   :  { %37 = dma.hbm_to_vmem [thread:$0]  %s33_s20, 256, %s35_s22, [#allocation6]  }
   0x6   :  { %s58_s27 = sshll.u32 %s5025_s26, 4  ;;  %s18_s30 = sshll.u32 %s6391_s0, 4  ;;  %s59_s27 = int_to_ptr.vmem [resolvable:$true] %s58_s27  ;;  %s19_s30 = int_to_ptr.hbm [resolvable:$true] %s18_s30 }
   0x7   :  { %61 = dma.hbm_to_vmem [thread:$0]  %s57_s25, 64, %s59_s27, [#allocation9]  }
   0x8   :  { %s5026_s1 = smov [#allocation2]   ;;  %s42_s9 = sshll.u32 %s6393_s2, 4  ;;  %s43_s9 = int_to_ptr.hbm [resolvable:$true] %s42_s9 }
   0x9   :  { %s20_s6 = sshll.u32 %s5026_s1, 4  ;;  %s5027_s10 = smov 256   ;;  %s21_s6 = int_to_ptr.vmem [resolvable:$true] %s20_s6 }
   0xa   :  { %s5028_s3 = smov 16   ;;  %s5029_s11 = smov [#allocation7]  }
   0xb   :  { %26 = dma.hbm_to_vmem [thread:$0]  %s19_s30, 1024, %s21_s6, [#allocation3], %s5027_s10, %s5027_s10, %s5028_s3  }
   0xc   :  { %s44_s12 = sshll.u32 %s5029_s11, 4  ;;  %s67_s0 = sshll.u32 %s6395_s4, 4  ;;  %s45_s12 = int_to_ptr.vmem [resolvable:$true] %s44_s12  ;;  %s68_s0 = int_to_ptr.hbm [resolvable:$true] %s67_s0 }
   0xd   :  { %50 = dma.hbm_to_vmem [thread:$0]  %s43_s9, 16384, %s45_s12, [#allocation6], %s5027_s10, %s5027_s10, %s5028_s3  }
   0xe   :  { %s5030_s15 = smov [#allocation10]  }
   0xf   :  { %s69_s16 = sshll.u32 %s5030_s15, 4  ;;  %s70_s16 = int_to_ptr.vmem [resolvable:$true] %s69_s16 }
  0x10   :  { %72 = dma.hbm_to_vmem [thread:$0]  %s68_s0, 64, %s70_s16, [#allocation9]  }
  0x11   :  { %5016 = dma.done.wait [#allocation3], 1024  }
  0x12   :  { %5017 = vsyncadd [#allocation3], 4294966272 }
  0x13   :  { %5018 = dma.done.wait [#allocation6], 16640  }
  0x14   :  { %5019 = vsyncadd [#allocation6], 4294950656 }
  0x15   :  { %5020 = dma.done.wait [#allocation9], 128  }
  0x16   :  { %5021 = vsyncadd [#allocation9], 4294967168  ;;  %vm239_vm0 = vcmask 1040384   ;;  %vm241_vm1 = vcmask 1042434   ;;  %vm243_vm2 = vcmask 1041408   ;;  %v94_v0 = vld [vmem:[#allocation2] sm:$0xff] }
  0x17   :  { %v95_v1 = vld [vmem:[#allocation2 + $0x8] sm:$0xff]  ;;  %v5077_v2 = vld [vmem:[#allocation5] sm:$0xff]  ;;  %vm245_vm3 = vcmask 1041409   ;;  %vm247_vm4 = vcmask 1043459   ;;  %vm249_vm5 = vcmask 1042433   ;;  %v320_v3 = vunpack.c.l.b16 %v94_v0  ;;  %v96_v8 = vld [vmem:[#allocation2 + $0x10] sm:$0xff] }
  0x18   :  { %v321_v4 = vunpack.c.h.b16 %v94_v0  ;;  %v322_v5 = vunpack.c.l.b16 %v95_v1  ;;  %v323_v6 = vunpack.c.h.b16 %v95_v1  ;;  %v233_v7 = vld [vmem:[#allocation5 + $0x8] sm:$0xff]  ;;  %v5080_v9 = vrot.slane %v5077_v2, 3  ;;  %v97_v13 = vld [vmem:[#allocation2 + $0x18] sm:$0xff]  ;;  %v98_v26 = vld [vmem:[#allocation2 + $0x20] sm:$0xff]  ;;  %s5031_s2 = smov [#allocation11]   ;;  %s4090_s19 = sshll.u32 %s6396_s5, 4  ;;  %s4091_s19 = int_to_ptr.hbm [resolvable:$true] %s4090_s19 }
  0x19   :  { %v5082_v10 = vrot.slane %v233_v7, 6  ;;  %v5084_v11 = vrot.slane %v233_v7, 1  ;;  %v400_v12 = vunpack.c.l.b16 %v96_v8  ;;  %v5086_v14 = vpack.c.b16 %v320_v3, %v320_v3  ;;  %v99_v31 = vld [vmem:[#allocation2 + $0x28] sm:$0xff]  ;;  %v100_v0 = vld [vmem:[#allocation2 + $0x30] sm:$0xff]  ;;  %s4088_s4 = sshll.u32 %s5031_s2, 4  ;;  %s4089_s4 = int_to_ptr.vmem [resolvable:$true] %s4088_s4 }
  0x1a   :  { %v5088_v15 = vpack.c.b16 %v321_v4, %v321_v4  ;;  %v5090_v16 = vpack.c.b16 %v322_v5, %v322_v5  ;;  %v5092_v17 = vpack.c.b16 %v323_v6, %v323_v6  ;;  %v240_v18 = vsel %vm239_vm0, %v5077_v2, %v5080_v9  ;;  %v101_v4 = vld [vmem:[#allocation2 + $0x38] sm:$0xff] }
  0x1b   :  { %6665 = vst [vmem:[#allocation16_spill] sm:$0xff] %v5086_v14  ;;  %v242_v19 = vsel %vm241_vm1, %v5082_v10, %v5084_v11  ;;  %v5100_v20 = vpack.c.b16 %v400_v12, %v400_v12  ;;  %v401_v21 = vunpack.c.h.b16 %v96_v8  ;;  %339 = vmatpush.bf16.xpose.msra.mxu0 %v5086_v14  ;;  %v402_v23 = vunpack.c.l.b16 %v97_v13 }
  0x1c   :  { %6666 = vst [vmem:[#allocation17_spill] sm:$0xff] %v5088_v15  ;;  %352 = vmatpush.bf16.xpose.msra.mxu1 %v5088_v15  ;;  %v244_v22 = vsel %vm243_vm2, %v240_v18, %v242_v19  ;;  %v403_v24 = vunpack.c.h.b16 %v97_v13  ;;  %v246_v25 = vsel %vm245_vm3, %v5077_v2, %v5080_v9  ;;  %365 = vmatpush.bf16.xpose.msra.mxu2 %v5090_v16  ;;  %v480_v39 = vunpack.c.l.b16 %v98_v26 }
  0x1d   :  { %6667 = vst [vmem:[#allocation18_spill] sm:$0xff] %v5090_v16  ;;  %378 = vmatpush.bf16.xpose.msra.mxu3 %v5092_v17  ;;  %v264_v27 = vperm.slane %v244_v22, 0  ;;  %v265_v28 = vperm.slane %v244_v22, 1  ;;  %v266_v29 = vperm.slane %v244_v22, 2  ;;  %v267_v30 = vperm.slane %v244_v22, 3 }
  0x1e   :  { %6668 = vst [vmem:[#allocation19_spill] sm:$0xff] %v5092_v17  ;;  %v5111_v32 = vpack.c.b16 %v401_v21, %v401_v21  ;;  %v5113_v33 = vpack.c.b16 %v402_v23, %v402_v23  ;;  %v5115_v34 = vpack.c.b16 %v403_v24, %v403_v24  ;;  %v248_v35 = vsel %vm247_vm4, %v5082_v10, %v5084_v11 }
  0x1f   :  { %6669 = vst [vmem:[#allocation20_spill] sm:$0xff] %v5100_v20  ;;  %v296_v36 = vpack.c.bf16 %v265_v28, %v264_v27  ;;  %v297_v37 = vpack.c.bf16 %v267_v30, %v266_v29  ;;  %v250_v38 = vsel %vm249_vm5, %v246_v25, %v248_v35  ;;  %v481_v41 = vunpack.c.h.b16 %v98_v26 }
  0x20   :  { %6670 = vst [vmem:[#allocation21_spill] sm:$0xff] %v5111_v32  ;;  %v251_v40 = vrot.slane %v250_v38, 1  ;;  %v482_v42 = vunpack.c.l.b16 %v99_v31  ;;  %v483_v43 = vunpack.c.h.b16 %v99_v31  ;;  %v5124_v52 = vpack.c.b16 %v480_v39, %v480_v39 }
  0x21   :  { %6671 = vst [vmem:[#allocation22_spill] sm:$0xff] %v5113_v33  ;;  %v306_v44 = vunpack.c.l.b16 %v296_v36  ;;  %v307_v45 = vunpack.c.h.b16 %v296_v36  ;;  %v308_v46 = vunpack.c.l.b16 %v297_v37  ;;  %v309_v47 = vunpack.c.h.b16 %v297_v37 }
  0x22   :  { %6672 = vst [vmem:[#allocation23_spill] sm:$0xff] %v5115_v34  ;;  %v5126_v53 = vpack.c.b16 %v481_v41, %v481_v41  ;;  %v268_v54 = vperm.slane %v251_v40, 0  ;;  %v269_v55 = vperm.slane %v251_v40, 1  ;;  %v5128_v56 = vpack.c.b16 %v482_v42, %v482_v42 }
  0x23   :  { %419 = vmatpush.bf16.xpose.msrb.mxu0 %v5100_v20  ;;  %v310_v48 = vpack.c.b16 %v306_v44, %v306_v44  ;;  %v311_v49 = vpack.c.b16 %v307_v45, %v307_v45  ;;  %v312_v50 = vpack.c.b16 %v308_v46, %v308_v46  ;;  %v313_v51 = vpack.c.b16 %v309_v47, %v309_v47 }
  0x24   :  { %432 = vmatpush.bf16.xpose.msrb.mxu1 %v5111_v32  ;;  %445 = vmatpush.bf16.xpose.msrb.mxu2 %v5113_v33  ;;  %v5130_v57 = vpack.c.b16 %v483_v43, %v483_v43  ;;  %v270_v58 = vperm.slane %v251_v40, 2  ;;  %v271_v59 = vperm.slane %v251_v40, 3  ;;  %vm253_vm6 = vcmask 1044484  }
  0x25   :  { %458 = vmatpush.bf16.xpose.msrb.mxu3 %v5115_v34  ;;  %340 = vmatmul.bf16.vlgmr.msra.gmra.mxu0 %v310_v48  ;;  %v298_v60 = vpack.c.bf16 %v269_v55, %v268_v54  ;;  %v252_v62 = vsel %vm241_vm1, %v5077_v2, %v5080_v9  ;;  %v254_v63 = vsel %vm253_vm6, %v5082_v10, %v5084_v11  ;;  %vm255_vm7 = vcmask 1043458  }
  0x26   :  { %353 = vmatmul.bf16.vlgmr.msra.gmra.mxu1 %v311_v49  ;;  %366 = vmatmul.bf16.vlgmr.msra.gmra.mxu2 %v312_v50  ;;  %v299_v61 = vpack.c.bf16 %v271_v59, %v270_v58  ;;  %v256_v7 = vsel %vm255_vm7, %v252_v62, %v254_v63  ;;  %v560_v8 = vunpack.c.l.b16 %v100_v0  ;;  %v561_v12 = vunpack.c.h.b16 %v100_v0 }
  0x27   :  { %379 = vmatmul.bf16.vlgmr.msra.gmra.mxu3 %v313_v51  ;;  %v386_v1 = vunpack.c.l.b16 %v298_v60  ;;  %v387_v3 = vunpack.c.h.b16 %v298_v60  ;;  %v562_v13 = vunpack.c.l.b16 %v101_v4  ;;  %v563_v18 = vunpack.c.h.b16 %v101_v4 }
  0x28   :  { %v388_v5 = vunpack.c.l.b16 %v299_v61  ;;  %v389_v6 = vunpack.c.h.b16 %v299_v61  ;;  %v257_v22 = vrot.slane %v256_v7, 2  ;;  %v5143_v25 = vpack.c.b16 %v560_v8, %v560_v8 }
  0x29   :  { %v390_v19 = vpack.c.b16 %v386_v1, %v386_v1  ;;  %v391_v21 = vpack.c.b16 %v387_v3, %v387_v3  ;;  %v5145_v26 = vpack.c.b16 %v561_v12, %v561_v12  ;;  %v5147_v27 = vpack.c.b16 %v562_v13, %v562_v13 }
  0x2a   :  { %v392_v23 = vpack.c.b16 %v388_v5, %v388_v5  ;;  %v393_v24 = vpack.c.b16 %v389_v6, %v389_v6  ;;  %v5149_v28 = vpack.c.b16 %v563_v18, %v563_v18  ;;  %v272_v29 = vperm.slane %v257_v22, 0 }
  0x2b   :  { %499 = vmatpush.bf16.xpose.msra.mxu0 %v5124_v52  ;;  %v273_v30 = vperm.slane %v257_v22, 1  ;;  %v274_v31 = vperm.slane %v257_v22, 2  ;;  %v275_v35 = vperm.slane %v257_v22, 3  ;;  %vm6664_vm8 = vcmask 1045509  }
  0x2c   :  { %512 = vmatpush.bf16.xpose.msra.mxu1 %v5126_v53  ;;  %525 = vmatpush.bf16.xpose.msra.mxu2 %v5128_v56  ;;  %v258_v38 = vsel %vm247_vm4, %v5077_v2, %v5080_v9  ;;  %v260_v39 = vsel %vm6664_vm8, %v5082_v10, %v5084_v11  ;;  %vm6643_vm9 = vcmask 1044483   ;;  %vm6642_vm10 = vcmask 57344  }
  0x2d   :  { %538 = vmatpush.bf16.xpose.msra.mxu3 %v5130_v57  ;;  %v300_v36 = vpack.c.bf16 %v273_v30, %v272_v29  ;;  %v301_v37 = vpack.c.bf16 %v275_v35, %v274_v31  ;;  %v262_v44 = vsel %vm6643_vm9, %v258_v38, %v260_v39  ;;  %vm677_vm11 = vcmask 1043456  }
  0x2e   :  { %v263_v47 = vrot.slane %v262_v44, 3  ;;  %vm6641_vm12 = vcmask 64512  }
  0x2f   :  { %v466_v40 = vunpack.c.l.b16 %v300_v36  ;;  %v467_v41 = vunpack.c.h.b16 %v300_v36  ;;  %v468_v42 = vunpack.c.l.b16 %v301_v37  ;;  %v469_v43 = vunpack.c.h.b16 %v301_v37 }
  0x30   :  { %v276_v50 = vperm.slane %v263_v47, 0  ;;  %v277_v2 = vperm.slane %v263_v47, 1  ;;  %v278_v9 = vperm.slane %v263_v47, 2  ;;  %v279_v10 = vperm.slane %v263_v47, 3 }
  0x31   :  { %v470_v45 = vpack.c.b16 %v466_v40, %v466_v40  ;;  %v471_v46 = vpack.c.b16 %v467_v41, %v467_v41  ;;  %v472_v48 = vpack.c.b16 %v468_v42, %v468_v42  ;;  %v473_v49 = vpack.c.b16 %v469_v43, %v469_v43 }
  0x32   :  { %v302_v11 = vpack.c.bf16 %v277_v2, %v276_v50  ;;  %v303_v51 = vpack.c.bf16 %v279_v10, %v278_v9 }
  0x34   :  { %v546_v54 = vunpack.c.l.b16 %v302_v11  ;;  %v547_v55 = vunpack.c.h.b16 %v302_v11  ;;  %v548_v58 = vunpack.c.l.b16 %v303_v51  ;;  %v549_v59 = vunpack.c.h.b16 %v303_v51 }
  0x35   :  { %420 = vmatmul.bf16.vlgmr.msrb.gmra.mxu0 %v390_v19 }
  0x36   :  { %433 = vmatmul.bf16.vlgmr.msrb.gmra.mxu1 %v391_v21  ;;  %446 = vmatmul.bf16.vlgmr.msrb.gmra.mxu2 %v392_v23  ;;  %v550_v60 = vpack.c.b16 %v546_v54, %v546_v54  ;;  %v551_v61 = vpack.c.b16 %v547_v55, %v547_v55  ;;  %v552_v62 = vpack.c.b16 %v548_v58, %v548_v58 }
  0x37   :  { %459 = vmatmul.bf16.vlgmr.msrb.gmra.mxu3 %v393_v24  ;;  %579 = vmatpush.bf16.xpose.msrb.mxu0 %v5143_v25  ;;  %v553_v63 = vpack.c.b16 %v549_v59, %v549_v59 }
  0x38   :  { %592 = vmatpush.bf16.xpose.msrb.mxu1 %v5145_v26  ;;  %605 = vmatpush.bf16.xpose.msrb.mxu2 %v5147_v27 }
  0x39   :  { %618 = vmatpush.bf16.xpose.msrb.mxu3 %v5149_v28 }
  0x45   :  { %500 = vmatmul.bf16.vlgmr.msra.gmra.mxu0 %v470_v45 }
  0x46   :  { %513 = vmatmul.bf16.vlgmr.msra.gmra.mxu1 %v471_v46  ;;  %526 = vmatmul.bf16.vlgmr.msra.gmra.mxu2 %v472_v48 }
  0x47   :  { %539 = vmatmul.bf16.vlgmr.msra.gmra.mxu3 %v473_v49 }
  0x55   :  { %580 = vmatmul.bf16.vlgmr.msrb.gmra.mxu0 %v550_v60 }
  0x56   :  { %593 = vmatmul.bf16.vlgmr.msrb.gmra.mxu1 %v551_v61  ;;  %606 = vmatmul.bf16.vlgmr.msrb.gmra.mxu2 %v552_v62 }
  0x57   :  { %619 = vmatmul.bf16.vlgmr.msrb.gmra.mxu3 %v553_v63 }
  0xa2   :  { %v341_v0 = vpop.f32.mrf.mxu0 }
  0xa3   :  { %v354_v1 = vpop.f32.mrf.mxu1 }
  0xa4   :  { %v355_v3 = vadd.f32 %v354_v1, %v341_v0 }
  0xa9   :  { %v367_v4 = vpop.f32.mrf.mxu2 }
  0xaa   :  { %v380_v5 = vpop.f32.mrf.mxu3  ;;  %v368_v6 = vadd.f32 %v367_v4, %v355_v3  ;;  %v343_v7 = vpop.f32.mrf.mxu0 }
  0xab   :  { %v356_v8 = vpop.f32.mrf.mxu1 }
  0xac   :  { %v381_v12 = vadd.f32 %v380_v5, %v368_v6 }
  0xae   :  { %v625_v13 = vsel %vm6642_vm10, %v381_v12, -inf }
  0xaf   :  { %626 = vmax.xlane.f32.xlu0 %v625_v13 }
  0xb1   :  { %v369_v18 = vpop.f32.mrf.mxu2 }
  0xb2   :  { %v382_v19 = vpop.f32.mrf.mxu3  ;;  %v421_v21 = vpop.f32.mrf.mxu0 }
  0xb3   :  { %v434_v22 = vpop.f32.mrf.mxu1 }
  0xb4   :  { %v435_v23 = vadd.f32 %v434_v22, %v421_v21 }
  0xb9   :  { %v447_v24 = vpop.f32.mrf.mxu2 }
  0xba   :  { %v460_v29 = vpop.f32.mrf.mxu3  ;;  %v448_v30 = vadd.f32 %v447_v24, %v435_v23  ;;  %v423_v31 = vpop.f32.mrf.mxu0 }
  0xbb   :  { %v436_v35 = vpop.f32.mrf.mxu1 }
  0xbc   :  { %v461_v36 = vadd.f32 %v460_v29, %v448_v30 }
  0xbe   :  { %v628_v37 = vsel %vm6642_vm10, %v461_v36, -inf }
  0xbf   :  { %629 = vmax.xlane.f32.xlu0 %v628_v37  ;;  %v5182_v37 = vsel %vm677_vm11, %v5088_v15, 0 }
  0xc0   :  { %710 = vmatpush.bf16.msra.mxu1 %v5182_v37 }
  0xc1   :  { %v449_v38 = vpop.f32.mrf.mxu2 }
  0xc2   :  { %v462_v39 = vpop.f32.mrf.mxu3  ;;  %v501_v40 = vpop.f32.mrf.mxu0  ;;  %v5186_v38 = vsel %vm677_vm11, %v5090_v16, 0 }
  0xc3   :  { %v514_v41 = vpop.f32.mrf.mxu1  ;;  %v5190_v39 = vsel %vm677_vm11, %v5092_v17, 0  ;;  %723 = vmatpush.bf16.msra.mxu2 %v5186_v38 }
  0xc4   :  { %v515_v42 = vadd.f32 %v514_v41, %v501_v40  ;;  %736 = vmatpush.bf16.msra.mxu3 %v5190_v39  ;;  %v5198_v40 = vsel %vm677_vm11, %v5100_v20, 0  ;;  %v5202_v41 = vsel %vm677_vm11, %v5111_v32, 0 }
  0xc5   :  { %777 = vmatpush.bf16.msrb.mxu1 %v5202_v41 }
  0xc9   :  { %v527_v43 = vpop.f32.mrf.mxu2 }
  0xca   :  { %v540_v44 = vpop.f32.mrf.mxu3  ;;  %v528_v45 = vadd.f32 %v527_v43, %v515_v42  ;;  %v503_v46 = vpop.f32.mrf.mxu0  ;;  %v5206_v42 = vsel %vm677_vm11, %v5113_v33, 0  ;;  %v5210_v43 = vsel %vm677_vm11, %v5115_v34, 0 }
  0xcb   :  { %v516_v47 = vpop.f32.mrf.mxu1  ;;  %6673 = vst [vmem:[#allocation24_spill] sm:$0xff] %v5210_v43  ;;  %790 = vmatpush.bf16.msrb.mxu2 %v5206_v42  ;;  %803 = vmatpush.bf16.msrb.mxu3 %v5210_v43 }
  0xcc   :  { %v541_v48 = vadd.f32 %v540_v44, %v528_v45 }
  0xce   :  { %v631_v49 = vsel %vm6642_vm10, %v541_v48, -inf }
  0xcf   :  { %632 = vmax.xlane.f32.xlu1 %v631_v49  ;;  %v5222_v49 = vsel %vm677_vm11, %v5126_v53, 0 }
  0xd0   :  { %6675 = vst [vmem:[#allocation26_spill] sm:$0xff] %v5222_v49 }
  0xd1   :  { %v529_v50 = vpop.f32.mrf.mxu2 }
  0xd2   :  { %v542_v2 = vpop.f32.mrf.mxu3  ;;  %v581_v9 = vpop.f32.mrf.mxu0  ;;  %v5228_v50 = vsel %vm677_vm11, %v5128_v56, 0 }
  0xd3   :  { %v594_v10 = vpop.f32.mrf.mxu1  ;;  %6676 = vst [vmem:[#allocation27_spill] sm:$0xff] %v5228_v50  ;;  %v5232_v2 = vsel %vm677_vm11, %v5130_v57, 0 }
  0xd4   :  { %v595_v11 = vadd.f32 %v594_v10, %v581_v9  ;;  %6677 = vst [vmem:[#allocation28_spill] sm:$0xff] %v5232_v2 }
  0xd9   :  { %v607_v51 = vpop.f32.mrf.mxu2 }
  0xda   :  { %v620_v54 = vpop.f32.mrf.mxu3  ;;  %v608_v55 = vadd.f32 %v607_v51, %v595_v11  ;;  %v583_v58 = vpop.f32.mrf.mxu0 }
  0xdb   :  { %v596_v59 = vpop.f32.mrf.mxu1  ;;  %v5252_v58 = vsel %vm677_vm11, %v5147_v27, 0 }
  0xdc   :  { %v621_v60 = vadd.f32 %v620_v54, %v608_v55  ;;  %v5242_v54 = vsel %vm677_vm11, %v5143_v25, 0  ;;  %v5246_v55 = vsel %vm677_vm11, %v5145_v26, 0  ;;  %6680 = vst [vmem:[#allocation31_spill] sm:$0xff] %v5252_v58  ;;  %v5256_v59 = vsel %vm677_vm11, %v5149_v28, 0 }
  0xdd   :  { %6678 = vst [vmem:[#allocation29_spill] sm:$0xff] %v5242_v54 }
  0xde   :  { %v634_v61 = vsel %vm6642_vm10, %v621_v60, -inf  ;;  %6679 = vst [vmem:[#allocation30_spill] sm:$0xff] %v5246_v55 }
  0xdf   :  { %635 = vmax.xlane.f32.xlu1 %v634_v61  ;;  %6681 = vst [vmem:[#allocation32_spill] sm:$0xff] %v5256_v59 }
  0xe1   :  { %v609_v62 = vpop.f32.mrf.mxu2 }
  0xe2   :  { %v622_v63 = vpop.f32.mrf.mxu3 }
 0x122   :  { %v627_v0 = vpop.xlane.xlu0 %626 }
 0x123   :  { %v637_v1 = vsub.f32 %v381_v12, %v627_v0 }
 0x125   :  { %v641_v3 = vmul.f32 1.442695, %v637_v1 }
 0x127   :  { %4798 = vpow2.f32 %v641_v3 }
 0x12d   :  { %v4799_v4 = vpop.eup %4798 }
 0x12e   :  { %v649_v5 = vsel %vm6642_vm10, %v4799_v4, 0.0 }
 0x12f   :  { %650 = vadd.xlane.f32.xlu2 %v649_v5  ;;  %v4232_v5 = vld [vmem:[#allocation7 + $0xe0] sm:$0xf] }
 0x132   :  { %v630_v6 = vpop.xlane.xlu0 %629 }
 0x133   :  { %v638_v7 = vsub.f32 %v461_v36, %v630_v6  ;;  %v5178_v36 = vsel %vm677_vm11, %v5086_v14, 0  ;;  %v4692_v6 = vld [vmem:[#allocation7 + $0xec] sm:$0xf0] }
 0x134   :  { %697 = vmatpush.bf16.msra.mxu0 %v5178_v36 }
 0x135   :  { %v643_v8 = vmul.f32 1.442695, %v638_v7  ;;  %v4360_v7 = vld [vmem:[#allocation7 + $0x1e0] sm:$0xf] }
 0x137   :  { %4800 = vpow2.f32 %v643_v8  ;;  %v5274_v8 = vor.u32 %v4692_v6, %v4232_v5  ;;  %v4312_v5 = vld [vmem:[#allocation7 + $0x180] sm:$0xf] }
 0x138   :  { %764 = vmatpush.bf16.msrb.mxu0 %v5198_v40 }
 0x139   :  { %6682 = vst [vmem:[#allocation33_spill] sm:$0xff] %v5274_v8 }
 0x13d   :  { %v4801_v13 = vpop.eup %4800 }
 0x13e   :  { %v652_v18 = vsel %vm6642_vm10, %v4801_v13, 0.0 }
 0x13f   :  { %653 = vadd.xlane.f32.xlu2 %v652_v18 }
 0x142   :  { %v633_v19 = vpop.xlane.xlu1 %632 }
 0x143   :  { %v639_v21 = vsub.f32 %v541_v48, %v633_v19  ;;  %v5218_v48 = vsel %vm677_vm11, %v5124_v52, 0  ;;  %v4216_v19 = vld [vmem:[#allocation7 + $0xc0] sm:$0xf] }
 0x144   :  { %6674 = vst [vmem:[#allocation25_spill] sm:$0xff] %v5218_v48 }
 0x145   :  { %v645_v22 = vmul.f32 1.442695, %v639_v21  ;;  %v4688_v21 = vld [vmem:[#allocation7 + $0xcc] sm:$0xf0] }
 0x147   :  { %4802 = vpow2.f32 %v645_v22  ;;  %v4344_v22 = vld [vmem:[#allocation7 + $0x1c0] sm:$0xf] }
 0x14d   :  { %v5168_v23 = vpop.eup %4802 }
 0x14e   :  { %v655_v12 = vsel %vm6642_vm10, %v5168_v23, 0.0 }
 0x14f   :  { %656 = vadd.xlane.f32.xlu0 %v655_v12  ;;  %v4720_v12 = vld [vmem:[#allocation7 + $0x1cc] sm:$0xf0] }
 0x152   :  { %v636_v24 = vpop.xlane.xlu1 %635 }
 0x153   :  { %v640_v29 = vsub.f32 %v621_v60, %v636_v24  ;;  %v5282_v24 = vor.u32 %v4720_v12, %v4344_v22  ;;  %v4584_v22 = vld [vmem:[#allocation7 + $0x3a0] sm:$0xf] }
 0x155   :  { %v647_v30 = vmul.f32 1.442695, %v640_v29  ;;  %6685 = vst [vmem:[#allocation36_spill] sm:$0xff] %v5282_v24  ;;  %v4488_v29 = vld [vmem:[#allocation7 + $0x2e0] sm:$0xf] }
 0x157   :  { %4804 = vpow2.f32 %v647_v30  ;;  %v4756_v30 = vld [vmem:[#allocation7 + $0x2ec] sm:$0xf0] }
 0x15d   :  { %v5172_v31 = vpop.eup %4804 }
 0x15e   :  { %v658_v35 = vsel %vm6642_vm10, %v5172_v31, 0.0 }
 0x15f   :  { %659 = vadd.xlane.f32.xlu1 %v658_v35  ;;  %v5285_v35 = vor.u32 %v4756_v30, %v4488_v29  ;;  %v4780_v29 = vld [vmem:[#allocation7 + $0x3ac] sm:$0xf0] }
 0x160   :  { %v5312_v30 = vor.u32 %v4780_v29, %v4584_v22  ;;  %v4704_v22 = vld [vmem:[#allocation7 + $0x14c] sm:$0xf0] }
 0x161   :  { %6686 = vst [vmem:[#allocation37_spill] sm:$0xff] %v5285_v35 }
 0x162   :  { %6695 = vst [vmem:[#allocation46_spill] sm:$0xff] %v5312_v30 }
 0x1a2   :  { %v651_v44 = vpop.xlane.xlu2 %650 }
 0x1a3   :  { %4806 = vrcp.f32 %v651_v44  ;;  %v4788_v44 = vld [vmem:[#allocation7 + $0x3ec] sm:$0xf0] }
 0x1a9   :  { %v4807_v45 = vpop.eup %4806 }
 0x1aa   :  { %v665_v46 = vmul.f32 %v4807_v45, %v4799_v4 }
 0x1ac   :  { %v669_v47 = vpack.c.bf16 %v665_v46, %v665_v46  ;;  %v4200_v46 = vld [vmem:[#allocation7 + $0xa0] sm:$0xf] }
 0x1ae   :  { %4102 = vmatmul.msk.bf16.vlgmr.msra.gmra.mxu0 %vm6641_vm12, %v669_v47  ;;  %4103 = vmatmul.msk.bf16.vlgmr.msra.gmra.mxu1 %vm6641_vm12, %v669_v47 }
 0x1af   :  { %4104 = vmatmul.msk.bf16.vlgmr.msra.gmra.mxu2 %vm6641_vm12, %v669_v47  ;;  %4105 = vmatmul.msk.bf16.vlgmr.msra.gmra.mxu3 %vm6641_vm12, %v669_v47  ;;  %v4684_v47 = vld [vmem:[#allocation7 + $0xac] sm:$0xf0] }
 0x1b0   :  { %831 = vmatpush.bf16.msra.mxu0 %v5218_v48  ;;  %844 = vmatpush.bf16.msra.mxu1 %v5222_v49 }
 0x1b1   :  { %857 = vmatpush.bf16.msra.mxu2 %v5228_v50  ;;  %870 = vmatpush.bf16.msra.mxu3 %v5232_v2 }
 0x1b2   :  { %v654_v9 = vpop.xlane.xlu2 %653 }
 0x1b3   :  { %4808 = vrcp.f32 %v654_v9  ;;  %v4328_v9 = vld [vmem:[#allocation7 + $0x1a0] sm:$0xf] }
 0x1b9   :  { %v4809_v10 = vpop.eup %4808 }
 0x1ba   :  { %v666_v11 = vmul.f32 %v4809_v10, %v4801_v13  ;;  %v4724_v13 = vld [vmem:[#allocation7 + $0x1ec] sm:$0xf0]  ;;  %v5291_v10 = vor.u32 %v4684_v47, %v4200_v46  ;;  %v4296_v46 = vld [vmem:[#allocation7 + $0x160] sm:$0xf] }
 0x1bb   :  { %v5276_v18 = vor.u32 %v4724_v13, %v4360_v7  ;;  %v4712_v7 = vld [vmem:[#allocation7 + $0x18c] sm:$0xf0] }
 0x1bc   :  { %v670_v51 = vpack.c.bf16 %v666_v11, %v666_v11  ;;  %6688 = vst [vmem:[#allocation39_spill] sm:$0xff] %v5291_v10  ;;  %v4716_v11 = vld [vmem:[#allocation7 + $0x1ac] sm:$0xf0]  ;;  %v5306_v13 = vor.u32 %v4712_v7, %v4312_v5  ;;  %v4152_v5 = vld [vmem:[#allocation7 + $0x40] sm:$0xf] }
 0x1bd   :  { %6683 = vst [vmem:[#allocation34_spill] sm:$0xff] %v5276_v18  ;;  %v4672_v7 = vld [vmem:[#allocation7 + $0x4c] sm:$0xf0] }
 0x1be   :  { %4106 = vmatmul.msk.bf16.vlgmr.msrb.gmra.mxu0 %vm6641_vm12, %v670_v51  ;;  %4107 = vmatmul.msk.bf16.vlgmr.msrb.gmra.mxu1 %vm6641_vm12, %v670_v51  ;;  %6693 = vst [vmem:[#allocation44_spill] sm:$0xff] %v5306_v13 }
 0x1bf   :  { %4108 = vmatmul.msk.bf16.vlgmr.msrb.gmra.mxu2 %vm6641_vm12, %v670_v51  ;;  %4109 = vmatmul.msk.bf16.vlgmr.msrb.gmra.mxu3 %vm6641_vm12, %v670_v51  ;;  %v5294_v51 = vor.u32 %v4716_v11, %v4328_v9  ;;  %v4708_v9 = vld [vmem:[#allocation7 + $0x16c] sm:$0xf0] }
 0x1c0   :  { %898 = vmatpush.bf16.msrb.mxu0 %v5242_v54  ;;  %911 = vmatpush.bf16.msrb.mxu1 %v5246_v55  ;;  %v5318_v11 = vor.u32 %v4708_v9, %v4296_v46  ;;  %v4552_v46 = vld [vmem:[#allocation7 + $0x360] sm:$0xf] }
 0x1c1   :  { %924 = vmatpush.bf16.msrb.mxu2 %v5252_v58  ;;  %937 = vmatpush.bf16.msrb.mxu3 %v5256_v59  ;;  %6689 = vst [vmem:[#allocation40_spill] sm:$0xff] %v5294_v51 }
 0x1c2   :  { %v657_v60 = vpop.xlane.xlu0 %656  ;;  %6697 = vst [vmem:[#allocation48_spill] sm:$0xff] %v5318_v11 }
 0x1c3   :  { %4810 = vrcp.f32 %v657_v60  ;;  %v4472_v60 = vld [vmem:[#allocation7 + $0x2c0] sm:$0xf] }
 0x1c9   :  { %v4811_v61 = vpop.eup %4810 }
 0x1ca   :  { %v667_v62 = vmul.f32 %v4811_v61, %v5168_v23  ;;  %v5280_v23 = vor.u32 %v4688_v21, %v4216_v19  ;;  %v4752_v61 = vld [vmem:[#allocation7 + $0x2cc] sm:$0xf0]  ;;  %v4456_v19 = vld [vmem:[#allocation7 + $0x2a0] sm:$0xf] }
 0x1cb   :  { %v4748_v21 = vld [vmem:[#allocation7 + $0x2ac] sm:$0xf0] }
 0x1cc   :  { %v671_v63 = vpack.c.bf16 %v667_v62, %v667_v62  ;;  %6684 = vst [vmem:[#allocation35_spill] sm:$0xff] %v5280_v23  ;;  %v4600_v62 = vld [vmem:[#allocation7 + $0x3c0] sm:$0xf]  ;;  %v5309_v12 = vor.u32 %v4748_v21, %v4456_v19  ;;  %v5327_v21 = vor.u32 %v4672_v7, %v4152_v5 }
 0x1cd   :  { %v4280_v19 = vld [vmem:[#allocation7 + $0x140] sm:$0xf] }
 0x1ce   :  { %4110 = vmatmul.msk.bf16.vlgmr.msra.gmra.mxu0 %vm6641_vm12, %v671_v63  ;;  %4111 = vmatmul.msk.bf16.vlgmr.msra.gmra.mxu1 %vm6641_vm12, %v671_v63  ;;  %6694 = vst [vmem:[#allocation45_spill] sm:$0xff] %v5309_v12  ;;  %v5330_v29 = vor.u32 %v4704_v22, %v4280_v19  ;;  %v4264_v5 = vld [vmem:[#allocation7 + $0x120] sm:$0xf]  ;;  %v4700_v19 = vld [vmem:[#allocation7 + $0x12c] sm:$0xf0] }
 0x1cf   :  { %4112 = vmatmul.msk.bf16.vlgmr.msra.gmra.mxu2 %vm6641_vm12, %v671_v63  ;;  %4113 = vmatmul.msk.bf16.vlgmr.msra.gmra.mxu3 %vm6641_vm12, %v671_v63  ;;  %v5297_v63 = vor.u32 %v4752_v61, %v4472_v60  ;;  %v4440_v60 = vld [vmem:[#allocation7 + $0x280] sm:$0xf]  ;;  %v4744_v61 = vld [vmem:[#allocation7 + $0x28c] sm:$0xf0]  ;;  %6700 = vst [vmem:[#allocation51_spill] sm:$0xff] %v5327_v21  ;;  %v5342_v22 = vor.u32 %v4700_v19, %v4264_v5 }
 0x1d0   :  { %1663 = vmatpush.bf16.msra.mxu0 %v5274_v8  ;;  %1676 = vmatpush.bf16.msra.mxu1 %v5276_v18  ;;  %6701 = vst [vmem:[#allocation52_spill] sm:$0xff] %v5330_v29  ;;  %v4696_v5 = vld [vmem:[#allocation7 + $0x10c] sm:$0xf0]  ;;  %v4690_v19 = vld [vmem:[#allocation7 + $0xe4] sm:$0xf] }
 0x1d1   :  { %1689 = vmatpush.bf16.msra.mxu2 %v5285_v35  ;;  %6690 = vst [vmem:[#allocation41_spill] sm:$0xff] %v5297_v63 }
 0x1d2   :  { %v660_v0 = vpop.xlane.xlu1 %659  ;;  %6705 = vst [vmem:[#allocation56_spill] sm:$0xff] %v5342_v22 }
 0x1d3   :  { %4812 = vrcp.f32 %v660_v0  ;;  %v4784_v0 = vld [vmem:[#allocation7 + $0x3cc] sm:$0xf0] }
 0x1d4   :  { %1664 = vmatpush.bf16.msra.mxu0 %v5280_v23  ;;  %1677 = vmatpush.bf16.msra.mxu1 %v5282_v24 }
 0x1d5   :  { %1690 = vmatpush.bf16.msra.mxu2 %v5297_v63 }
 0x1d8   :  { %1665 = vmatpush.bf16.msra.mxu0 %v5291_v10  ;;  %1678 = vmatpush.bf16.msra.mxu1 %v5294_v51 }
 0x1d9   :  { %v4813_v1 = vpop.eup %4812  ;;  %1691 = vmatpush.bf16.msra.mxu2 %v5309_v12 }
 0x1da   :  { %v668_v3 = vmul.f32 %v4813_v1, %v5172_v31  ;;  %v4616_v31 = vld [vmem:[#allocation7 + $0x3e0] sm:$0xf]  ;;  %v5300_v1 = vor.u32 %v4784_v0, %v4600_v62  ;;  %v5321_v0 = vor.u32 %v4744_v61, %v4440_v60  ;;  %v4772_v60 = vld [vmem:[#allocation7 + $0x36c] sm:$0xf0] }
 0x1db   :  { %v5288_v45 = vor.u32 %v4788_v44, %v4616_v31  ;;  %v4168_v31 = vld [vmem:[#allocation7 + $0x60] sm:$0xf]  ;;  %v4676_v44 = vld [vmem:[#allocation7 + $0x6c] sm:$0xf0]  ;;  %v5336_v61 = vor.u32 %v4772_v60, %v4552_v46 }
 0x1dc   :  { %v672_v4 = vpack.c.bf16 %v668_v3, %v668_v3  ;;  %6691 = vst [vmem:[#allocation42_spill] sm:$0xff] %v5300_v1  ;;  %v4184_v3 = vld [vmem:[#allocation7 + $0x80] sm:$0xf]  ;;  %1679 = vmatpush.bf16.msra.mxu1 %v5306_v13  ;;  %v5315_v47 = vor.u32 %v4676_v44, %v4168_v31  ;;  %v4740_v44 = vld [vmem:[#allocation7 + $0x26c] sm:$0xf0] }
 0x1dd   :  { %6687 = vst [vmem:[#allocation38_spill] sm:$0xff] %v5288_v45  ;;  %1702 = vmatpush.bf16.msra.mxu3 %v5288_v45  ;;  %v4568_v62 = vld [vmem:[#allocation7 + $0x380] sm:$0xf]  ;;  %1692 = vmatpush.bf16.msra.mxu2 %v5321_v0  ;;  %v4768_v46 = vld [vmem:[#allocation7 + $0x34c] sm:$0xf0] }
 0x1de   :  { %4114 = vmatmul.msk.bf16.vlgmr.msrb.gmra.mxu0 %vm6641_vm12, %v672_v4  ;;  %4115 = vmatmul.msk.bf16.vlgmr.msrb.gmra.mxu1 %vm6641_vm12, %v672_v4  ;;  %6696 = vst [vmem:[#allocation47_spill] sm:$0xff] %v5315_v47  ;;  %v4424_v31 = vld [vmem:[#allocation7 + $0x260] sm:$0xf]  ;;  %v4618_v13 = vld [vmem:[#allocation7 + $0x3f0] sm:$0xf0] }
 0x1df   :  { %4116 = vmatmul.msk.bf16.vlgmr.msrb.gmra.mxu2 %vm6641_vm12, %v672_v4  ;;  %4117 = vmatmul.msk.bf16.vlgmr.msrb.gmra.mxu3 %vm6641_vm12, %v672_v4  ;;  %v4680_v4 = vld [vmem:[#allocation7 + $0x8c] sm:$0xf0]  ;;  %6698 = vst [vmem:[#allocation49_spill] sm:$0xff] %v5321_v0  ;;  %v5333_v9 = vor.u32 %v4740_v44, %v4424_v31  ;;  %v4536_v44 = vld [vmem:[#allocation7 + $0x340] sm:$0xf] }
 0x1e0   :  { %v5303_v6 = vor.u32 %v4680_v4, %v4184_v3  ;;  %v4776_v3 = vld [vmem:[#allocation7 + $0x38c] sm:$0xf0]  ;;  %1680 = vmatpush.bf16.msra.mxu1 %v5318_v11  ;;  %6703 = vst [vmem:[#allocation54_spill] sm:$0xff] %v5336_v61  ;;  %v5348_v60 = vor.u32 %v4768_v46, %v4536_v44  ;;  %v4234_v11 = vld [vmem:[#allocation7 + $0xf0] sm:$0xf0] }
 0x1e1   :  { %1703 = vmatpush.bf16.msra.mxu3 %v5300_v1  ;;  %v5324_v4 = vor.u32 %v4776_v3, %v4568_v62  ;;  %6702 = vst [vmem:[#allocation53_spill] sm:$0xff] %v5333_v9  ;;  %v4136_v62 = vld [vmem:[#allocation7 + $0x20] sm:$0xf]  ;;  %v4668_v3 = vld [vmem:[#allocation7 + $0x2c] sm:$0xf0]  ;;  %1693 = vmatpush.bf16.msra.mxu2 %v5333_v9 }
 0x1e2   :  { %6692 = vst [vmem:[#allocation43_spill] sm:$0xff] %v5303_v6  ;;  %1666 = vmatpush.bf16.msra.mxu0 %v5303_v6  ;;  %v5339_v7 = vor.u32 %v4668_v3, %v4136_v62  ;;  %v4736_v31 = vld [vmem:[#allocation7 + $0x24c] sm:$0xf0]  ;;  %v4120_v9 = vld [vmem:[#allocation7] sm:$0xf] }
 0x1e3   :  { %6699 = vst [vmem:[#allocation50_spill] sm:$0xff] %v5324_v4  ;;  %v4664_v62 = vld [vmem:[#allocation7 + $0xc] sm:$0xf0]  ;;  %v4248_v3 = vld [vmem:[#allocation7 + $0x100] sm:$0xf] }
 0x1e4   :  { %1681 = vmatpush.bf16.msra.mxu1 %v5330_v29  ;;  %6704 = vst [vmem:[#allocation55_spill] sm:$0xff] %v5339_v7  ;;  %v4392_v44 = vld [vmem:[#allocation7 + $0x220] sm:$0xf]  ;;  %v4490_v0 = vld [vmem:[#allocation7 + $0x2f0] sm:$0xf0] }
 0x1e5   :  { %1704 = vmatpush.bf16.msra.mxu3 %v5312_v30  ;;  %6707 = vst [vmem:[#allocation58_spill] sm:$0xff] %v5348_v60  ;;  %v4778_v6 = vld [vmem:[#allocation7 + $0x3a4] sm:$0xf]  ;;  %v4282_v30 = vld [vmem:[#allocation7 + $0x150] sm:$0xf0] }
 0x1e6   :  { %1667 = vmatpush.bf16.msra.mxu0 %v5315_v47  ;;  %v4732_v47 = vld [vmem:[#allocation7 + $0x22c] sm:$0xf0]  ;;  %v4240_v45 = vld [vmem:[#allocation7 + $0xe8] sm:$0xf] }
 0x1e8   :  { %1682 = vmatpush.bf16.msra.mxu1 %v5342_v22  ;;  %v4362_v22 = vld [vmem:[#allocation7 + $0x1f0] sm:$0xf0] }
 0x1e9   :  { %1705 = vmatpush.bf16.msra.mxu3 %v5324_v4 }
 0x1ea   :  { %1668 = vmatpush.bf16.msra.mxu0 %v5327_v21  ;;  %v4408_v21 = vld [vmem:[#allocation7 + $0x240] sm:$0xf] }
 0x1eb   :  { %v5345_v29 = vor.u32 %v4736_v31, %v4408_v21  ;;  %v5356_v21 = vor.u32 %v4690_v19, %v4234_v11  ;;  %v4722_v31 = vld [vmem:[#allocation7 + $0x1e4] sm:$0xf] }
 0x1ec   :  { %v5359_v46 = vor.u32 %v4722_v31, %v4362_v22  ;;  %v4686_v11 = vld [vmem:[#allocation7 + $0xc4] sm:$0xf] }
 0x1ed   :  { %1706 = vmatpush.bf16.msra.mxu3 %v5336_v61  ;;  %6706 = vst [vmem:[#allocation57_spill] sm:$0xff] %v5345_v29  ;;  %1694 = vmatpush.bf16.msra.mxu2 %v5345_v29  ;;  %v5351_v61 = vor.u32 %v4664_v62, %v4120_v9  ;;  %v4520_v29 = vld [vmem:[#allocation7 + $0x320] sm:$0xf]  ;;  %v4764_v9 = vld [vmem:[#allocation7 + $0x32c] sm:$0xf0]  ;;  %v5363_v62 = vor.u32 %v4732_v47, %v4392_v44 }
 0x1ee   :  { %1669 = vmatpush.bf16.msra.mxu0 %v5339_v7  ;;  %v5354_v7 = vor.u32 %v4696_v5, %v4248_v3  ;;  %6710 = vst [vmem:[#allocation61_spill] sm:$0xff] %v5356_v21  ;;  %v5365_v3 = vor.u32 %v4764_v9, %v4520_v29  ;;  %v4218_v5 = vld [vmem:[#allocation7 + $0xd0] sm:$0xf0]  ;;  %v4718_v19 = vld [vmem:[#allocation7 + $0x1c4] sm:$0xf] }
 0x1ef   :  { %6708 = vst [vmem:[#allocation59_spill] sm:$0xff] %v5351_v61  ;;  %v5374_v31 = vor.u32 %v4686_v11, %v4218_v5  ;;  %v4376_v47 = vld [vmem:[#allocation7 + $0x200] sm:$0xf]  ;;  %v4728_v44 = vld [vmem:[#allocation7 + $0x20c] sm:$0xf0] }
 0x1f0   :  { %6709 = vst [vmem:[#allocation60_spill] sm:$0xff] %v5354_v7  ;;  %1683 = vmatpush.bf16.msra.mxu1 %v5354_v7  ;;  %v5378_v9 = vor.u32 %v4728_v44, %v4376_v47  ;;  %v4760_v7 = vld [vmem:[#allocation7 + $0x30c] sm:$0xf0]  ;;  %v4714_v47 = vld [vmem:[#allocation7 + $0x1a4] sm:$0xf] }
 0x1f1   :  { %1707 = vmatpush.bf16.msra.mxu3 %v5348_v60  ;;  %6711 = vst [vmem:[#allocation62_spill] sm:$0xff] %v5359_v46  ;;  %1695 = vmatpush.bf16.msra.mxu2 %v5363_v62 }
 0x1f2   :  { %1670 = vmatpush.bf16.msra.mxu0 %v5351_v61  ;;  %6712 = vst [vmem:[#allocation63_spill] sm:$0xff] %v5363_v62  ;;  %v4754_v61 = vld [vmem:[#allocation7 + $0x2e4] sm:$0xf] }
 0x1f3   :  { %6713 = vst [vmem:[#allocation64_spill] sm:$0xff] %v5365_v3  ;;  %v4786_v62 = vld [vmem:[#allocation7 + $0x3e4] sm:$0xf]  ;;  %v5384_v11 = vor.u32 %v4754_v61, %v4490_v0  ;;  %v4474_v61 = vld [vmem:[#allocation7 + $0x2d0] sm:$0xf0] }
 0x1f4   :  { %1728 = vmatpush.bf16.msrb.mxu1 %v5359_v46  ;;  %6714 = vst [vmem:[#allocation65_spill] sm:$0xff] %v5374_v31  ;;  %v4504_v46 = vld [vmem:[#allocation7 + $0x300] sm:$0xf]  ;;  %v5386_v5 = vor.u32 %v4786_v62, %v4618_v13  ;;  %v4750_v0 = vld [vmem:[#allocation7 + $0x2c4] sm:$0xf] }
 0x1f5   :  { %1708 = vmatpush.bf16.msra.mxu3 %v5365_v3  ;;  %6716 = vst [vmem:[#allocation67_spill] sm:$0xff] %v5378_v9  ;;  %v5381_v4 = vor.u32 %v4760_v7, %v4504_v46  ;;  %1696 = vmatpush.bf16.msra.mxu2 %v5378_v9  ;;  %v4330_v7 = vld [vmem:[#allocation7 + $0x1b0] sm:$0xf0]  ;;  %v4782_v13 = vld [vmem:[#allocation7 + $0x3c4] sm:$0xf]  ;;  %v5397_v62 = vor.u32 %v4750_v0, %v4474_v61 }
 0x1f6   :  { %1715 = vmatpush.bf16.msrb.mxu0 %v5356_v21  ;;  %v4346_v21 = vld [vmem:[#allocation7 + $0x1d0] sm:$0xf0]  ;;  %6718 = vst [vmem:[#allocation69_spill] sm:$0xff] %v5384_v11  ;;  %v5394_v46 = vor.u32 %v4714_v47, %v4330_v7  ;;  %v4710_v47 = vld [vmem:[#allocation7 + $0x184] sm:$0xf] }
 0x1f7   :  { %v5376_v29 = vor.u32 %v4718_v19, %v4346_v21  ;;  %6717 = vst [vmem:[#allocation68_spill] sm:$0xff] %v5381_v4  ;;  %v4682_v21 = vld [vmem:[#allocation7 + $0xa4] sm:$0xf]  ;;  %v4202_v19 = vld [vmem:[#allocation7 + $0xb0] sm:$0xf0] }
 0x1f8   :  { %6719 = vst [vmem:[#allocation70_spill] sm:$0xff] %v5386_v5  ;;  %v5390_v44 = vor.u32 %v4682_v21, %v4202_v19  ;;  %v4678_v19 = vld [vmem:[#allocation7 + $0x84] sm:$0xf]  ;;  %v4314_v3 = vld [vmem:[#allocation7 + $0x190] sm:$0xf0] }
 0x1f9   :  { %6715 = vst [vmem:[#allocation66_spill] sm:$0xff] %v5376_v29  ;;  %1729 = vmatpush.bf16.msrb.mxu1 %v5376_v29  ;;  %1709 = vmatpush.bf16.msra.mxu3 %v5381_v4  ;;  %v4602_v29 = vld [vmem:[#allocation7 + $0x3d0] sm:$0xf0]  ;;  %v5410_v0 = vor.u32 %v4710_v47, %v4314_v3  ;;  %v4746_v61 = vld [vmem:[#allocation7 + $0x2a4] sm:$0xf] }
 0x1fa   :  { %1716 = vmatpush.bf16.msrb.mxu0 %v5374_v31  ;;  %6720 = vst [vmem:[#allocation71_spill] sm:$0xff] %v5390_v44  ;;  %1741 = vmatpush.bf16.msrb.mxu2 %v5384_v11  ;;  %v5404_v21 = vor.u32 %v4782_v13, %v4602_v29  ;;  %v4586_v13 = vld [vmem:[#allocation7 + $0x3b0] sm:$0xf0]  ;;  %v4742_v47 = vld [vmem:[#allocation7 + $0x284] sm:$0xf] }
 0x1fb   :  { %6721 = vst [vmem:[#allocation72_spill] sm:$0xff] %v5394_v46 }
 0x1fc   :  { %6722 = vst [vmem:[#allocation73_spill] sm:$0xff] %v5397_v62 }
 0x1fd   :  { %1754 = vmatpush.bf16.msrb.mxu3 %v5386_v5  ;;  %1730 = vmatpush.bf16.msrb.mxu1 %v5394_v46  ;;  %6723 = vst [vmem:[#allocation74_spill] sm:$0xff] %v5404_v21  ;;  %v4186_v5 = vld [vmem:[#allocation7 + $0x90] sm:$0xf0] }
 0x1fe   :  { %1717 = vmatpush.bf16.msrb.mxu0 %v5390_v44  ;;  %v5406_v9 = vor.u32 %v4678_v19, %v4186_v5  ;;  %1742 = vmatpush.bf16.msrb.mxu2 %v5397_v62  ;;  %6725 = vst [vmem:[#allocation76_spill] sm:$0xff] %v5410_v0  ;;  %v4458_v44 = vld [vmem:[#allocation7 + $0x2b0] sm:$0xf0]  ;;  %v4674_v5 = vld [vmem:[#allocation7 + $0x64] sm:$0xf] }
 0x1ff   :  { %v5413_v29 = vor.u32 %v4746_v61, %v4458_v44  ;;  %v4170_v19 = vld [vmem:[#allocation7 + $0x70] sm:$0xf0]  ;;  %v4774_v61 = vld [vmem:[#allocation7 + $0x384] sm:$0xf] }
 0x200   :  { %6724 = vst [vmem:[#allocation75_spill] sm:$0xff] %v5406_v9  ;;  %v5418_v46 = vor.u32 %v4674_v5, %v4170_v19  ;;  %v4442_v44 = vld [vmem:[#allocation7 + $0x290] sm:$0xf0]  ;;  %v4670_v19 = vld [vmem:[#allocation7 + $0x44] sm:$0xf] }
 0x201   :  { %1755 = vmatpush.bf16.msrb.mxu3 %v5404_v21  ;;  %6726 = vst [vmem:[#allocation77_spill] sm:$0xff] %v5413_v29  ;;  %1731 = vmatpush.bf16.msrb.mxu1 %v5410_v0  ;;  %v4298_v21 = vld [vmem:[#allocation7 + $0x170] sm:$0xf0]  ;;  %v5425_v0 = vor.u32 %v4742_v47, %v4442_v44  ;;  %v4702_v62 = vld [vmem:[#allocation7 + $0x144] sm:$0xf] }
 0x202   :  { %1718 = vmatpush.bf16.msrb.mxu0 %v5406_v9  ;;  %6728 = vst [vmem:[#allocation79_spill] sm:$0xff] %v5418_v46  ;;  %1743 = vmatpush.bf16.msrb.mxu2 %v5413_v29  ;;  %v4154_v29 = vld [vmem:[#allocation7 + $0x50] sm:$0xf0]  ;;  %v5438_v47 = vor.u32 %v4702_v62, %v4282_v30  ;;  %v4734_v62 = vld [vmem:[#allocation7 + $0x244] sm:$0xf] }
 0x203   :  { %6730 = vst [vmem:[#allocation81_spill] sm:$0xff] %v5425_v0  ;;  %v4426_v44 = vld [vmem:[#allocation7 + $0x270] sm:$0xf0] }
 0x204   :  { %6733 = vst [vmem:[#allocation84_spill] sm:$0xff] %v5438_v47 }
 0x206   :  { %1719 = vmatpush.bf16.msrb.mxu0 %v5418_v46  ;;  %1744 = vmatpush.bf16.msrb.mxu2 %v5425_v0  ;;  %v4698_v46 = vld [vmem:[#allocation7 + $0x124] sm:$0xf] }
 0x22b   :  { %v5368_v60 = vpop.f32.mrf.mxu0  ;;  %v5370_v22 = vpop.f32.mrf.mxu1 }
 0x232   :  { %v5399_v31 = vpop.f32.mrf.mxu2  ;;  %v5401_v4 = vpop.f32.mrf.mxu3 }
 0x233   :  { %v701_v7 = vpop.f32.mrf.mxu0  ;;  %v714_v11 = vpop.f32.mrf.mxu1 }
 0x234   :  { %v5416_v11 = vor.u32 %v4778_v6, %v4586_v13  ;;  %v4706_v7 = vld [vmem:[#allocation7 + $0x164] sm:$0xf]  ;;  %v4570_v6 = vld [vmem:[#allocation7 + $0x390] sm:$0xf0] }
 0x235   :  { %v5422_v3 = vor.u32 %v4706_v7, %v4298_v21  ;;  %v5428_v5 = vor.u32 %v4774_v61, %v4570_v6  ;;  %v5434_v7 = vor.u32 %v4670_v19, %v4154_v29  ;;  %v4770_v61 = vld [vmem:[#allocation7 + $0x364] sm:$0xf]  ;;  %v4138_v19 = vld [vmem:[#allocation7 + $0x30] sm:$0xf0] }
 0x236   :  { %6727 = vst [vmem:[#allocation78_spill] sm:$0xff] %v5416_v11  ;;  %1756 = vmatpush.bf16.msrb.mxu3 %v5416_v11  ;;  %v4666_v29 = vld [vmem:[#allocation7 + $0x24] sm:$0xf] }
 0x237   :  { %6729 = vst [vmem:[#allocation80_spill] sm:$0xff] %v5422_v3  ;;  %1732 = vmatpush.bf16.msrb.mxu1 %v5422_v3  ;;  %1720 = vmatpush.bf16.msrb.mxu0 %v5434_v7  ;;  %v5446_v0 = vor.u32 %v4666_v29, %v4138_v19  ;;  %v4662_v19 = vld [vmem:[#allocation7 + $0x4] sm:$0xf] }
 0x238   :  { %6731 = vst [vmem:[#allocation82_spill] sm:$0xff] %v5428_v5 }
 0x239   :  { %6732 = vst [vmem:[#allocation83_spill] sm:$0xff] %v5434_v7 }
 0x23a   :  { %v727_v13 = vpop.f32.mrf.mxu2  ;;  %v740_v9 = vpop.f32.mrf.mxu3  ;;  %1757 = vmatpush.bf16.msrb.mxu3 %v5428_v5  ;;  %6736 = vst [vmem:[#allocation87_spill] sm:$0xff] %v5446_v0  ;;  %v4266_v5 = vld [vmem:[#allocation7 + $0x130] sm:$0xf0] }
 0x23b   :  { %v5430_v11 = vpop.f32.mrf.mxu0  ;;  %v5432_v21 = vpop.f32.mrf.mxu1  ;;  %v4738_v9 = vld [vmem:[#allocation7 + $0x264] sm:$0xf]  ;;  %v4554_v13 = vld [vmem:[#allocation7 + $0x370] sm:$0xf0]  ;;  %1733 = vmatpush.bf16.msrb.mxu1 %v5438_v47  ;;  %v5450_v30 = vor.u32 %v4698_v46, %v4266_v5  ;;  %1721 = vmatpush.bf16.msrb.mxu0 %v5446_v0 }
 0x23c   :  { %v5441_v6 = vor.u32 %v4738_v9, %v4426_v44  ;;  %v5444_v3 = vor.u32 %v4770_v61, %v4554_v13  ;;  %v4410_v9 = vld [vmem:[#allocation7 + $0x250] sm:$0xf0]  ;;  %v4766_v61 = vld [vmem:[#allocation7 + $0x344] sm:$0xf] }
 0x23d   :  { %6737 = vst [vmem:[#allocation88_spill] sm:$0xff] %v5450_v30  ;;  %v5453_v44 = vor.u32 %v4734_v62, %v4410_v9  ;;  %v4538_v13 = vld [vmem:[#allocation7 + $0x350] sm:$0xf0]  ;;  %v4694_v46 = vld [vmem:[#allocation7 + $0x104] sm:$0xf] }
 0x23e   :  { %6734 = vst [vmem:[#allocation85_spill] sm:$0xff] %v5441_v6  ;;  %1745 = vmatpush.bf16.msrb.mxu2 %v5441_v6  ;;  %1758 = vmatpush.bf16.msrb.mxu3 %v5444_v3  ;;  %v5460_v29 = vor.u32 %v4766_v61, %v4538_v13  ;;  %v4250_v0 = vld [vmem:[#allocation7 + $0x110] sm:$0xf0]  ;;  %v4730_v9 = vld [vmem:[#allocation7 + $0x224] sm:$0xf] }
 0x23f   :  { %6735 = vst [vmem:[#allocation86_spill] sm:$0xff] %v5444_v3  ;;  %1734 = vmatpush.bf16.msrb.mxu1 %v5450_v30  ;;  %v4122_v3 = vld [vmem:[#allocation7 + $0x10] sm:$0xf0]  ;;  %v5466_v62 = vor.u32 %v4694_v46, %v4250_v0  ;;  %v4762_v61 = vld [vmem:[#allocation7 + $0x324] sm:$0xf] }
 0x240   :  { %6738 = vst [vmem:[#allocation89_spill] sm:$0xff] %v5453_v44  ;;  %v5462_v12 = vor.u32 %v4662_v19, %v4122_v3  ;;  %v4394_v30 = vld [vmem:[#allocation7 + $0x230] sm:$0xf0]  ;;  %v4726_v3 = vld [vmem:[#allocation7 + $0x204] sm:$0xf] }
 0x241   :  { %6739 = vst [vmem:[#allocation90_spill] sm:$0xff] %v5460_v29  ;;  %v4522_v13 = vld [vmem:[#allocation7 + $0x330] sm:$0xf0]  ;;  %v5470_v51 = vor.u32 %v4730_v9, %v4394_v30  ;;  %v4758_v0 = vld [vmem:[#allocation7 + $0x304] sm:$0xf] }
 0x242   :  { %v5455_v47 = vpop.f32.mrf.mxu2  ;;  %v5457_v7 = vpop.f32.mrf.mxu3  ;;  %6740 = vst [vmem:[#allocation91_spill] sm:$0xff] %v5462_v12  ;;  %1746 = vmatpush.bf16.msrb.mxu2 %v5453_v44  ;;  %1759 = vmatpush.bf16.msrb.mxu3 %v5460_v29  ;;  %v4378_v19 = vld [vmem:[#allocation7 + $0x210] sm:$0xf0] }
 0x243   :  { %v768_v5 = vpop.f32.mrf.mxu0  ;;  %v781_v6 = vpop.f32.mrf.mxu1  ;;  %6741 = vst [vmem:[#allocation92_spill] sm:$0xff] %v5466_v62  ;;  %1722 = vmatpush.bf16.msrb.mxu0 %v5462_v12  ;;  %1735 = vmatpush.bf16.msrb.mxu1 %v5466_v62  ;;  %v4506_v46 = vld [vmem:[#allocation7 + $0x310] sm:$0xf0]  ;;  %v5476_v12 = vor.u32 %v4726_v3, %v4378_v19 }
 0x244   :  { %6742 = vst [vmem:[#allocation93_spill] sm:$0xff] %v5470_v51  ;;  %v5472_v6 = vor.u32 %v4762_v61, %v4522_v13  ;;  %v5478_v44 = vor.u32 %v4758_v0, %v4506_v46  ;;  %v947_v61 = vpack.c.bf16 %v5430_v11, %v5430_v11  ;;  %v948_v13 = vpack.c.bf16 %v5432_v21, %v5432_v21 }
 0x245   :  { %6744 = vst [vmem:[#allocation95_spill] sm:$0xff] %v5476_v12  ;;  %v949_v11 = vpack.c.bf16 %v5455_v47, %v5455_v47  ;;  %v950_v21 = vpack.c.bf16 %v5457_v7, %v5457_v7  ;;  %v4693_v7 = vld [vmem:[#allocation7 + $0xf4] sm:$0xf0] }
 0x246   :  { %6743 = vst [vmem:[#allocation94_spill] sm:$0xff] %v5472_v6  ;;  %1747 = vmatpush.bf16.msrb.mxu2 %v5470_v51  ;;  %1760 = vmatpush.bf16.msrb.mxu3 %v5472_v6  ;;  %v979_v0 = vunpack.c.l.b16 %v947_v61  ;;  %v980_v46 = vunpack.c.l.b16 %v948_v13  ;;  %v943_v6 = vpack.c.bf16 %v5368_v60, %v5368_v60 }
 0x247   :  { %6745 = vst [vmem:[#allocation96_spill] sm:$0xff] %v5478_v44  ;;  %v981_v35 = vunpack.c.l.b16 %v949_v11  ;;  %v982_v47 = vunpack.c.l.b16 %v950_v21  ;;  %v5502_v21 = vor.u32 %v4693_v7, %v4240_v45  ;;  %v4721_v7 = vld [vmem:[#allocation7 + $0x1d4] sm:$0xf0] }
 0x248   :  { %v975_v23 = vunpack.c.l.b16 %v943_v6 }
 0x24a   :  { %v794_v5 = vpop.f32.mrf.mxu2  ;;  %v807_v29 = vpop.f32.mrf.mxu3  ;;  %1748 = vmatpush.bf16.msrb.mxu2 %v5476_v12  ;;  %1761 = vmatpush.bf16.msrb.mxu3 %v5478_v44  ;;  %v944_v44 = vpack.c.bf16 %v5370_v22, %v5370_v22 }
 0x24b   :  { %v833_v10 = vpop.f32.mrf.mxu0  ;;  %v846_v62 = vpop.f32.mrf.mxu1 }
 0x24c   :  { %v951_v3 = vpack.c.bf16 %v833_v10, %v833_v10  ;;  %v952_v19 = vpack.c.bf16 %v846_v62, %v846_v62  ;;  %v991_v10 = vrot.slane %v979_v0, 7  ;;  %v997_v62 = vrot.slane %v980_v46, 7 }
 0x24d   :  { %v976_v22 = vunpack.c.l.b16 %v944_v44  ;;  %v945_v0 = vpack.c.bf16 %v5399_v31, %v5399_v31  ;;  %v1003_v31 = vrot.slane %v981_v35, 7 }
 0x24e   :  { %v983_v12 = vunpack.c.l.b16 %v951_v3  ;;  %v984_v51 = vunpack.c.l.b16 %v952_v19 }
 0x24f   :  { %v998_v44 = vsel %vm245_vm3, %v997_v62, %v976_v22 }
 0x250   :  { %v993_v3 = vrot.slane %v983_v12, 6  ;;  %v999_v19 = vrot.slane %v984_v51, 6 }
 0x252   :  { %v859_v30 = vpop.f32.mrf.mxu2  ;;  %v872_v9 = vpop.f32.mrf.mxu3 }
 0x253   :  { %v835_v5 = vpop.f32.mrf.mxu0  ;;  %v848_v29 = vpop.f32.mrf.mxu1  ;;  %v953_v1 = vpack.c.bf16 %v859_v30, %v859_v30  ;;  %v954_v63 = vpack.c.bf16 %v872_v9, %v872_v9  ;;  %v946_v30 = vpack.c.bf16 %v5401_v4, %v5401_v4  ;;  %v992_v9 = vsel %vm245_vm3, %v991_v10, %v975_v23 }
 0x254   :  { %v994_v11 = vsel %vm241_vm1, %v993_v3, %v992_v9  ;;  %v4689_v3 = vld [vmem:[#allocation7 + $0xd4] sm:$0xf0] }
 0x255   :  { %v985_v12 = vunpack.c.l.b16 %v953_v1  ;;  %v986_v51 = vunpack.c.l.b16 %v954_v63  ;;  %v4224_v1 = vld [vmem:[#allocation7 + $0xc8] sm:$0xf] }
 0x257   :  { %v1005_v35 = vrot.slane %v985_v12, 6  ;;  %v4789_v12 = vld [vmem:[#allocation7 + $0x3f4] sm:$0xf0] }
 0x25a   :  { %v861_v5 = vpop.f32.mrf.mxu2  ;;  %v874_v29 = vpop.f32.mrf.mxu3 }
 0x25b   :  { %v900_v61 = vpop.f32.mrf.mxu0  ;;  %v913_v13 = vpop.f32.mrf.mxu1  ;;  %v4368_v5 = vld [vmem:[#allocation7 + $0x1e8] sm:$0xf]  ;;  %v4725_v29 = vld [vmem:[#allocation7 + $0x1f4] sm:$0xf0] }
 0x25c   :  { %v955_v60 = vpack.c.bf16 %v900_v61, %v900_v61  ;;  %v956_v24 = vpack.c.bf16 %v913_v13, %v913_v13  ;;  %v5504_v61 = vor.u32 %v4725_v29, %v4368_v5  ;;  %v1009_v13 = vrot.slane %v982_v47, 7 }
 0x25d   :  { %v1011_v47 = vrot.slane %v986_v51, 6  ;;  %v977_v5 = vunpack.c.l.b16 %v945_v0  ;;  %v978_v29 = vunpack.c.l.b16 %v946_v30  ;;  %v4208_v0 = vld [vmem:[#allocation7 + $0xa8] sm:$0xf]  ;;  %v4685_v30 = vld [vmem:[#allocation7 + $0xb4] sm:$0xf0] }
 0x25e   :  { %v987_v18 = vunpack.c.l.b16 %v955_v60  ;;  %v988_v8 = vunpack.c.l.b16 %v956_v24  ;;  %v1000_v24 = vsel %vm241_vm1, %v999_v19, %v998_v44  ;;  %6746 = vst [vmem:[#allocation97_spill] sm:$0xff] %v5504_v61  ;;  %v4352_v19 = vld [vmem:[#allocation7 + $0x1c8] sm:$0xf] }
 0x25f   :  { %v1004_v51 = vsel %vm245_vm3, %v1003_v31, %v977_v5  ;;  %v4480_v31 = vld [vmem:[#allocation7 + $0x2c8] sm:$0xf] }
 0x260   :  { %v995_v6 = vrot.slane %v987_v18, 5  ;;  %v1001_v46 = vrot.slane %v988_v8, 5 }
 0x262   :  { %v996_v4 = vsel %vm247_vm4, %v995_v6, %v994_v11  ;;  %v1002_v23 = vsel %vm247_vm4, %v1001_v46, %v1000_v24  ;;  %v926_v10 = vpop.f32.mrf.mxu2  ;;  %v939_v62 = vpop.f32.mrf.mxu3  ;;  %v4496_v6 = vld [vmem:[#allocation7 + $0x2e8] sm:$0xf]  ;;  %v4757_v46 = vld [vmem:[#allocation7 + $0x2f4] sm:$0xf0]  ;;  %v5516_v24 = vor.u32 %v4689_v3, %v4224_v1 }
 0x263   :  { %v5508_v63 = vpack.c.b16 %v996_v4, %v996_v4  ;;  %v5510_v8 = vpack.c.b16 %v1002_v23, %v1002_v23  ;;  %v957_v18 = vpack.c.bf16 %v926_v10, %v926_v10  ;;  %v958_v60 = vpack.c.bf16 %v939_v62, %v939_v62  ;;  %v902_v22 = vpop.f32.mrf.mxu0  ;;  %v915_v45 = vpop.f32.mrf.mxu1  ;;  %v4624_v11 = vld [vmem:[#allocation7 + $0x3e8] sm:$0xf] }
 0x264   :  { %v5518_v4 = vor.u32 %v4721_v7, %v4352_v19  ;;  %v1010_v23 = vsel %vm245_vm3, %v1009_v13, %v978_v29  ;;  %v1006_v22 = vsel %vm241_vm1, %v1005_v35, %v1004_v51  ;;  %v5528_v19 = vor.u32 %v4789_v12, %v4624_v11  ;;  %v4753_v13 = vld [vmem:[#allocation7 + $0x2d4] sm:$0xf0]  ;;  %v4320_v12 = vld [vmem:[#allocation7 + $0x188] sm:$0xf] }
 0x265   :  { %v989_v9 = vunpack.c.l.b16 %v957_v18  ;;  %v990_v44 = vunpack.c.l.b16 %v958_v60  ;;  %1671 = vmatmul.bf16.vlgmr.msra.gmra.mxu0 %v5508_v63  ;;  %1684 = vmatmul.bf16.vlgmr.msra.gmra.mxu1 %v5510_v8  ;;  %v4336_v18 = vld [vmem:[#allocation7 + $0x1a8] sm:$0xf]  ;;  %v4717_v60 = vld [vmem:[#allocation7 + $0x1b4] sm:$0xf0]  ;;  %v1012_v45 = vsel %vm241_vm1, %v1011_v47, %v1010_v23  ;;  %v5530_v7 = vor.u32 %v4685_v30, %v4208_v0 }
 0x266   :  { %1767 = vmatpush.bf16.msra.mxu0 %v5502_v21  ;;  %1780 = vmatpush.bf16.msra.mxu1 %v5504_v61  ;;  %v5524_v61 = vor.u32 %v4757_v46, %v4496_v6  ;;  %6747 = vst [vmem:[#allocation98_spill] sm:$0xff] %v5528_v19  ;;  %v5538_v47 = vor.u32 %v4717_v60, %v4336_v18  ;;  %v4785_v6 = vld [vmem:[#allocation7 + $0x3d4] sm:$0xf0]  ;;  %v4192_v46 = vld [vmem:[#allocation7 + $0x88] sm:$0xf] }
 0x267   :  { %v1007_v10 = vrot.slane %v989_v9, 5  ;;  %v1013_v62 = vrot.slane %v990_v44, 5  ;;  %6748 = vst [vmem:[#allocation99_spill] sm:$0xff] %v5530_v7  ;;  %v4608_v44 = vld [vmem:[#allocation7 + $0x3c8] sm:$0xf]  ;;  %v5544_v30 = vor.u32 %v4753_v13, %v4480_v31 }
 0x268   :  { %6749 = vst [vmem:[#allocation100_spill] sm:$0xff] %v5538_v47  ;;  %v4681_v11 = vld [vmem:[#allocation7 + $0x94] sm:$0xf0]  ;;  %v5546_v51 = vor.u32 %v4785_v6, %v4608_v44  ;;  %v4464_v23 = vld [vmem:[#allocation7 + $0x2a8] sm:$0xf] }
 0x269   :  { %v1008_v1 = vsel %vm247_vm4, %v1007_v10, %v1006_v22  ;;  %v1014_v3 = vsel %vm247_vm4, %v1013_v62, %v1012_v45  ;;  %v4713_v0 = vld [vmem:[#allocation7 + $0x194] sm:$0xf0]  ;;  %6750 = vst [vmem:[#allocation101_spill] sm:$0xff] %v5544_v30  ;;  %v5550_v10 = vor.u32 %v4681_v11, %v4192_v46  ;;  %v4592_v60 = vld [vmem:[#allocation7 + $0x3a8] sm:$0xf] }
 0x26a   :  { %v5532_v5 = vpack.c.b16 %v1008_v1, %v1008_v1  ;;  %v5534_v29 = vpack.c.b16 %v1014_v3, %v1014_v3  ;;  %v928_v9 = vpop.f32.mrf.mxu2  ;;  %v941_v35 = vpop.f32.mrf.mxu3  ;;  %1768 = vmatpush.bf16.msra.mxu0 %v5516_v24  ;;  %1781 = vmatpush.bf16.msra.mxu1 %v5518_v4  ;;  %6751 = vst [vmem:[#allocation102_spill] sm:$0xff] %v5546_v51  ;;  %v4749_v18 = vld [vmem:[#allocation7 + $0x2b4] sm:$0xf0]  ;;  %v4176_v45 = vld [vmem:[#allocation7 + $0x68] sm:$0xf] }
 0x26b   :  { %6752 = vst [vmem:[#allocation103_spill] sm:$0xff] %v5550_v10  ;;  %v5552_v62 = vor.u32 %v4713_v0, %v4320_v12  ;;  %v4781_v22 = vld [vmem:[#allocation7 + $0x3b4] sm:$0xf0]  ;;  %v4304_v3 = vld [vmem:[#allocation7 + $0x168] sm:$0xf]  ;;  %v5556_v31 = vor.u32 %v4749_v18, %v4464_v23 }
 0x26c   :  { %1697 = vmatmul.bf16.vlgmr.msra.gmra.mxu2 %v5532_v5  ;;  %1710 = vmatmul.bf16.vlgmr.msra.gmra.mxu3 %v5534_v29  ;;  %v4677_v1 = vld [vmem:[#allocation7 + $0x74] sm:$0xf0]  ;;  %v5558_v13 = vor.u32 %v4781_v22, %v4592_v60  ;;  %v4448_v35 = vld [vmem:[#allocation7 + $0x288] sm:$0xf] }
 0x26d   :  { %1793 = vmatpush.bf16.msra.mxu2 %v5524_v61  ;;  %1806 = vmatpush.bf16.msra.mxu3 %v5528_v19  ;;  %6753 = vst [vmem:[#allocation104_spill] sm:$0xff] %v5552_v62  ;;  %v4709_v9 = vld [vmem:[#allocation7 + $0x174] sm:$0xf0]  ;;  %v4576_v6 = vld [vmem:[#allocation7 + $0x388] sm:$0xf]  ;;  %v5562_v11 = vor.u32 %v4677_v1, %v4176_v45 }
 0x26e   :  { %1769 = vmatpush.bf16.msra.mxu0 %v5530_v7  ;;  %1782 = vmatpush.bf16.msra.mxu1 %v5538_v47  ;;  %6754 = vst [vmem:[#allocation105_spill] sm:$0xff] %v5556_v31  ;;  %v4745_v44 = vld [vmem:[#allocation7 + $0x294] sm:$0xf0]  ;;  %v5564_v12 = vor.u32 %v4709_v9, %v4304_v3  ;;  %v4160_v0 = vld [vmem:[#allocation7 + $0x48] sm:$0xf] }
 0x26f   :  { %6755 = vst [vmem:[#allocation106_spill] sm:$0xff] %v5558_v13  ;;  %v4777_v46 = vld [vmem:[#allocation7 + $0x394] sm:$0xf0]  ;;  %v4288_v47 = vld [vmem:[#allocation7 + $0x148] sm:$0xf]  ;;  %v5568_v23 = vor.u32 %v4745_v44, %v4448_v35 }
 0x270   :  { %6756 = vst [vmem:[#allocation107_spill] sm:$0xff] %v5562_v11  ;;  %v5570_v18 = vor.u32 %v4777_v46, %v4576_v6  ;;  %v4432_v60 = vld [vmem:[#allocation7 + $0x268] sm:$0xf]  ;;  %v4741_v22 = vld [vmem:[#allocation7 + $0x274] sm:$0xf0] }
 0x271   :  { %1794 = vmatpush.bf16.msra.mxu2 %v5544_v30  ;;  %1807 = vmatpush.bf16.msra.mxu3 %v5546_v51  ;;  %6757 = vst [vmem:[#allocation108_spill] sm:$0xff] %v5564_v12  ;;  %v4673_v30 = vld [vmem:[#allocation7 + $0x54] sm:$0xf0]  ;;  %v4560_v45 = vld [vmem:[#allocation7 + $0x368] sm:$0xf] }
 0x272   :  { %1770 = vmatpush.bf16.msra.mxu0 %v5550_v10  ;;  %1783 = vmatpush.bf16.msra.mxu1 %v5552_v62  ;;  %v4705_v51 = vld [vmem:[#allocation7 + $0x154] sm:$0xf0]  ;;  %6758 = vst [vmem:[#allocation109_spill] sm:$0xff] %v5568_v23  ;;  %v5576_v3 = vor.u32 %v4673_v30, %v4160_v0  ;;  %v4144_v35 = vld [vmem:[#allocation7 + $0x28] sm:$0xf] }
 0x273   :  { %6759 = vst [vmem:[#allocation110_spill] sm:$0xff] %v5570_v18  ;;  %v4773_v1 = vld [vmem:[#allocation7 + $0x374] sm:$0xf0]  ;;  %v5578_v9 = vor.u32 %v4705_v51, %v4288_v47  ;;  %v4272_v6 = vld [vmem:[#allocation7 + $0x128] sm:$0xf] }
 0x274   :  { %6760 = vst [vmem:[#allocation111_spill] sm:$0xff] %v5576_v3  ;;  %v4669_v44 = vld [vmem:[#allocation7 + $0x34] sm:$0xf0]  ;;  %v4416_v62 = vld [vmem:[#allocation7 + $0x248] sm:$0xf] }
 0x275   :  { %1795 = vmatpush.bf16.msra.mxu2 %v5556_v31  ;;  %1808 = vmatpush.bf16.msra.mxu3 %v5558_v13  ;;  %6761 = vst [vmem:[#allocation112_spill] sm:$0xff] %v5578_v9  ;;  %v4701_v46 = vld [vmem:[#allocation7 + $0x134] sm:$0xf0]  ;;  %v5582_v13 = vor.u32 %v4741_v22, %v4432_v60  ;;  %v5584_v31 = vor.u32 %v4773_v1, %v4560_v45  ;;  %v4544_v10 = vld [vmem:[#allocation7 + $0x348] sm:$0xf] }
 0x276   :  { %1723 = vmatmul.bf16.vlgmr.msrb.gmra.mxu0 %v5508_v63  ;;  %1736 = vmatmul.bf16.vlgmr.msrb.gmra.mxu1 %v5510_v8  ;;  %v5588_v47 = vor.u32 %v4669_v44, %v4144_v35  ;;  %v5590_v30 = vor.u32 %v4701_v46, %v4272_v6  ;;  %v4128_v51 = vld [vmem:[#allocation7 + $0x8] sm:$0xf]  ;;  %v4665_v0 = vld [vmem:[#allocation7 + $0x14] sm:$0xf0]  ;;  %v4691_v22 = vld [vmem:[#allocation7 + $0xec] sm:$0xf] }
 0x277   :  { %1771 = vmatpush.bf16.msra.mxu0 %v5562_v11  ;;  %1784 = vmatpush.bf16.msra.mxu1 %v5564_v12  ;;  %6762 = vst [vmem:[#allocation113_spill] sm:$0xff] %v5582_v13  ;;  %v4737_v11 = vld [vmem:[#allocation7 + $0x254] sm:$0xf0]  ;;  %v4242_v45 = vld [vmem:[#allocation7 + $0xf8] sm:$0xf0]  ;;  %v5602_v7 = vor.u32 %v4665_v0, %v4128_v51 }
 0x278   :  { %6763 = vst [vmem:[#allocation114_spill] sm:$0xff] %v5584_v31  ;;  %v4769_v12 = vld [vmem:[#allocation7 + $0x354] sm:$0xf0]  ;;  %v5596_v1 = vor.u32 %v4737_v11, %v4416_v62  ;;  %v4723_v44 = vld [vmem:[#allocation7 + $0x1ec] sm:$0xf] }
 0x279   :  { %1796 = vmatpush.bf16.msra.mxu2 %v5568_v23  ;;  %1809 = vmatpush.bf16.msra.mxu3 %v5570_v18  ;;  %6764 = vst [vmem:[#allocation115_spill] sm:$0xff] %v5588_v47  ;;  %v4256_v23 = vld [vmem:[#allocation7 + $0x108] sm:$0xf]  ;;  %v4697_v60 = vld [vmem:[#allocation7 + $0x114] sm:$0xf0]  ;;  %v5598_v35 = vor.u32 %v4769_v12, %v4544_v10 }
 0x27a   :  { %6765 = vst [vmem:[#allocation116_spill] sm:$0xff] %v5590_v30  ;;  %v4370_v6 = vld [vmem:[#allocation7 + $0x1f8] sm:$0xf0]  ;;  %v4400_v46 = vld [vmem:[#allocation7 + $0x228] sm:$0xf]  ;;  %v5604_v19 = vor.u32 %v4697_v60, %v4256_v23 }
 0x27b   :  { %1772 = vmatpush.bf16.msra.mxu0 %v5576_v3  ;;  %1785 = vmatpush.bf16.msra.mxu1 %v5578_v9  ;;  %6766 = vst [vmem:[#allocation117_spill] sm:$0xff] %v5596_v1  ;;  %v4733_v9 = vld [vmem:[#allocation7 + $0x234] sm:$0xf0]  ;;  %v4528_v3 = vld [vmem:[#allocation7 + $0x328] sm:$0xf]  ;;  %v5608_v62 = vor.u32 %v4723_v44, %v4370_v6 }
 0x27c   :  { %1749 = vmatmul.bf16.vlgmr.msrb.gmra.mxu2 %v5532_v5  ;;  %1762 = vmatmul.bf16.vlgmr.msrb.gmra.mxu3 %v5534_v29  ;;  %6767 = vst [vmem:[#allocation118_spill] sm:$0xff] %v5598_v35  ;;  %v4765_v18 = vld [vmem:[#allocation7 + $0x334] sm:$0xf0]  ;;  %v4687_v10 = vld [vmem:[#allocation7 + $0xcc] sm:$0xf] }
 0x27d   :  { %1797 = vmatpush.bf16.msra.mxu2 %v5582_v13  ;;  %1810 = vmatpush.bf16.msra.mxu3 %v5584_v31  ;;  %6768 = vst [vmem:[#allocation119_spill] sm:$0xff] %v5602_v7  ;;  %v5606_v13 = vor.u32 %v4691_v22, %v4242_v45  ;;  %v4226_v11 = vld [vmem:[#allocation7 + $0xd8] sm:$0xf0]  ;;  %v4719_v12 = vld [vmem:[#allocation7 + $0x1cc] sm:$0xf]  ;;  %v5612_v31 = vor.u32 %v4733_v9, %v4400_v46 }
 0x27e   :  { %6769 = vst [vmem:[#allocation120_spill] sm:$0xff] %v5604_v19  ;;  %v4384_v51 = vld [vmem:[#allocation7 + $0x208] sm:$0xf]  ;;  %v4729_v0 = vld [vmem:[#allocation7 + $0x214] sm:$0xf0]  ;;  %v5620_v9 = vor.u32 %v4687_v10, %v4226_v11 }
 0x27f   :  { %1773 = vmatpush.bf16.msra.mxu0 %v5588_v47  ;;  %1786 = vmatpush.bf16.msra.mxu1 %v5590_v30  ;;  %6770 = vst [vmem:[#allocation121_spill] sm:$0xff] %v5606_v13  ;;  %v5614_v47 = vor.u32 %v4765_v18, %v4528_v3  ;;  %v4354_v30 = vld [vmem:[#allocation7 + $0x1d8] sm:$0xf0]  ;;  %v4512_v23 = vld [vmem:[#allocation7 + $0x308] sm:$0xf]  ;;  %v5626_v46 = vor.u32 %v4729_v0, %v4384_v51 }
 0x280   :  { %6771 = vst [vmem:[#allocation122_spill] sm:$0xff] %v5608_v62  ;;  %v4761_v60 = vld [vmem:[#allocation7 + $0x314] sm:$0xf0]  ;;  %v4755_v22 = vld [vmem:[#allocation7 + $0x2ec] sm:$0xf]  ;;  %v5622_v18 = vor.u32 %v4719_v12, %v4354_v30 }
 0x281   :  { %1798 = vmatpush.bf16.msra.mxu2 %v5596_v1  ;;  %1811 = vmatpush.bf16.msra.mxu3 %v5598_v35  ;;  %6772 = vst [vmem:[#allocation123_spill] sm:$0xff] %v5612_v31  ;;  %v4498_v45 = vld [vmem:[#allocation7 + $0x2f8] sm:$0xf0]  ;;  %v4787_v44 = vld [vmem:[#allocation7 + $0x3ec] sm:$0xf] }
 0x282   :  { %6773 = vst [vmem:[#allocation124_spill] sm:$0xff] %v5614_v47  ;;  %v4626_v6 = vld [vmem:[#allocation7 + $0x3f8] sm:$0xf0]  ;;  %v4683_v3 = vld [vmem:[#allocation7 + $0xac] sm:$0xf]  ;;  %v5632_v10 = vor.u32 %v4755_v22, %v4498_v45 }
 0x283   :  { %1774 = vmatpush.bf16.msra.mxu0 %v5602_v7  ;;  %1787 = vmatpush.bf16.msra.mxu1 %v5604_v19  ;;  %6774 = vst [vmem:[#allocation125_spill] sm:$0xff] %v5620_v9  ;;  %v5628_v7 = vor.u32 %v4761_v60, %v4512_v23  ;;  %v4210_v19 = vld [vmem:[#allocation7 + $0xb8] sm:$0xf0]  ;;  %v4715_v35 = vld [vmem:[#allocation7 + $0x1ac] sm:$0xf]  ;;  %v5634_v30 = vor.u32 %v4787_v44, %v4626_v6 }
 0x284   :  { %6775 = vst [vmem:[#allocation126_spill] sm:$0xff] %v5622_v18  ;;  %v4338_v1 = vld [vmem:[#allocation7 + $0x1b8] sm:$0xf0]  ;;  %v4751_v11 = vld [vmem:[#allocation7 + $0x2cc] sm:$0xf]  ;;  %v5638_v51 = vor.u32 %v4683_v3, %v4210_v19 }
 0x285   :  { %1799 = vmatpush.bf16.msra.mxu2 %v5612_v31  ;;  %1812 = vmatpush.bf16.msra.mxu3 %v5614_v47  ;;  %6776 = vst [vmem:[#allocation127_spill] sm:$0xff] %v5626_v46  ;;  %v4482_v12 = vld [vmem:[#allocation7 + $0x2d8] sm:$0xf0]  ;;  %v4783_v31 = vld [vmem:[#allocation7 + $0x3cc] sm:$0xf]  ;;  %v5640_v0 = vor.u32 %v4715_v35, %v4338_v1 }
 0x286   :  { %6777 = vst [vmem:[#allocation128_spill] sm:$0xff] %v5628_v7  ;;  %1775 = vmatmul.bf16.vlgmr.msra.gmra.mxu0 %v5508_v63  ;;  %1788 = vmatmul.bf16.vlgmr.msra.gmra.mxu1 %v5510_v8  ;;  %v4679_v23 = vld [vmem:[#allocation7 + $0x8c] sm:$0xf]  ;;  %v4194_v60 = vld [vmem:[#allocation7 + $0x98] sm:$0xf0]  ;;  %v5646_v44 = vor.u32 %v4751_v11, %v4482_v12 }
 0x287   :  { %1819 = vmatpush.bf16.msrb.mxu0 %v5606_v13  ;;  %1832 = vmatpush.bf16.msrb.mxu1 %v5608_v62  ;;  %6778 = vst [vmem:[#allocation129_spill] sm:$0xff] %v5632_v10  ;;  %v4610_v62 = vld [vmem:[#allocation7 + $0x3d8] sm:$0xf0]  ;;  %v4711_v22 = vld [vmem:[#allocation7 + $0x18c] sm:$0xf] }
 0x288   :  { %6779 = vst [vmem:[#allocation130_spill] sm:$0xff] %v5634_v30  ;;  %v4322_v45 = vld [vmem:[#allocation7 + $0x198] sm:$0xf0]  ;;  %v5648_v6 = vor.u32 %v4783_v31, %v4610_v62  ;;  %v4747_v19 = vld [vmem:[#allocation7 + $0x2ac] sm:$0xf] }
 0x289   :  { %6780 = vst [vmem:[#allocation131_spill] sm:$0xff] %v5638_v51  ;;  %1800 = vmatpush.bf16.msra.mxu2 %v5626_v46  ;;  %1813 = vmatpush.bf16.msra.mxu3 %v5628_v7  ;;  %v4466_v3 = vld [vmem:[#allocation7 + $0x2b8] sm:$0xf0]  ;;  %v4779_v1 = vld [vmem:[#allocation7 + $0x3ac] sm:$0xf]  ;;  %v5652_v7 = vor.u32 %v4679_v23, %v4194_v60  ;;  %v5654_v46 = vor.u32 %v4711_v22, %v4322_v45 }
 0x28a   :  { %6781 = vst [vmem:[#allocation132_spill] sm:$0xff] %v5640_v0  ;;  %v4594_v35 = vld [vmem:[#allocation7 + $0x3b8] sm:$0xf0]  ;;  %v4707_v31 = vld [vmem:[#allocation7 + $0x16c] sm:$0xf]  ;;  %v5660_v12 = vor.u32 %v4747_v19, %v4466_v3 }
 0x28b   :  { %1820 = vmatpush.bf16.msrb.mxu0 %v5620_v9  ;;  %1833 = vmatpush.bf16.msrb.mxu1 %v5622_v18  ;;  %6782 = vst [vmem:[#allocation133_spill] sm:$0xff] %v5646_v44  ;;  %v4675_v18 = vld [vmem:[#allocation7 + $0x6c] sm:$0xf]  ;;  %v4178_v11 = vld [vmem:[#allocation7 + $0x78] sm:$0xf0] }
 0x28c   :  { %6783 = vst [vmem:[#allocation134_spill] sm:$0xff] %v5648_v6  ;;  %1801 = vmatmul.bf16.vlgmr.msra.gmra.mxu2 %v5532_v5  ;;  %1814 = vmatmul.bf16.vlgmr.msra.gmra.mxu3 %v5534_v29  ;;  %v4306_v62 = vld [vmem:[#allocation7 + $0x178] sm:$0xf0]  ;;  %v4743_v23 = vld [vmem:[#allocation7 + $0x28c] sm:$0xf] }
 0x28d   :  { %1845 = vmatpush.bf16.msrb.mxu2 %v5632_v10  ;;  %1858 = vmatpush.bf16.msrb.mxu3 %v5634_v30  ;;  %6784 = vst [vmem:[#allocation135_spill] sm:$0xff] %v5652_v7  ;;  %v4450_v60 = vld [vmem:[#allocation7 + $0x298] sm:$0xf0]  ;;  %v4775_v22 = vld [vmem:[#allocation7 + $0x38c] sm:$0xf]  ;;  %v5668_v30 = vor.u32 %v4707_v31, %v4306_v62 }
 0x28e   :  { %6785 = vst [vmem:[#allocation136_spill] sm:$0xff] %v5654_v46  ;;  %v4578_v45 = vld [vmem:[#allocation7 + $0x398] sm:$0xf0]  ;;  %v4671_v10 = vld [vmem:[#allocation7 + $0x4c] sm:$0xf]  ;;  %v5672_v19 = vor.u32 %v4743_v23, %v4450_v60 }
 0x28f   :  { %1821 = vmatpush.bf16.msrb.mxu0 %v5638_v51  ;;  %1834 = vmatpush.bf16.msrb.mxu1 %v5640_v0  ;;  %6786 = vst [vmem:[#allocation137_spill] sm:$0xff] %v5660_v12  ;;  %v5662_v51 = vor.u32 %v4779_v1, %v4594_v35  ;;  %v5666_v0 = vor.u32 %v4675_v18, %v4178_v11  ;;  %v4703_v9 = vld [vmem:[#allocation7 + $0x14c] sm:$0xf]  ;;  %v4434_v35 = vld [vmem:[#allocation7 + $0x278] sm:$0xf0] }
 0x290   :  { %6789 = vst [vmem:[#allocation140_spill] sm:$0xff] %v5668_v30  ;;  %v5674_v3 = vor.u32 %v4775_v22, %v4578_v45  ;;  %v4739_v1 = vld [vmem:[#allocation7 + $0x26c] sm:$0xf]  ;;  %v4146_v62 = vld [vmem:[#allocation7 + $0x38] sm:$0xf0] }
 0x291   :  { %1846 = vmatpush.bf16.msrb.mxu2 %v5646_v44  ;;  %1859 = vmatpush.bf16.msrb.mxu3 %v5648_v6  ;;  %6787 = vst [vmem:[#allocation138_spill] sm:$0xff] %v5662_v51  ;;  %v4162_v44 = vld [vmem:[#allocation7 + $0x58] sm:$0xf0]  ;;  %v4667_v31 = vld [vmem:[#allocation7 + $0x2c] sm:$0xf]  ;;  %v5684_v23 = vor.u32 %v4739_v1, %v4434_v35 }
 0x292   :  { %6788 = vst [vmem:[#allocation139_spill] sm:$0xff] %v5666_v0  ;;  %v4290_v6 = vld [vmem:[#allocation7 + $0x158] sm:$0xf0]  ;;  %v5678_v18 = vor.u32 %v4671_v10, %v4162_v44  ;;  %v4735_v22 = vld [vmem:[#allocation7 + $0x24c] sm:$0xf] }
 0x293   :  { %1822 = vmatpush.bf16.msrb.mxu0 %v5652_v7  ;;  %1835 = vmatpush.bf16.msrb.mxu1 %v5654_v46  ;;  %6790 = vst [vmem:[#allocation141_spill] sm:$0xff] %v5672_v19  ;;  %v4771_v7 = vld [vmem:[#allocation7 + $0x36c] sm:$0xf]  ;;  %v4562_v46 = vld [vmem:[#allocation7 + $0x378] sm:$0xf0]  ;;  %v5680_v11 = vor.u32 %v4703_v9, %v4290_v6  ;;  %v5690_v9 = vor.u32 %v4667_v31, %v4146_v62 }
 0x294   :  { %6791 = vst [vmem:[#allocation142_spill] sm:$0xff] %v5674_v3  ;;  %v5686_v60 = vor.u32 %v4771_v7, %v4562_v46  ;;  %v4418_v45 = vld [vmem:[#allocation7 + $0x258] sm:$0xf0]  ;;  %v4663_v44 = vld [vmem:[#allocation7 + $0xc] sm:$0xf] }
 0x295   :  { %1847 = vmatpush.bf16.msrb.mxu2 %v5660_v12  ;;  %1860 = vmatpush.bf16.msrb.mxu3 %v5662_v51  ;;  %6792 = vst [vmem:[#allocation143_spill] sm:$0xff] %v5678_v18  ;;  %v4699_v12 = vld [vmem:[#allocation7 + $0x12c] sm:$0xf]  ;;  %v4274_v51 = vld [vmem:[#allocation7 + $0x138] sm:$0xf0]  ;;  %v5696_v7 = vor.u32 %v4735_v22, %v4418_v45 }
 0x296   :  { %6793 = vst [vmem:[#allocation144_spill] sm:$0xff] %v5680_v11  ;;  %v5692_v10 = vor.u32 %v4699_v12, %v4274_v51  ;;  %v4130_v6 = vld [vmem:[#allocation7 + $0x18] sm:$0xf0]  ;;  %v4731_v1 = vld [vmem:[#allocation7 + $0x22c] sm:$0xf] }
 0x297   :  { %1823 = vmatpush.bf16.msrb.mxu0 %v5666_v0  ;;  %1836 = vmatpush.bf16.msrb.mxu1 %v5668_v30  ;;  %6794 = vst [vmem:[#allocation145_spill] sm:$0xff] %v5684_v23  ;;  %v4767_v0 = vld [vmem:[#allocation7 + $0x34c] sm:$0xf]  ;;  %v4546_v30 = vld [vmem:[#allocation7 + $0x358] sm:$0xf0]  ;;  %v5702_v51 = vor.u32 %v4663_v44, %v4130_v6 }
 0x298   :  { %6795 = vst [vmem:[#allocation146_spill] sm:$0xff] %v5686_v60  ;;  %v5698_v46 = vor.u32 %v4767_v0, %v4546_v30  ;;  %v4402_v35 = vld [vmem:[#allocation7 + $0x238] sm:$0xf0]  ;;  %v4727_v0 = vld [vmem:[#allocation7 + $0x20c] sm:$0xf] }
 0x299   :  { %1848 = vmatpush.bf16.msrb.mxu2 %v5672_v19  ;;  %1861 = vmatpush.bf16.msrb.mxu3 %v5674_v3  ;;  %6796 = vst [vmem:[#allocation147_spill] sm:$0xff] %v5690_v9  ;;  %v4695_v19 = vld [vmem:[#allocation7 + $0x10c] sm:$0xf]  ;;  %v4258_v3 = vld [vmem:[#allocation7 + $0x118] sm:$0xf0]  ;;  %v5708_v31 = vor.u32 %v4731_v1, %v4402_v35 }
 0x29a   :  { %6797 = vst [vmem:[#allocation148_spill] sm:$0xff] %v5692_v10  ;;  %v5704_v12 = vor.u32 %v4695_v19, %v4258_v3  ;;  %v4386_v62 = vld [vmem:[#allocation7 + $0x218] sm:$0xf0]  ;;  %v4759_v22 = vld [vmem:[#allocation7 + $0x30c] sm:$0xf] }
 0x29b   :  { %1824 = vmatpush.bf16.msrb.mxu0 %v5678_v18  ;;  %1837 = vmatpush.bf16.msrb.mxu1 %v5680_v11  ;;  %6798 = vst [vmem:[#allocation149_spill] sm:$0xff] %v5696_v7  ;;  %v4763_v18 = vld [vmem:[#allocation7 + $0x32c] sm:$0xf]  ;;  %v4530_v11 = vld [vmem:[#allocation7 + $0x338] sm:$0xf0]  ;;  %v5718_v19 = vor.u32 %v4727_v0, %v4386_v62 }
 0x29c   :  { %6799 = vst [vmem:[#allocation150_spill] sm:$0xff] %v5698_v46  ;;  %v5710_v30 = vor.u32 %v4763_v18, %v4530_v11  ;;  %v4514_v45 = vld [vmem:[#allocation7 + $0x318] sm:$0xf0] }
 0x29d   :  { %1849 = vmatpush.bf16.msrb.mxu2 %v5684_v23  ;;  %1862 = vmatpush.bf16.msrb.mxu3 %v5686_v60  ;;  %6800 = vst [vmem:[#allocation151_spill] sm:$0xff] %v5702_v51  ;;  %v5720_v3 = vor.u32 %v4759_v22, %v4514_v45 }
 0x29e   :  { %6801 = vst [vmem:[#allocation152_spill] sm:$0xff] %v5704_v12 }
 0x29f   :  { %1825 = vmatpush.bf16.msrb.mxu0 %v5690_v9  ;;  %1838 = vmatpush.bf16.msrb.mxu1 %v5692_v10  ;;  %6802 = vst [vmem:[#allocation153_spill] sm:$0xff] %v5708_v31 }
 0x2a0   :  { %6803 = vst [vmem:[#allocation154_spill] sm:$0xff] %v5710_v30 }
 0x2a1   :  { %1850 = vmatpush.bf16.msrb.mxu2 %v5696_v7  ;;  %1863 = vmatpush.bf16.msrb.mxu3 %v5698_v46  ;;  %6804 = vst [vmem:[#allocation155_spill] sm:$0xff] %v5718_v19 }
 0x2a2   :  { %6805 = vst [vmem:[#allocation156_spill] sm:$0xff] %v5720_v3 }
 0x2a3   :  { %1826 = vmatpush.bf16.msrb.mxu0 %v5702_v51  ;;  %1839 = vmatpush.bf16.msrb.mxu1 %v5704_v12 }
 0x2a5   :  { %1851 = vmatpush.bf16.msrb.mxu2 %v5708_v31  ;;  %1864 = vmatpush.bf16.msrb.mxu3 %v5710_v30 }
 0x2a6   :  { %1827 = vmatmul.bf16.vlgmr.msrb.gmra.mxu0 %v5508_v63  ;;  %1840 = vmatmul.bf16.vlgmr.msrb.gmra.mxu1 %v5510_v8 }
 0x2a7   :  { %2114 = vmatpush.bf16.xpose.msra.mxu0 %v5086_v14  ;;  %2127 = vmatpush.bf16.xpose.msra.mxu1 %v5088_v15 }
 0x2a9   :  { %1852 = vmatpush.bf16.msrb.mxu2 %v5718_v19  ;;  %1865 = vmatpush.bf16.msrb.mxu3 %v5720_v3 }
 0x2ac   :  { %1853 = vmatmul.bf16.vlgmr.msrb.gmra.mxu2 %v5532_v5  ;;  %1866 = vmatmul.bf16.vlgmr.msrb.gmra.mxu3 %v5534_v29 }
 0x2ad   :  { %2140 = vmatpush.bf16.xpose.msra.mxu2 %v5090_v16  ;;  %2153 = vmatpush.bf16.xpose.msra.mxu3 %v5092_v17 }
 0x2af   :  { %2180 = vmatpush.bf16.xpose.msrb.mxu0 %v5100_v20  ;;  %2193 = vmatpush.bf16.xpose.msrb.mxu1 %v5111_v32 }
 0x2b5   :  { %2206 = vmatpush.bf16.xpose.msrb.mxu2 %v5113_v33  ;;  %2219 = vmatpush.bf16.xpose.msrb.mxu3 %v5115_v34 }
 0x2e2   :  { %v1672_v63 = vpop.f32.mrf.mxu0  ;;  %v1685_v8 = vpop.f32.mrf.mxu1 }
 0x2e3   :  { %v1686_v18 = vadd.f32 %v1685_v8, %v1672_v63 }
 0x2ea   :  { %v1674_v11 = vpop.f32.mrf.mxu0  ;;  %v1687_v44 = vpop.f32.mrf.mxu1 }
 0x2ef   :  { %v1698_v6 = vpop.f32.mrf.mxu2  ;;  %v1711_v1 = vpop.f32.mrf.mxu3 }
 0x2f0   :  { %v1699_v35 = vadd.f32 %v1698_v6, %v1686_v18 }
 0x2f2   :  { %v1712_v0 = vadd.f32 %v1711_v1, %v1699_v35 }
 0x2f3   :  { %v1724_v62 = vpop.f32.mrf.mxu0  ;;  %v1737_v22 = vpop.f32.mrf.mxu1 }
 0x2f4   :  { %v1871_v45 = vsel %vm677_vm11, %v1712_v0, 0.0  ;;  %v1738_v19 = vadd.f32 %v1737_v22, %v1724_v62 }
 0x2f5   :  { %v1872_v5 = vrot.slane %v1871_v45, 4 }
 0x2f7   :  { %v1700_v17 = vpop.f32.mrf.mxu2  ;;  %v1713_v29 = vpop.f32.mrf.mxu3  ;;  %v1873_v16 = vadd.f32 %v1872_v5, %v1871_v45 }
 0x2f9   :  { %v1874_v34 = vrot.slane %v1873_v16, 2 }
 0x2fb   :  { %v1726_v33 = vpop.f32.mrf.mxu0  ;;  %v1739_v3 = vpop.f32.mrf.mxu1  ;;  %v1875_v11 = vadd.f32 %v1874_v34, %v1873_v16 }
 0x2fd   :  { %v1876_v35 = vrot.slane %v1875_v11, 1 }
 0x2ff   :  { %v1750_v32 = vpop.f32.mrf.mxu2  ;;  %v1763_v63 = vpop.f32.mrf.mxu3  ;;  %v1877_v45 = vadd.f32 %v1876_v35, %v1875_v11 }
 0x300   :  { %v1751_v8 = vadd.f32 %v1750_v32, %v1738_v19 }
 0x301   :  { %v1899_v22 = vmul.f32 0.25, %v1877_v45 }
 0x302   :  { %v1764_v44 = vadd.f32 %v1763_v63, %v1751_v8 }
 0x303   :  { %v1776_v20 = vpop.f32.mrf.mxu0  ;;  %v1789_v18 = vpop.f32.mrf.mxu1  ;;  %v5736_v8 = vsub.f32 %v1712_v0, %v1899_v22 }
 0x304   :  { %v1878_v6 = vsel %vm677_vm11, %v1764_v44, 0.0  ;;  %v1790_v32 = vadd.f32 %v1789_v18, %v1776_v20 }
 0x305   :  { %v1879_v1 = vrot.slane %v1878_v6, 4  ;;  %v1907_v11 = vmul.f32 %v5736_v8, %v5736_v8 }
 0x307   :  { %v1880_v30 = vadd.f32 %v1879_v1, %v1878_v6  ;;  %v1752_v31 = vpop.f32.mrf.mxu2  ;;  %v1765_v17 = vpop.f32.mrf.mxu3  ;;  %v1911_v0 = vsel %vm677_vm11, %v1907_v11, 0.0 }
 0x309   :  { %v1881_v29 = vrot.slane %v1880_v30, 2 }
 0x30b   :  { %v1882_v33 = vadd.f32 %v1881_v29, %v1880_v30  ;;  %v1778_v3 = vpop.f32.mrf.mxu0  ;;  %v1791_v5 = vpop.f32.mrf.mxu1 }
 0x30d   :  { %v1883_v62 = vrot.slane %v1882_v33, 1 }
 0x30f   :  { %v1884_v15 = vadd.f32 %v1883_v62, %v1882_v33  ;;  %v1802_v16 = vpop.f32.mrf.mxu2  ;;  %v1815_v34 = vpop.f32.mrf.mxu3  ;;  %v1912_v33 = vrot.slane %v1911_v0, 4 }
 0x310   :  { %v1803_v63 = vadd.f32 %v1802_v16, %v1790_v32 }
 0x311   :  { %v1900_v19 = vmul.f32 0.25, %v1884_v15  ;;  %v1913_v16 = vadd.f32 %v1912_v33, %v1911_v0 }
 0x312   :  { %v1816_v6 = vadd.f32 %v1815_v34, %v1803_v63 }
 0x313   :  { %v5738_v14 = vsub.f32 %v1764_v44, %v1900_v19 }
 0x314   :  { %v1885_v30 = vsel %vm677_vm11, %v1816_v6, 0.0 }
 0x315   :  { %v1908_v31 = vmul.f32 %v5738_v14, %v5738_v14  ;;  %v1886_v1 = vrot.slane %v1885_v30, 4 }
 0x317   :  { %v1918_v20 = vsel %vm677_vm11, %v1908_v31, 0.0  ;;  %v1887_v35 = vadd.f32 %v1886_v1, %v1885_v30  ;;  %v1804_v15 = vpop.f32.mrf.mxu2  ;;  %v1817_v17 = vpop.f32.mrf.mxu3  ;;  %v1914_v31 = vrot.slane %v1913_v16, 2 }
 0x318   :  { %v1919_v18 = vrot.slane %v1918_v20, 4 }
 0x319   :  { %v1888_v44 = vrot.slane %v1887_v35, 2 }
 0x31a   :  { %v1920_v29 = vadd.f32 %v1919_v18, %v1918_v20 }
 0x31b   :  { %v1889_v45 = vadd.f32 %v1888_v44, %v1887_v35  ;;  %v1915_v35 = vadd.f32 %v1914_v31, %v1913_v16 }
 0x31c   :  { %v1921_v5 = vrot.slane %v1920_v29, 2 }
 0x31d   :  { %v1890_v3 = vrot.slane %v1889_v45, 1  ;;  %v1916_v33 = vrot.slane %v1915_v35, 1 }
 0x31e   :  { %v1922_v19 = vadd.f32 %v1921_v5, %v1920_v29 }
 0x31f   :  { %v1891_v62 = vadd.f32 %v1890_v3, %v1889_v45  ;;  %v1917_v12 = vadd.f32 %v1916_v33, %v1915_v35 }
 0x320   :  { %v1923_v1 = vrot.slane %v1922_v19, 1 }
 0x321   :  { %v1901_v34 = vmul.f32 0.25, %v1891_v62 }
 0x322   :  { %v1924_v17 = vadd.f32 %v1923_v1, %v1922_v19  ;;  %v1939_v19 = vmul.f32 0.25, %v1917_v12 }
 0x323   :  { %v1828_v22 = vpop.f32.mrf.mxu0  ;;  %v1841_v32 = vpop.f32.mrf.mxu1  ;;  %v5747_v63 = vsub.f32 %v1816_v6, %v1901_v34 }
 0x324   :  { %v1842_v45 = vadd.f32 %v1841_v32, %v1828_v22  ;;  %v1940_v5 = vmul.f32 0.25, %v1924_v17 }
 0x325   :  { %v1909_v30 = vmul.f32 %v5747_v63, %v5747_v63 }
 0x327   :  { %v1925_v11 = vsel %vm677_vm11, %v1909_v30, 0.0  ;;  %v1944_v30 = vadd.f32 1e-05, %v1940_v5 }
 0x328   :  { %v1926_v15 = vrot.slane %v1925_v11, 4 }
 0x329   :  { %4814 = vrsqrt.f32 %v1944_v30  ;;  %vm1963_vm14 = vweird.f32 %v1944_v30 }
 0x32a   :  { %v1927_v44 = vadd.f32 %v1926_v15, %v1925_v11  ;;  %v1943_v11 = vadd.f32 1e-05, %v1939_v19 }
 0x32b   :  { %v1830_v20 = vpop.f32.mrf.mxu0  ;;  %v1843_v18 = vpop.f32.mrf.mxu1 }
 0x32c   :  { %v1928_v29 = vrot.slane %v1927_v44, 2  ;;  %4816 = vrsqrt.f32 %v1943_v11  ;;  %vm1953_vm10 = vweird.f32 %v1943_v11 }
 0x32e   :  { %v1929_v62 = vadd.f32 %v1928_v29, %v1927_v44 }
 0x32f   :  { %v1854_v3 = vpop.f32.mrf.mxu2  ;;  %v1867_v0 = vpop.f32.mrf.mxu3 }
 0x330   :  { %v1855_v6 = vadd.f32 %v1854_v3, %v1842_v45  ;;  %v1930_v20 = vrot.slane %v1929_v62, 1  ;;  %v4815_v44 = vpop.eup %4814 }
 0x331   :  { %vm1964_vm13 = vweird.f32 %v4815_v44 }
 0x332   :  { %v1868_v34 = vadd.f32 %v1867_v0, %v1855_v6  ;;  %v1931_v22 = vadd.f32 %v1930_v20, %v1929_v62  ;;  %v1958_v0 = vmul.f32 %v4815_v44, %v1944_v30  ;;  %vm1965_vm15 = vmor %vm1963_vm14, %vm1964_vm13 }
 0x334   :  { %v1892_v51 = vsel %vm677_vm11, %v1868_v34, 0.0  ;;  %v1941_v45 = vmul.f32 0.25, %v1931_v22  ;;  %v1959_v12 = vmul.f32 %v4815_v44, %v1958_v0 }
 0x335   :  { %v1893_v46 = vrot.slane %v1892_v51, 4 }
 0x336   :  { %v1945_v3 = vadd.f32 1e-05, %v1941_v45  ;;  %v1960_v20 = vmul.f32 0.5, %v1959_v12  ;;  %v230_v12 = vld [vmem:[#allocation8] sm:$0xf] }
 0x337   :  { %v1894_v18 = vadd.f32 %v1893_v46, %v1892_v51  ;;  %v1856_v16 = vpop.f32.mrf.mxu2  ;;  %v1869_v31 = vpop.f32.mrf.mxu3 }
 0x338   :  { %v4817_v51 = vpop.eup %4816  ;;  %4818 = vrsqrt.f32 %v1945_v3  ;;  %vm1973_vm14 = vweird.f32 %v1945_v3 }
 0x339   :  { %v1895_v1 = vrot.slane %v1894_v18, 2  ;;  %v1948_v5 = vmul.f32 %v4817_v51, %v1943_v11  ;;  %vm1954_vm12 = vweird.f32 %v4817_v51 }
 0x33a   :  { %vm1955_vm9 = vmor %vm1953_vm10, %vm1954_vm12 }
 0x33b   :  { %v1896_v32 = vadd.f32 %v1895_v1, %v1894_v18  ;;  %v1949_v31 = vmul.f32 %v4817_v51, %v1948_v5  ;;  %v1961_v1 = vsub.f32 1.5, %v1960_v20 }
 0x33d   :  { %v1897_v15 = vrot.slane %v1896_v32, 1  ;;  %v1962_v45 = vmul.f32 %v4815_v44, %v1961_v1 }
 0x33e   :  { %v4819_v18 = vpop.eup %4818 }
 0x33f   :  { %v1898_v17 = vadd.f32 %v1897_v15, %v1896_v32  ;;  %v1968_v22 = vmul.f32 %v4819_v18, %v1945_v3  ;;  %v1950_v32 = vmul.f32 0.5, %v1949_v31  ;;  %v1966_v7 = vsel %vm1965_vm15, %v4815_v44, %v1962_v45 }
 0x340   :  { %v1988_v5 = vmul.f32 %v1966_v7, %v5738_v14  ;;  %vm1974_vm13 = vweird.f32 %v4819_v18 }
 0x341   :  { %v1902_v35 = vmul.f32 0.25, %v1898_v17  ;;  %v1969_v17 = vmul.f32 %v4819_v18, %v1968_v22  ;;  %v1951_v0 = vsub.f32 1.5, %v1950_v32  ;;  %v5765_v32 = vperm.slane %v230_v12, 0  ;;  %vm1975_vm15 = vmor %vm1973_vm14, %vm1974_vm13 }
 0x342   :  { %vm6809_vm13 = vcmask 1044483   ;;  %vm6810_vm14 = vcmask 57344  }
 0x343   :  { %v5753_v33 = vsub.f32 %v1868_v34, %v1902_v35 }
 0x345   :  { %v1910_v46 = vmul.f32 %v5753_v33, %v5753_v33 }
 0x347   :  { %v1932_v29 = vsel %vm677_vm11, %v1910_v46, 0.0 }
 0x348   :  { %v1933_v6 = vrot.slane %v1932_v29, 4 }
 0x34a   :  { %v1934_v62 = vadd.f32 %v1933_v6, %v1932_v29  ;;  %v1970_v29 = vmul.f32 0.5, %v1969_v17  ;;  %v1952_v6 = vmul.f32 %v4817_v51, %v1951_v0 }
 0x34c   :  { %v1935_v16 = vrot.slane %v1934_v62, 2  ;;  %v1971_v20 = vsub.f32 1.5, %v1970_v29  ;;  %v1956_v31 = vsel %vm1955_vm9, %v4817_v51, %v1952_v6  ;;  %v5772_v29 = vperm.slane %v230_v12, 2 }
 0x34d   :  { %v5775_v6 = vperm.slane %v230_v12, 3 }
 0x34e   :  { %v1936_v19 = vadd.f32 %v1935_v16, %v1934_v62  ;;  %v5759_v62 = vperm.slane %v230_v12, 1  ;;  %v231_v16 = vld [vmem:[#allocation10] sm:$0xf]  ;;  %v1972_v44 = vmul.f32 %v4819_v18, %v1971_v20 }
 0x34f   :  { %v5762_v1 = vperm.slane %v231_v16, 1  ;;  %v5769_v45 = vperm.slane %v231_v16, 0 }
 0x350   :  { %v1937_v34 = vrot.slane %v1936_v19, 1  ;;  %v2001_v30 = vmul.f32 %v5759_v62, %v1988_v5  ;;  %v1976_v11 = vsel %vm1975_vm15, %v4819_v18, %v1972_v44  ;;  %v5777_v18 = vperm.slane %v231_v16, 2  ;;  %vm6811_vm15 = vmmov %vm6810_vm14 }
 0x351   :  { %v1989_v0 = vmul.f32 %v1976_v11, %v5747_v63  ;;  %v5781_v44 = vperm.slane %v231_v16, 3 }
 0x352   :  { %v1938_v15 = vadd.f32 %v1937_v34, %v1936_v19  ;;  %v1987_v34 = vmul.f32 %v1956_v31, %v5736_v8  ;;  %v2014_v7 = vadd.f32 %v5762_v1, %v2001_v30  ;;  %6806 = vst [vmem:[#allocation157_spill] sm:$0xff] %v5777_v18 }
 0x353   :  { %v2002_v31 = vmul.f32 %v5772_v29, %v1989_v0  ;;  %6807 = vst [vmem:[#allocation158_spill] sm:$0xff] %v5781_v44 }
 0x354   :  { %v1942_v35 = vmul.f32 0.25, %v1938_v15  ;;  %v2000_v51 = vmul.f32 %v5765_v32, %v1987_v34 }
 0x355   :  { %v2015_v34 = vadd.f32 %v5777_v18, %v2002_v31 }
 0x356   :  { %v1946_v46 = vadd.f32 1e-05, %v1942_v35  ;;  %v2018_v35 = vmax.f32 %v2014_v7, 0.0  ;;  %v2013_v3 = vadd.f32 %v5769_v45, %v2000_v51  ;;  %v4870_v7 = vld [vmem:[#allocation5] sm:$0xff] }
 0x358   :  { %4820 = vrsqrt.f32 %v1946_v46  ;;  %vm1983_vm10 = vweird.f32 %v1946_v46  ;;  %v2025_v20 = vrot.slane %v2018_v35, 4  ;;  %v2017_v63 = vmax.f32 %v2013_v3, 0.0 }
 0x35e   :  { %v4821_v19 = vpop.eup %4820 }
 0x35f   :  { %v1978_v22 = vmul.f32 %v4821_v19, %v1946_v46  ;;  %vm1984_vm9 = vweird.f32 %v4821_v19  ;;  %v2027_v46 = vsel %vm677_vm11, %v2017_v63, %v2025_v20 }
 0x360   :  { %vm1985_vm12 = vmor %vm1983_vm10, %vm1984_vm9  ;;  %v5787_v11 = vadd.f32 %v4870_v7, %v2027_v46 }
 0x361   :  { %v1979_v14 = vmul.f32 %v4821_v19, %v1978_v22  ;;  %vm6812_vm9 = vmmov %vm6810_vm14 }
 0x362   :  { %vm6813_vm10 = vmmov %vm6812_vm9 }
 0x363   :  { %v1980_v15 = vmul.f32 0.5, %v1979_v14 }
 0x365   :  { %v1981_v17 = vsub.f32 1.5, %v1980_v15 }
 0x367   :  { %v1982_v8 = vmul.f32 %v4821_v19, %v1981_v17  ;;  %v5793_v17 = vrot.slane %v5787_v11, 3 }
 0x369   :  { %v1986_v5 = vsel %vm1985_vm12, %v4821_v19, %v1982_v8  ;;  %v2019_v19 = vmax.f32 %v2015_v34, 0.0  ;;  %v2038_v8 = vsel %vm239_vm0, %v5787_v11, %v5793_v17  ;;  %v2041_v46 = vsel %vm245_vm3, %v5787_v11, %v5793_v17  ;;  %vm6814_vm12 = vmmov %vm6812_vm9 }
 0x36a   :  { %v1990_v30 = vmul.f32 %v1986_v5, %v5753_v33  ;;  %v4871_v33 = vld [vmem:[#allocation5 + $0x8] sm:$0xff] }
 0x36c   :  { %v2003_v22 = vmul.f32 %v5775_v6, %v1990_v30 }
 0x36e   :  { %v2016_v12 = vadd.f32 %v5781_v44, %v2003_v22 }
 0x370   :  { %v2020_v14 = vmax.f32 %v2016_v12, 0.0 }
 0x372   :  { %v2026_v15 = vrot.slane %v2020_v14, 4 }
 0x374   :  { %v2028_v51 = vsel %vm677_vm11, %v2019_v19, %v2026_v15 }
 0x375   :  { %v5790_v16 = vadd.f32 %v4871_v33, %v2028_v51 }
 0x377   :  { %6808 = vst [vmem:[#allocation159_spill] sm:$0xff] %v5790_v16  ;;  %v5796_v35 = vrot.slane %v5790_v16, 6  ;;  %v5799_v0 = vrot.slane %v5790_v16, 1 }
 0x379   :  { %v2039_v3 = vsel %vm241_vm1, %v5796_v35, %v5799_v0  ;;  %v2042_v20 = vsel %vm247_vm4, %v5796_v35, %v5799_v0 }
 0x37a   :  { %v2040_v5 = vsel %vm243_vm2, %v2038_v8, %v2039_v3  ;;  %v2043_v14 = vsel %vm249_vm5, %v2041_v46, %v2042_v20  ;;  %v2045_v46 = vsel %vm241_vm1, %v5787_v11, %v5793_v17 }
 0x37b   :  { %v2053_v31 = vperm.slane %v2040_v5, 0  ;;  %v2054_v30 = vperm.slane %v2040_v5, 1  ;;  %v2055_v63 = vperm.slane %v2040_v5, 2  ;;  %v2056_v22 = vperm.slane %v2040_v5, 3 }
 0x37c   :  { %v2044_v33 = vrot.slane %v2043_v14, 1 }
 0x37d   :  { %v2085_v34 = vpack.c.bf16 %v2054_v30, %v2053_v31  ;;  %v2086_v12 = vpack.c.bf16 %v2056_v22, %v2055_v63  ;;  %v2046_v22 = vsel %vm253_vm6, %v5796_v35, %v5799_v0 }
 0x37e   :  { %v2057_v5 = vperm.slane %v2044_v33, 0  ;;  %v2058_v18 = vperm.slane %v2044_v33, 1  ;;  %v2059_v20 = vperm.slane %v2044_v33, 2  ;;  %v2060_v31 = vperm.slane %v2044_v33, 3 }
 0x37f   :  { %v2095_v7 = vunpack.c.l.b16 %v2085_v34  ;;  %v2096_v19 = vunpack.c.h.b16 %v2085_v34  ;;  %v2097_v15 = vunpack.c.l.b16 %v2086_v12  ;;  %v2098_v51 = vunpack.c.h.b16 %v2086_v12 }
 0x380   :  { %v2087_v30 = vpack.c.bf16 %v2058_v18, %v2057_v5  ;;  %v2088_v63 = vpack.c.bf16 %v2060_v31, %v2059_v20  ;;  %v2047_v14 = vsel %vm255_vm7, %v2045_v46, %v2046_v22 }
 0x381   :  { %v2099_v8 = vpack.c.b16 %v2095_v7, %v2095_v7  ;;  %v2100_v3 = vpack.c.b16 %v2096_v19, %v2096_v19  ;;  %v2101_v16 = vpack.c.b16 %v2097_v15, %v2097_v15  ;;  %v2102_v44 = vpack.c.b16 %v2098_v51, %v2098_v51 }
 0x382   :  { %v2163_v34 = vunpack.c.l.b16 %v2088_v63  ;;  %v2164_v12 = vunpack.c.h.b16 %v2088_v63  ;;  %v2048_v15 = vrot.slane %v2047_v14, 2 }
 0x383   :  { %2115 = vmatmul.bf16.vlgmr.msra.gmra.mxu0 %v2099_v8  ;;  %2128 = vmatmul.bf16.vlgmr.msra.gmra.mxu1 %v2100_v3 }
 0x384   :  { %2141 = vmatmul.bf16.vlgmr.msra.gmra.mxu2 %v2101_v16  ;;  %2154 = vmatmul.bf16.vlgmr.msra.gmra.mxu3 %v2102_v44  ;;  %v2161_v16 = vunpack.c.l.b16 %v2087_v30  ;;  %v2162_v44 = vunpack.c.h.b16 %v2087_v30  ;;  %v2167_v51 = vpack.c.b16 %v2163_v34, %v2163_v34  ;;  %v2168_v18 = vpack.c.b16 %v2164_v12, %v2164_v12 }
 0x385   :  { %2246 = vmatpush.bf16.xpose.msra.mxu0 %v5124_v52  ;;  %2259 = vmatpush.bf16.xpose.msra.mxu1 %v5126_v53  ;;  %v2061_v33 = vperm.slane %v2048_v15, 0  ;;  %v2062_v8 = vperm.slane %v2048_v15, 1  ;;  %v2063_v3 = vperm.slane %v2048_v15, 2  ;;  %v2064_v5 = vperm.slane %v2048_v15, 3 }
 0x386   :  { %2272 = vmatpush.bf16.xpose.msra.mxu2 %v5128_v56  ;;  %2285 = vmatpush.bf16.xpose.msra.mxu3 %v5130_v57  ;;  %v2165_v7 = vpack.c.b16 %v2161_v16, %v2161_v16  ;;  %v2166_v19 = vpack.c.b16 %v2162_v44, %v2162_v44  ;;  %v2050_v30 = vsel %vm6664_vm8, %v5796_v35, %v5799_v0 }
 0x387   :  { %v2089_v20 = vpack.c.bf16 %v2062_v8, %v2061_v33  ;;  %v2090_v31 = vpack.c.bf16 %v2064_v5, %v2063_v3  ;;  %v2049_v16 = vsel %vm247_vm4, %v5787_v11, %v5793_v17 }
 0x388   :  { %v2051_v34 = vsel %vm6809_vm13, %v2049_v16, %v2050_v30  ;;  %vm6815_vm13 = vmmov %vm6812_vm9 }
 0x389   :  { %v2227_v63 = vunpack.c.l.b16 %v2089_v20  ;;  %v2228_v22 = vunpack.c.h.b16 %v2089_v20  ;;  %v2229_v44 = vunpack.c.l.b16 %v2090_v31  ;;  %v2230_v46 = vunpack.c.h.b16 %v2090_v31 }
 0x38b   :  { %v2231_v12 = vpack.c.b16 %v2227_v63, %v2227_v63  ;;  %v2232_v14 = vpack.c.b16 %v2228_v22, %v2228_v22  ;;  %v2234_v15 = vpack.c.b16 %v2230_v46, %v2230_v46 }
 0x393   :  { %2181 = vmatmul.bf16.vlgmr.msrb.gmra.mxu0 %v2165_v7  ;;  %2194 = vmatmul.bf16.vlgmr.msrb.gmra.mxu1 %v2166_v19  ;;  %v2052_v7 = vrot.slane %v2051_v34, 3  ;;  %v2233_v19 = vpack.c.b16 %v2229_v44, %v2229_v44 }
 0x394   :  { %2207 = vmatmul.bf16.vlgmr.msrb.gmra.mxu2 %v2167_v51  ;;  %2220 = vmatmul.bf16.vlgmr.msrb.gmra.mxu3 %v2168_v18 }
 0x395   :  { %2312 = vmatpush.bf16.xpose.msrb.mxu0 %v5143_v25  ;;  %2325 = vmatpush.bf16.xpose.msrb.mxu1 %v5145_v26  ;;  %v2065_v35 = vperm.slane %v2052_v7, 0  ;;  %v2066_v0 = vperm.slane %v2052_v7, 1  ;;  %v2067_v17 = vperm.slane %v2052_v7, 2  ;;  %v2068_v51 = vperm.slane %v2052_v7, 3 }
 0x396   :  { %2338 = vmatpush.bf16.xpose.msrb.mxu2 %v5147_v27  ;;  %2351 = vmatpush.bf16.xpose.msrb.mxu3 %v5149_v28 }
 0x397   :  { %v2091_v18 = vpack.c.bf16 %v2066_v0, %v2065_v35  ;;  %v2092_v33 = vpack.c.bf16 %v2068_v51, %v2067_v17 }
 0x399   :  { %v2293_v8 = vunpack.c.l.b16 %v2091_v18  ;;  %v2294_v3 = vunpack.c.h.b16 %v2091_v18  ;;  %v2295_v5 = vunpack.c.l.b16 %v2092_v33  ;;  %v2296_v20 = vunpack.c.h.b16 %v2092_v33 }
 0x39b   :  { %v2297_v31 = vpack.c.b16 %v2293_v8, %v2293_v8  ;;  %v2298_v30 = vpack.c.b16 %v2294_v3, %v2294_v3  ;;  %v2299_v63 = vpack.c.b16 %v2295_v5, %v2295_v5  ;;  %v2300_v22 = vpack.c.b16 %v2296_v20, %v2296_v20 }
 0x3a3   :  { %2247 = vmatmul.bf16.vlgmr.msra.gmra.mxu0 %v2231_v12  ;;  %2260 = vmatmul.bf16.vlgmr.msra.gmra.mxu1 %v2232_v14 }
 0x3a4   :  { %2273 = vmatmul.bf16.vlgmr.msra.gmra.mxu2 %v2233_v19  ;;  %2286 = vmatmul.bf16.vlgmr.msra.gmra.mxu3 %v2234_v15 }
 0x3a5   :  { %2415 = vmatpush.bf16.msra.mxu0 %v5178_v36  ;;  %2428 = vmatpush.bf16.msra.mxu1 %v5182_v37 }
 0x3a6   :  { %2441 = vmatpush.bf16.msra.mxu2 %v5186_v38  ;;  %2454 = vmatpush.bf16.msra.mxu3 %v5190_v39 }
 0x3b3   :  { %2313 = vmatmul.bf16.vlgmr.msrb.gmra.mxu0 %v2297_v31  ;;  %2326 = vmatmul.bf16.vlgmr.msrb.gmra.mxu1 %v2298_v30 }
 0x3b4   :  { %2339 = vmatmul.bf16.vlgmr.msrb.gmra.mxu2 %v2299_v63  ;;  %2352 = vmatmul.bf16.vlgmr.msrb.gmra.mxu3 %v2300_v22 }
 0x3b5   :  { %2470 = vmatpush.bf16.msrb.mxu0 %v5198_v40  ;;  %2483 = vmatpush.bf16.msrb.mxu1 %v5202_v41 }
 0x3b6   :  { %2496 = vmatpush.bf16.msrb.mxu2 %v5206_v42  ;;  %2509 = vmatpush.bf16.msrb.mxu3 %v5210_v43 }
 0x400   :  { %v2116_v16 = vpop.f32.mrf.mxu0  ;;  %v2129_v44 = vpop.f32.mrf.mxu1 }
 0x401   :  { %v2130_v46 = vadd.f32 %v2129_v44, %v2116_v16 }
 0x407   :  { %v2142_v34 = vpop.f32.mrf.mxu2  ;;  %v2155_v12 = vpop.f32.mrf.mxu3 }
 0x408   :  { %v2143_v14 = vadd.f32 %v2142_v34, %v2130_v46  ;;  %v2118_v7 = vpop.f32.mrf.mxu0  ;;  %v2131_v19 = vpop.f32.mrf.mxu1 }
 0x40a   :  { %v2156_v15 = vadd.f32 %v2155_v12, %v2143_v14 }
 0x40c   :  { %v2357_v35 = vsel %vm6810_vm14, %v2156_v15, -inf  ;;  %vm6816_vm14 = vmmov %vm6812_vm9 }
 0x40d   :  { %2358 = vmax.xlane.f32.xlu2 %v2357_v35 }
 0x40f   :  { %v2144_v0 = vpop.f32.mrf.mxu2  ;;  %v2157_v17 = vpop.f32.mrf.mxu3 }
 0x410   :  { %v2182_v51 = vpop.f32.mrf.mxu0  ;;  %v2195_v18 = vpop.f32.mrf.mxu1 }
 0x411   :  { %v2196_v33 = vadd.f32 %v2195_v18, %v2182_v51 }
 0x417   :  { %v2208_v8 = vpop.f32.mrf.mxu2  ;;  %v2221_v3 = vpop.f32.mrf.mxu3 }
 0x418   :  { %v2209_v5 = vadd.f32 %v2208_v8, %v2196_v33  ;;  %v2184_v20 = vpop.f32.mrf.mxu0  ;;  %v2197_v31 = vpop.f32.mrf.mxu1 }
 0x41a   :  { %v2222_v30 = vadd.f32 %v2221_v3, %v2209_v5 }
 0x41c   :  { %v2360_v63 = vsel %vm6811_vm15, %v2222_v30, -inf  ;;  %vm6817_vm15 = vmmov %vm6812_vm9 }
 0x41d   :  { %2361 = vmax.xlane.f32.xlu0 %v2360_v63 }
 0x41f   :  { %v2210_v22 = vpop.f32.mrf.mxu2  ;;  %v2223_v16 = vpop.f32.mrf.mxu3 }
 0x420   :  { %v2248_v44 = vpop.f32.mrf.mxu0  ;;  %v2261_v46 = vpop.f32.mrf.mxu1 }
 0x421   :  { %v2262_v34 = vadd.f32 %v2261_v46, %v2248_v44 }
 0x427   :  { %v2274_v12 = vpop.f32.mrf.mxu2  ;;  %v2287_v14 = vpop.f32.mrf.mxu3 }
 0x428   :  { %v2275_v7 = vadd.f32 %v2274_v12, %v2262_v34  ;;  %v2250_v19 = vpop.f32.mrf.mxu0  ;;  %v2263_v35 = vpop.f32.mrf.mxu1 }
 0x42a   :  { %v2288_v0 = vadd.f32 %v2287_v14, %v2275_v7 }
 0x42c   :  { %v2363_v17 = vsel %vm6812_vm9, %v2288_v0, -inf  ;;  %vm6818_vm9 = vcmask 64512  }
 0x42d   :  { %2364 = vmax.xlane.f32.xlu1 %v2363_v17 }
 0x42f   :  { %v2276_v51 = vpop.f32.mrf.mxu2  ;;  %v2289_v18 = vpop.f32.mrf.mxu3 }
 0x430   :  { %v2314_v33 = vpop.f32.mrf.mxu0  ;;  %v2327_v8 = vpop.f32.mrf.mxu1 }
 0x431   :  { %v2328_v3 = vadd.f32 %v2327_v8, %v2314_v33 }
 0x437   :  { %v2340_v5 = vpop.f32.mrf.mxu2  ;;  %v2353_v20 = vpop.f32.mrf.mxu3 }
 0x438   :  { %v2341_v31 = vadd.f32 %v2340_v5, %v2328_v3  ;;  %v2316_v63 = vpop.f32.mrf.mxu0  ;;  %v2329_v22 = vpop.f32.mrf.mxu1 }
 0x43a   :  { %v2354_v16 = vadd.f32 %v2353_v20, %v2341_v31 }
 0x43c   :  { %v2366_v44 = vsel %vm6813_vm10, %v2354_v16, -inf  ;;  %vm6819_vm10 = vmmov %vm6818_vm9 }
 0x43d   :  { %2367 = vmax.xlane.f32.xlu2 %v2366_v44 }
 0x43f   :  { %v2342_v46 = vpop.f32.mrf.mxu2  ;;  %v2355_v34 = vpop.f32.mrf.mxu3 }
 0x480   :  { %v2359_v12 = vpop.xlane.xlu2 %2358 }
 0x481   :  { %v2369_v14 = vsub.f32 %v2156_v15, %v2359_v12 }
 0x483   :  { %v2373_v7 = vmul.f32 1.442695, %v2369_v14 }
 0x485   :  { %4822 = vpow2.f32 %v2373_v7 }
 0x48b   :  { %v4823_v19 = vpop.eup %4822 }
 0x48c   :  { %v2381_v35 = vsel %vm6814_vm12, %v4823_v19, 0.0  ;;  %vm6820_vm12 = vmmov %vm6818_vm9 }
 0x48d   :  { %2382 = vadd.xlane.f32.xlu0 %v2381_v35 }
 0x490   :  { %v2362_v17 = vpop.xlane.xlu0 %2361 }
 0x491   :  { %v2370_v51 = vsub.f32 %v2222_v30, %v2362_v17 }
 0x493   :  { %v2375_v18 = vmul.f32 1.442695, %v2370_v51 }
 0x495   :  { %4824 = vpow2.f32 %v2375_v18 }
 0x49b   :  { %v4825_v33 = vpop.eup %4824 }
 0x49c   :  { %v2384_v8 = vsel %vm6815_vm13, %v4825_v33, 0.0  ;;  %vm6821_vm13 = vmmov %vm6818_vm9 }
 0x49d   :  { %2385 = vadd.xlane.f32.xlu1 %v2384_v8  ;;  %v6829_v8 = vld [vmem:[#allocation33_spill] sm:$0xff] }
 0x4a0   :  { %v2365_v3 = vpop.xlane.xlu1 %2364 }
 0x4a1   :  { %v2371_v5 = vsub.f32 %v2288_v0, %v2365_v3  ;;  %v6830_v3 = vld [vmem:[#allocation34_spill] sm:$0xff] }
 0x4a3   :  { %v2377_v20 = vmul.f32 1.442695, %v2371_v5  ;;  %v6831_v5 = vld [vmem:[#allocation37_spill] sm:$0xff] }
 0x4a5   :  { %4826 = vpow2.f32 %v2377_v20  ;;  %v6832_v20 = vld [vmem:[#allocation38_spill] sm:$0xff] }
 0x4ab   :  { %v4827_v31 = vpop.eup %4826 }
 0x4ac   :  { %v2387_v15 = vsel %vm6816_vm14, %v4827_v31, 0.0  ;;  %vm6822_vm14 = vmmov %vm6818_vm9 }
 0x4ad   :  { %2388 = vadd.xlane.f32.xlu2 %v2387_v15 }
 0x4b0   :  { %v2368_v63 = vpop.xlane.xlu2 %2367 }
 0x4b1   :  { %v2372_v22 = vsub.f32 %v2354_v16, %v2368_v63  ;;  %v6834_v63 = vld [vmem:[#allocation36_spill] sm:$0xff] }
 0x4b3   :  { %v2379_v44 = vmul.f32 1.442695, %v2372_v22  ;;  %v6835_v22 = vld [vmem:[#allocation41_spill] sm:$0xff] }
 0x4b5   :  { %4828 = vpow2.f32 %v2379_v44  ;;  %v6836_v44 = vld [vmem:[#allocation42_spill] sm:$0xff] }
 0x4bb   :  { %v4829_v46 = vpop.eup %4828 }
 0x4bc   :  { %v2390_v30 = vsel %vm6817_vm15, %v4829_v46, 0.0  ;;  %vm6823_vm15 = vmmov %vm6818_vm9 }
 0x4bd   :  { %2391 = vadd.xlane.f32.xlu0 %v2390_v30  ;;  %v6837_v30 = vld [vmem:[#allocation39_spill] sm:$0xff] }
 0x500   :  { %v2383_v34 = vpop.xlane.xlu0 %2382 }
 0x501   :  { %4830 = vrcp.f32 %v2383_v34  ;;  %v6838_v34 = vld [vmem:[#allocation40_spill] sm:$0xff] }
 0x507   :  { %v4831_v12 = vpop.eup %4830 }
 0x508   :  { %v2397_v14 = vmul.f32 %v4831_v12, %v4823_v19 }
 0x50a   :  { %v2401_v7 = vpack.c.bf16 %v2397_v14, %v2397_v14  ;;  %v6839_v14 = vld [vmem:[#allocation45_spill] sm:$0xff] }
 0x50c   :  { %4630 = vmatmul.msk.bf16.vlgmr.msra.gmra.mxu0 %vm6818_vm9, %v2401_v7  ;;  %4631 = vmatmul.msk.bf16.vlgmr.msra.gmra.mxu1 %vm6819_vm10, %v2401_v7  ;;  %vm6824_vm10 = vmmov %vm6818_vm9 }
 0x50d   :  { %4632 = vmatmul.msk.bf16.vlgmr.msra.gmra.mxu2 %vm6820_vm12, %v2401_v7  ;;  %4633 = vmatmul.msk.bf16.vlgmr.msra.gmra.mxu3 %vm6821_vm13, %v2401_v7  ;;  %vm6825_vm12 = vmmov %vm6818_vm9  ;;  %v6840_v7 = vld [vmem:[#allocation46_spill] sm:$0xff] }
 0x50e   :  { %2525 = vmatpush.bf16.msra.mxu0 %v5218_v48  ;;  %2538 = vmatpush.bf16.msra.mxu1 %v5222_v49  ;;  %vm6826_vm13 = vmmov %vm6818_vm9 }
 0x50f   :  { %2551 = vmatpush.bf16.msra.mxu2 %v5228_v50  ;;  %2564 = vmatpush.bf16.msra.mxu3 %v5232_v2 }
 0x510   :  { %v2386_v0 = vpop.xlane.xlu1 %2385 }
 0x511   :  { %4832 = vrcp.f32 %v2386_v0 }
 0x517   :  { %v4833_v16 = vpop.eup %4832 }
 0x518   :  { %v2398_v19 = vmul.f32 %v4833_v16, %v4825_v33 }
 0x51a   :  { %v2402_v35 = vpack.c.bf16 %v2398_v19, %v2398_v19  ;;  %v6841_v19 = vld [vmem:[#allocation43_spill] sm:$0xff] }
 0x51c   :  { %4634 = vmatmul.msk.bf16.vlgmr.msrb.gmra.mxu0 %vm6822_vm14, %v2402_v35  ;;  %4635 = vmatmul.msk.bf16.vlgmr.msrb.gmra.mxu1 %vm6823_vm15, %v2402_v35  ;;  %vm6827_vm14 = vmmov %vm6818_vm9 }
 0x51d   :  { %4636 = vmatmul.msk.bf16.vlgmr.msrb.gmra.mxu2 %vm6818_vm9, %v2402_v35  ;;  %4637 = vmatmul.msk.bf16.vlgmr.msrb.gmra.mxu3 %vm6824_vm10, %v2402_v35  ;;  %vm6828_vm15 = vmmov %vm6818_vm9  ;;  %v6842_v35 = vld [vmem:[#allocation44_spill] sm:$0xff] }
 0x51e   :  { %2580 = vmatpush.bf16.msrb.mxu0 %v5242_v54  ;;  %2593 = vmatpush.bf16.msrb.mxu1 %v5246_v55  ;;  %vm6845_vm10 = vmmov %vm6818_vm9 }
 0x51f   :  { %2606 = vmatpush.bf16.msrb.mxu2 %v5252_v58  ;;  %2619 = vmatpush.bf16.msrb.mxu3 %v5256_v59 }
 0x520   :  { %v2389_v17 = vpop.xlane.xlu2 %2388 }
 0x521   :  { %4834 = vrcp.f32 %v2389_v17  ;;  %v6843_v17 = vld [vmem:[#allocation49_spill] sm:$0xff] }
 0x527   :  { %v4835_v51 = vpop.eup %4834 }
 0x528   :  { %v2399_v18 = vmul.f32 %v4835_v51, %v4827_v31  ;;  %v6833_v31 = vld [vmem:[#allocation35_spill] sm:$0xff]  ;;  %v6844_v51 = vld [vmem:[#allocation50_spill] sm:$0xff] }
 0x52a   :  { %v2403_v33 = vpack.c.bf16 %v2399_v18, %v2399_v18  ;;  %v6848_v18 = vld [vmem:[#allocation47_spill] sm:$0xff] }
 0x52c   :  { %4638 = vmatmul.msk.bf16.vlgmr.msra.gmra.mxu0 %vm6825_vm12, %v2403_v33  ;;  %4639 = vmatmul.msk.bf16.vlgmr.msra.gmra.mxu1 %vm6826_vm13, %v2403_v33  ;;  %vm6846_vm12 = vmmov %vm6818_vm9 }
 0x52d   :  { %4640 = vmatmul.msk.bf16.vlgmr.msra.gmra.mxu2 %vm6827_vm14, %v2403_v33  ;;  %4641 = vmatmul.msk.bf16.vlgmr.msra.gmra.mxu3 %vm6828_vm15, %v2403_v33  ;;  %vm6847_vm13 = vmmov %vm6818_vm9  ;;  %v6850_v33 = vld [vmem:[#allocation53_spill] sm:$0xff] }
 0x52e   :  { %2705 = vmatpush.bf16.msra.mxu0 %v6829_v8  ;;  %2718 = vmatpush.bf16.msra.mxu1 %v6830_v3 }
 0x52f   :  { %2731 = vmatpush.bf16.msra.mxu2 %v6831_v5  ;;  %2744 = vmatpush.bf16.msra.mxu3 %v6832_v20 }
 0x530   :  { %v2392_v15 = vpop.xlane.xlu0 %2391 }
 0x531   :  { %4836 = vrcp.f32 %v2392_v15  ;;  %v6851_v15 = vld [vmem:[#allocation54_spill] sm:$0xff] }
 0x532   :  { %2706 = vmatpush.bf16.msra.mxu0 %v6833_v31  ;;  %2719 = vmatpush.bf16.msra.mxu1 %v6834_v63 }
 0x533   :  { %2732 = vmatpush.bf16.msra.mxu2 %v6835_v22  ;;  %2745 = vmatpush.bf16.msra.mxu3 %v6836_v44 }
 0x536   :  { %2707 = vmatpush.bf16.msra.mxu0 %v6837_v30  ;;  %2720 = vmatpush.bf16.msra.mxu1 %v6838_v34 }
 0x537   :  { %v4837_v12 = vpop.eup %4836  ;;  %2733 = vmatpush.bf16.msra.mxu2 %v6839_v14  ;;  %2746 = vmatpush.bf16.msra.mxu3 %v6840_v7 }
 0x538   :  { %v2400_v0 = vmul.f32 %v4837_v12, %v4829_v46  ;;  %v6849_v46 = vld [vmem:[#allocation48_spill] sm:$0xff]  ;;  %v6852_v12 = vld [vmem:[#allocation51_spill] sm:$0xff] }
 0x53a   :  { %v2404_v16 = vpack.c.bf16 %v2400_v0, %v2400_v0  ;;  %2708 = vmatpush.bf16.msra.mxu0 %v6841_v19  ;;  %2721 = vmatpush.bf16.msra.mxu1 %v6842_v35  ;;  %v6853_v0 = vld [vmem:[#allocation52_spill] sm:$0xff]  ;;  %v6856_v35 = vld [vmem:[#allocation55_spill] sm:$0xff] }
 0x53b   :  { %2734 = vmatpush.bf16.msra.mxu2 %v6843_v17  ;;  %2747 = vmatpush.bf16.msra.mxu3 %v6844_v51  ;;  %v6854_v51 = vld [vmem:[#allocation57_spill] sm:$0xff]  ;;  %v6855_v17 = vld [vmem:[#allocation58_spill] sm:$0xff]  ;;  %v6857_v19 = vld [vmem:[#allocation56_spill] sm:$0xff] }
 0x53c   :  { %4642 = vmatmul.msk.bf16.vlgmr.msrb.gmra.mxu0 %vm6818_vm9, %v2404_v16  ;;  %4643 = vmatmul.msk.bf16.vlgmr.msrb.gmra.mxu1 %vm6845_vm10, %v2404_v16 }
 0x53d   :  { %4644 = vmatmul.msk.bf16.vlgmr.msrb.gmra.mxu2 %vm6846_vm12, %v2404_v16  ;;  %4645 = vmatmul.msk.bf16.vlgmr.msrb.gmra.mxu3 %vm6847_vm13, %v2404_v16  ;;  %v6858_v16 = vld [vmem:[#allocation63_spill] sm:$0xff] }
 0x53e   :  { %2709 = vmatpush.bf16.msra.mxu0 %v6848_v18  ;;  %2722 = vmatpush.bf16.msra.mxu1 %v6849_v46  ;;  %v6859_v18 = vld [vmem:[#allocation64_spill] sm:$0xff]  ;;  %v6860_v46 = vld [vmem:[#allocation59_spill] sm:$0xff] }
 0x53f   :  { %2735 = vmatpush.bf16.msra.mxu2 %v6850_v33  ;;  %2748 = vmatpush.bf16.msra.mxu3 %v6851_v15  ;;  %v6861_v33 = vld [vmem:[#allocation60_spill] sm:$0xff]  ;;  %v6862_v15 = vld [vmem:[#allocation61_spill] sm:$0xff] }
 0x542   :  { %2710 = vmatpush.bf16.msra.mxu0 %v6852_v12  ;;  %2723 = vmatpush.bf16.msra.mxu1 %v6853_v0  ;;  %v6863_v12 = vld [vmem:[#allocation62_spill] sm:$0xff]  ;;  %v6864_v0 = vld [vmem:[#allocation67_spill] sm:$0xff] }
 0x543   :  { %2736 = vmatpush.bf16.msra.mxu2 %v6854_v51  ;;  %2749 = vmatpush.bf16.msra.mxu3 %v6855_v17  ;;  %v6865_v51 = vld [vmem:[#allocation68_spill] sm:$0xff]  ;;  %v6866_v17 = vld [vmem:[#allocation69_spill] sm:$0xff] }
 0x546   :  { %2711 = vmatpush.bf16.msra.mxu0 %v6856_v35  ;;  %2724 = vmatpush.bf16.msra.mxu1 %v6857_v19  ;;  %v6867_v35 = vld [vmem:[#allocation70_spill] sm:$0xff]  ;;  %v6868_v19 = vld [vmem:[#allocation65_spill] sm:$0xff] }
 0x547   :  { %2737 = vmatpush.bf16.msra.mxu2 %v6858_v16  ;;  %2750 = vmatpush.bf16.msra.mxu3 %v6859_v18  ;;  %v6869_v16 = vld [vmem:[#allocation66_spill] sm:$0xff]  ;;  %v6870_v18 = vld [vmem:[#allocation73_spill] sm:$0xff] }
 0x54a   :  { %2712 = vmatpush.bf16.msra.mxu0 %v6860_v46  ;;  %2725 = vmatpush.bf16.msra.mxu1 %v6861_v33  ;;  %v6871_v46 = vld [vmem:[#allocation74_spill] sm:$0xff]  ;;  %v6872_v33 = vld [vmem:[#allocation71_spill] sm:$0xff] }
 0x54b   :  { %2738 = vmatpush.bf16.msra.mxu2 %v6864_v0  ;;  %2751 = vmatpush.bf16.msra.mxu3 %v6865_v51  ;;  %v6875_v0 = vld [vmem:[#allocation78_spill] sm:$0xff]  ;;  %v6876_v51 = vld [vmem:[#allocation75_spill] sm:$0xff] }
 0x54e   :  { %2757 = vmatpush.bf16.msrb.mxu0 %v6862_v15  ;;  %2770 = vmatpush.bf16.msrb.mxu1 %v6863_v12  ;;  %v6873_v15 = vld [vmem:[#allocation72_spill] sm:$0xff]  ;;  %v6874_v12 = vld [vmem:[#allocation77_spill] sm:$0xff] }
 0x54f   :  { %2783 = vmatpush.bf16.msrb.mxu2 %v6866_v17  ;;  %2796 = vmatpush.bf16.msrb.mxu3 %v6867_v35  ;;  %v6877_v17 = vld [vmem:[#allocation76_spill] sm:$0xff]  ;;  %v6878_v35 = vld [vmem:[#allocation81_spill] sm:$0xff] }
 0x552   :  { %2758 = vmatpush.bf16.msrb.mxu0 %v6868_v19  ;;  %2771 = vmatpush.bf16.msrb.mxu1 %v6869_v16  ;;  %v6879_v19 = vld [vmem:[#allocation82_spill] sm:$0xff]  ;;  %v6880_v16 = vld [vmem:[#allocation79_spill] sm:$0xff] }
 0x553   :  { %2784 = vmatpush.bf16.msrb.mxu2 %v6870_v18  ;;  %2797 = vmatpush.bf16.msrb.mxu3 %v6871_v46  ;;  %v6881_v18 = vld [vmem:[#allocation80_spill] sm:$0xff]  ;;  %v6882_v46 = vld [vmem:[#allocation85_spill] sm:$0xff] }
 0x556   :  { %2759 = vmatpush.bf16.msrb.mxu0 %v6872_v33  ;;  %2772 = vmatpush.bf16.msrb.mxu1 %v6873_v15  ;;  %v6883_v33 = vld [vmem:[#allocation86_spill] sm:$0xff]  ;;  %v6884_v15 = vld [vmem:[#allocation83_spill] sm:$0xff] }
 0x557   :  { %2785 = vmatpush.bf16.msrb.mxu2 %v6874_v12  ;;  %2798 = vmatpush.bf16.msrb.mxu3 %v6875_v0  ;;  %v6885_v12 = vld [vmem:[#allocation84_spill] sm:$0xff]  ;;  %v6886_v0 = vld [vmem:[#allocation89_spill] sm:$0xff] }
 0x55a   :  { %2760 = vmatpush.bf16.msrb.mxu0 %v6876_v51  ;;  %2773 = vmatpush.bf16.msrb.mxu1 %v6877_v17  ;;  %v6887_v51 = vld [vmem:[#allocation90_spill] sm:$0xff]  ;;  %v6888_v17 = vld [vmem:[#allocation87_spill] sm:$0xff] }
 0x55b   :  { %2786 = vmatpush.bf16.msrb.mxu2 %v6878_v35  ;;  %2799 = vmatpush.bf16.msrb.mxu3 %v6879_v19  ;;  %v6889_v35 = vld [vmem:[#allocation88_spill] sm:$0xff]  ;;  %v6890_v19 = vld [vmem:[#allocation93_spill] sm:$0xff] }
 0x55e   :  { %2761 = vmatpush.bf16.msrb.mxu0 %v6880_v16  ;;  %2774 = vmatpush.bf16.msrb.mxu1 %v6881_v18  ;;  %v6891_v16 = vld [vmem:[#allocation94_spill] sm:$0xff]  ;;  %v6892_v18 = vld [vmem:[#allocation91_spill] sm:$0xff] }
 0x55f   :  { %2787 = vmatpush.bf16.msrb.mxu2 %v6882_v46  ;;  %2800 = vmatpush.bf16.msrb.mxu3 %v6883_v33  ;;  %v6893_v46 = vld [vmem:[#allocation92_spill] sm:$0xff]  ;;  %v6894_v33 = vld [vmem:[#allocation95_spill] sm:$0xff] }
 0x562   :  { %2762 = vmatpush.bf16.msrb.mxu0 %v6884_v15  ;;  %2775 = vmatpush.bf16.msrb.mxu1 %v6885_v12  ;;  %v6895_v15 = vld [vmem:[#allocation96_spill] sm:$0xff] }
 0x563   :  { %2788 = vmatpush.bf16.msrb.mxu2 %v6886_v0  ;;  %2801 = vmatpush.bf16.msrb.mxu3 %v6887_v51 }
 0x566   :  { %2763 = vmatpush.bf16.msrb.mxu0 %v6888_v17  ;;  %2776 = vmatpush.bf16.msrb.mxu1 %v6889_v35 }
 0x567   :  { %2789 = vmatpush.bf16.msrb.mxu2 %v6890_v19  ;;  %2802 = vmatpush.bf16.msrb.mxu3 %v6891_v16 }
 0x56a   :  { %2764 = vmatpush.bf16.msrb.mxu0 %v6892_v18  ;;  %2777 = vmatpush.bf16.msrb.mxu1 %v6893_v46 }
 0x56b   :  { %2790 = vmatpush.bf16.msrb.mxu2 %v6894_v33  ;;  %2803 = vmatpush.bf16.msrb.mxu3 %v6895_v15 }
 0x589   :  { %v2417_v12 = vpop.f32.mrf.mxu0  ;;  %v2430_v0 = vpop.f32.mrf.mxu1 }
 0x58a   :  { %v2625_v55 = vpack.c.bf16 %v2417_v12, %v2417_v12  ;;  %v2626_v54 = vpack.c.bf16 %v2430_v0, %v2430_v0 }
 0x590   :  { %v5941_v7 = vpop.f32.mrf.mxu2  ;;  %v5943_v51 = vpop.f32.mrf.mxu3 }
 0x591   :  { %v2419_v17 = vpop.f32.mrf.mxu0  ;;  %v2432_v35 = vpop.f32.mrf.mxu1 }
 0x598   :  { %v2445_v14 = vpop.f32.mrf.mxu2  ;;  %v2458_v19 = vpop.f32.mrf.mxu3 }
 0x599   :  { %v2472_v34 = vpop.f32.mrf.mxu0  ;;  %v2485_v16 = vpop.f32.mrf.mxu1 }
 0x59a   :  { %v2629_v5 = vpack.c.bf16 %v2472_v34, %v2472_v34  ;;  %v2630_v3 = vpack.c.bf16 %v2485_v16, %v2485_v16 }
 0x59c   :  { %v2661_v14 = vunpack.c.l.b16 %v2629_v5  ;;  %v2662_v19 = vunpack.c.l.b16 %v2630_v3 }
 0x59e   :  { %v2673_v49 = vrot.slane %v2661_v14, 7  ;;  %v2679_v48 = vrot.slane %v2662_v19, 7 }
 0x5a0   :  { %v2498_v30 = vpop.f32.mrf.mxu2  ;;  %v2511_v18 = vpop.f32.mrf.mxu3 }
 0x5a1   :  { %v2474_v44 = vpop.f32.mrf.mxu0  ;;  %v2487_v46 = vpop.f32.mrf.mxu1 }
 0x5a2   :  { %v2631_v44 = vpack.c.bf16 %v2498_v30, %v2498_v30  ;;  %v2632_v46 = vpack.c.bf16 %v2511_v18, %v2511_v18 }
 0x5a4   :  { %v2663_v12 = vunpack.c.l.b16 %v2631_v44  ;;  %v2664_v0 = vunpack.c.l.b16 %v2632_v46 }
 0x5a8   :  { %v2500_v22 = vpop.f32.mrf.mxu2  ;;  %v2513_v33 = vpop.f32.mrf.mxu3 }
 0x5a9   :  { %v2527_v63 = vpop.f32.mrf.mxu0  ;;  %v2540_v15 = vpop.f32.mrf.mxu1 }
 0x5aa   :  { %v2633_v17 = vpack.c.bf16 %v2527_v63, %v2527_v63  ;;  %v2634_v35 = vpack.c.bf16 %v2540_v15, %v2540_v15  ;;  %v2657_v63 = vunpack.c.l.b16 %v2625_v55  ;;  %v2658_v15 = vunpack.c.l.b16 %v2626_v54 }
 0x5ab   :  { %v2685_v55 = vrot.slane %v2663_v12, 7  ;;  %v6896_v12 = vld [vmem:[#allocation97_spill] sm:$0xff] }
 0x5ac   :  { %v2665_v58 = vunpack.c.l.b16 %v2633_v17  ;;  %v2666_v2 = vunpack.c.l.b16 %v2634_v35  ;;  %v2674_v30 = vsel %vm245_vm3, %v2673_v49, %v2657_v63  ;;  %v2680_v18 = vsel %vm245_vm3, %v2679_v48, %v2658_v15 }
 0x5ae   :  { %v2675_v5 = vrot.slane %v2665_v58, 6  ;;  %v2681_v3 = vrot.slane %v2666_v2, 6  ;;  %v2691_v58 = vrot.slane %v2664_v0, 7 }
 0x5b0   :  { %v2553_v31 = vpop.f32.mrf.mxu2  ;;  %v2566_v20 = vpop.f32.mrf.mxu3  ;;  %v2676_v2 = vsel %vm241_vm1, %v2675_v5, %v2674_v30  ;;  %v2682_v54 = vsel %vm241_vm1, %v2681_v3, %v2680_v18 }
 0x5b1   :  { %v2529_v8 = vpop.f32.mrf.mxu0  ;;  %v2542_v59 = vpop.f32.mrf.mxu1  ;;  %v2635_v34 = vpack.c.bf16 %v2553_v31, %v2553_v31  ;;  %v2636_v16 = vpack.c.bf16 %v2566_v20, %v2566_v20 }
 0x5b3   :  { %v2667_v14 = vunpack.c.l.b16 %v2635_v34  ;;  %v2668_v19 = vunpack.c.l.b16 %v2636_v16 }
 0x5b8   :  { %v2555_v22 = vpop.f32.mrf.mxu2  ;;  %v2568_v33 = vpop.f32.mrf.mxu3 }
 0x5b9   :  { %v2582_v50 = vpop.f32.mrf.mxu0  ;;  %v2595_v43 = vpop.f32.mrf.mxu1 }
 0x5ba   :  { %v2637_v8 = vpack.c.bf16 %v2582_v50, %v2582_v50  ;;  %v2638_v59 = vpack.c.bf16 %v2595_v43, %v2595_v43  ;;  %v2627_v50 = vpack.c.bf16 %v5941_v7, %v5941_v7  ;;  %v2628_v43 = vpack.c.bf16 %v5943_v51, %v5943_v51 }
 0x5bc   :  { %v2669_v17 = vunpack.c.l.b16 %v2637_v8  ;;  %v2670_v35 = vunpack.c.l.b16 %v2638_v59  ;;  %v2687_v8 = vrot.slane %v2667_v14, 6  ;;  %v2693_v59 = vrot.slane %v2668_v19, 6 }
 0x5bd   :  { %v2659_v63 = vunpack.c.l.b16 %v2627_v50  ;;  %v2660_v15 = vunpack.c.l.b16 %v2628_v43 }
 0x5be   :  { %v2677_v22 = vrot.slane %v2669_v17, 5  ;;  %v2683_v33 = vrot.slane %v2670_v35, 5 }
 0x5bf   :  { %v2686_v0 = vsel %vm245_vm3, %v2685_v55, %v2659_v63  ;;  %v2692_v17 = vsel %vm245_vm3, %v2691_v58, %v2660_v15  ;;  %v6898_v55 = vld [vmem:[#allocation99_spill] sm:$0xff]  ;;  %v6899_v58 = vld [vmem:[#allocation100_spill] sm:$0xff] }
 0x5c0   :  { %v2678_v49 = vsel %vm247_vm4, %v2677_v22, %v2676_v2  ;;  %v2684_v48 = vsel %vm247_vm4, %v2683_v33, %v2682_v54  ;;  %v2608_v20 = vpop.f32.mrf.mxu2  ;;  %v2621_v31 = vpop.f32.mrf.mxu3  ;;  %v2688_v18 = vsel %vm241_vm1, %v2687_v8, %v2686_v0  ;;  %v2694_v14 = vsel %vm241_vm1, %v2693_v59, %v2692_v17  ;;  %v6897_v54 = vld [vmem:[#allocation98_spill] sm:$0xff]  ;;  %v6908_v8 = vld [vmem:[#allocation109_spill] sm:$0xff]  ;;  %v6910_v63 = vld [vmem:[#allocation111_spill] sm:$0xff] }
 0x5c1   :  { %v5955_v44 = vpack.c.b16 %v2678_v49, %v2678_v49  ;;  %v5957_v46 = vpack.c.b16 %v2684_v48, %v2684_v48  ;;  %v2639_v7 = vpack.c.bf16 %v2608_v20, %v2608_v20  ;;  %v2640_v34 = vpack.c.bf16 %v2621_v31, %v2621_v31  ;;  %v2584_v16 = vpop.f32.mrf.mxu0  ;;  %v2597_v51 = vpop.f32.mrf.mxu1  ;;  %v6900_v49 = vld [vmem:[#allocation101_spill] sm:$0xff]  ;;  %v6901_v48 = vld [vmem:[#allocation102_spill] sm:$0xff]  ;;  %v6902_v20 = vld [vmem:[#allocation103_spill] sm:$0xff] }
 0x5c2   :  { %v6903_v31 = vld [vmem:[#allocation104_spill] sm:$0xff]  ;;  %v6906_v16 = vld [vmem:[#allocation107_spill] sm:$0xff]  ;;  %v6909_v59 = vld [vmem:[#allocation110_spill] sm:$0xff] }
 0x5c3   :  { %v2671_v5 = vunpack.c.l.b16 %v2639_v7  ;;  %v2672_v3 = vunpack.c.l.b16 %v2640_v34  ;;  %2713 = vmatmul.bf16.vlgmr.msra.gmra.mxu0 %v5955_v44  ;;  %2726 = vmatmul.bf16.vlgmr.msra.gmra.mxu1 %v5957_v46  ;;  %v6904_v7 = vld [vmem:[#allocation105_spill] sm:$0xff]  ;;  %v6905_v34 = vld [vmem:[#allocation106_spill] sm:$0xff]  ;;  %v6907_v51 = vld [vmem:[#allocation108_spill] sm:$0xff] }
 0x5c4   :  { %2809 = vmatpush.bf16.msra.mxu0 %v5502_v21  ;;  %2822 = vmatpush.bf16.msra.mxu1 %v6896_v12  ;;  %v6911_v15 = vld [vmem:[#allocation112_spill] sm:$0xff]  ;;  %v6914_v0 = vld [vmem:[#allocation115_spill] sm:$0xff] }
 0x5c5   :  { %v2689_v35 = vrot.slane %v2671_v5, 5  ;;  %v2695_v30 = vrot.slane %v2672_v3, 5  ;;  %v6912_v5 = vld [vmem:[#allocation113_spill] sm:$0xff]  ;;  %v6913_v3 = vld [vmem:[#allocation114_spill] sm:$0xff]  ;;  %v6915_v17 = vld [vmem:[#allocation116_spill] sm:$0xff] }
 0x5c7   :  { %v2690_v19 = vsel %vm247_vm4, %v2689_v35, %v2688_v18  ;;  %v2696_v22 = vsel %vm247_vm4, %v2695_v30, %v2694_v14  ;;  %v6916_v35 = vld [vmem:[#allocation117_spill] sm:$0xff]  ;;  %v6917_v30 = vld [vmem:[#allocation118_spill] sm:$0xff]  ;;  %v6918_v18 = vld [vmem:[#allocation119_spill] sm:$0xff] }
 0x5c8   :  { %v5969_v33 = vpack.c.b16 %v2690_v19, %v2690_v19  ;;  %v5971_v50 = vpack.c.b16 %v2696_v22, %v2696_v22  ;;  %v2610_v43 = vpop.f32.mrf.mxu2  ;;  %v2623_v2 = vpop.f32.mrf.mxu3  ;;  %2810 = vmatpush.bf16.msra.mxu0 %v5516_v24  ;;  %2823 = vmatpush.bf16.msra.mxu1 %v5518_v4  ;;  %v6919_v14 = vld [vmem:[#allocation120_spill] sm:$0xff]  ;;  %v6920_v19 = vld [vmem:[#allocation122_spill] sm:$0xff]  ;;  %v6921_v22 = vld [vmem:[#allocation123_spill] sm:$0xff] }
 0x5c9   :  { %v6922_v43 = vld [vmem:[#allocation125_spill] sm:$0xff]  ;;  %v6923_v2 = vld [vmem:[#allocation126_spill] sm:$0xff] }
 0x5ca   :  { %2739 = vmatmul.bf16.vlgmr.msra.gmra.mxu2 %v5969_v33  ;;  %2752 = vmatmul.bf16.vlgmr.msra.gmra.mxu3 %v5971_v50 }
 0x5cb   :  { %2835 = vmatpush.bf16.msra.mxu2 %v5524_v61  ;;  %2848 = vmatpush.bf16.msra.mxu3 %v6897_v54 }
 0x5cc   :  { %2811 = vmatpush.bf16.msra.mxu0 %v6898_v55  ;;  %2824 = vmatpush.bf16.msra.mxu1 %v6899_v58 }
 0x5cf   :  { %2836 = vmatpush.bf16.msra.mxu2 %v6900_v49  ;;  %2849 = vmatpush.bf16.msra.mxu3 %v6901_v48 }
 0x5d0   :  { %2812 = vmatpush.bf16.msra.mxu0 %v6902_v20  ;;  %2825 = vmatpush.bf16.msra.mxu1 %v6903_v31 }
 0x5d3   :  { %2837 = vmatpush.bf16.msra.mxu2 %v6904_v7  ;;  %2850 = vmatpush.bf16.msra.mxu3 %v6905_v34 }
 0x5d4   :  { %2765 = vmatmul.bf16.vlgmr.msrb.gmra.mxu0 %v5955_v44  ;;  %2778 = vmatmul.bf16.vlgmr.msrb.gmra.mxu1 %v5957_v46 }
 0x5d5   :  { %2813 = vmatpush.bf16.msra.mxu0 %v6906_v16  ;;  %2826 = vmatpush.bf16.msra.mxu1 %v6907_v51 }
 0x5d7   :  { %2838 = vmatpush.bf16.msra.mxu2 %v6908_v8  ;;  %2851 = vmatpush.bf16.msra.mxu3 %v6909_v59 }
 0x5d9   :  { %2814 = vmatpush.bf16.msra.mxu0 %v6910_v63  ;;  %2827 = vmatpush.bf16.msra.mxu1 %v6911_v15 }
 0x5da   :  { %2791 = vmatmul.bf16.vlgmr.msrb.gmra.mxu2 %v5969_v33  ;;  %2804 = vmatmul.bf16.vlgmr.msrb.gmra.mxu3 %v5971_v50 }
 0x5db   :  { %2839 = vmatpush.bf16.msra.mxu2 %v6912_v5  ;;  %2852 = vmatpush.bf16.msra.mxu3 %v6913_v3 }
 0x5dd   :  { %2815 = vmatpush.bf16.msra.mxu0 %v6914_v0  ;;  %2828 = vmatpush.bf16.msra.mxu1 %v6915_v17  ;;  %v6940_v17 = vld [vmem:[#allocation143_spill] sm:$0xff] }
 0x5df   :  { %2840 = vmatpush.bf16.msra.mxu2 %v6916_v35  ;;  %2853 = vmatpush.bf16.msra.mxu3 %v6917_v30  ;;  %v6924_v30 = vld [vmem:[#allocation127_spill] sm:$0xff]  ;;  %v6939_v35 = vld [vmem:[#allocation142_spill] sm:$0xff] }
 0x5e1   :  { %2816 = vmatpush.bf16.msra.mxu0 %v6918_v18  ;;  %2829 = vmatpush.bf16.msra.mxu1 %v6919_v14  ;;  %v6925_v18 = vld [vmem:[#allocation128_spill] sm:$0xff]  ;;  %v6926_v14 = vld [vmem:[#allocation129_spill] sm:$0xff] }
 0x5e3   :  { %2841 = vmatpush.bf16.msra.mxu2 %v6921_v22  ;;  %2854 = vmatpush.bf16.msra.mxu3 %v5614_v47  ;;  %v6929_v22 = vld [vmem:[#allocation132_spill] sm:$0xff]  ;;  %v6930_v47 = vld [vmem:[#allocation133_spill] sm:$0xff] }
 0x5e4   :  { %2817 = vmatmul.bf16.vlgmr.msra.gmra.mxu0 %v5955_v44  ;;  %2830 = vmatmul.bf16.vlgmr.msra.gmra.mxu1 %v5957_v46 }
 0x5e5   :  { %2861 = vmatpush.bf16.msrb.mxu0 %v5606_v13  ;;  %2874 = vmatpush.bf16.msrb.mxu1 %v6920_v19  ;;  %v6927_v13 = vld [vmem:[#allocation130_spill] sm:$0xff]  ;;  %v6928_v19 = vld [vmem:[#allocation131_spill] sm:$0xff] }
 0x5e7   :  { %2842 = vmatpush.bf16.msra.mxu2 %v6924_v30  ;;  %2855 = vmatpush.bf16.msra.mxu3 %v6925_v18  ;;  %v6933_v30 = vld [vmem:[#allocation136_spill] sm:$0xff]  ;;  %v6934_v18 = vld [vmem:[#allocation137_spill] sm:$0xff] }
 0x5e9   :  { %2862 = vmatpush.bf16.msrb.mxu0 %v6922_v43  ;;  %2875 = vmatpush.bf16.msrb.mxu1 %v6923_v2  ;;  %v6931_v43 = vld [vmem:[#allocation134_spill] sm:$0xff]  ;;  %v6932_v2 = vld [vmem:[#allocation135_spill] sm:$0xff] }
 0x5ea   :  { %2843 = vmatmul.bf16.vlgmr.msra.gmra.mxu2 %v5969_v33  ;;  %2856 = vmatmul.bf16.vlgmr.msra.gmra.mxu3 %v5971_v50 }
 0x5eb   :  { %2887 = vmatpush.bf16.msrb.mxu2 %v6926_v14  ;;  %2900 = vmatpush.bf16.msrb.mxu3 %v6927_v13  ;;  %v6935_v14 = vld [vmem:[#allocation138_spill] sm:$0xff]  ;;  %v6936_v13 = vld [vmem:[#allocation139_spill] sm:$0xff] }
 0x5ed   :  { %2863 = vmatpush.bf16.msrb.mxu0 %v6928_v19  ;;  %2876 = vmatpush.bf16.msrb.mxu1 %v6929_v22  ;;  %v6937_v19 = vld [vmem:[#allocation140_spill] sm:$0xff]  ;;  %v6938_v22 = vld [vmem:[#allocation141_spill] sm:$0xff] }
 0x5ef   :  { %2888 = vmatpush.bf16.msrb.mxu2 %v6930_v47  ;;  %2901 = vmatpush.bf16.msrb.mxu3 %v6931_v43  ;;  %v6941_v47 = vld [vmem:[#allocation144_spill] sm:$0xff] }
 0x5f1   :  { %2864 = vmatpush.bf16.msrb.mxu0 %v6932_v2  ;;  %2877 = vmatpush.bf16.msrb.mxu1 %v6933_v30 }
 0x5f3   :  { %2889 = vmatpush.bf16.msrb.mxu2 %v6934_v18  ;;  %2902 = vmatpush.bf16.msrb.mxu3 %v6935_v14  ;;  %v6942_v14 = vld [vmem:[#allocation149_spill] sm:$0xff] }
 0x5f5   :  { %2865 = vmatpush.bf16.msrb.mxu0 %v6936_v13  ;;  %2878 = vmatpush.bf16.msrb.mxu1 %v6937_v19  ;;  %v6943_v13 = vld [vmem:[#allocation150_spill] sm:$0xff]  ;;  %v6944_v19 = vld [vmem:[#allocation151_spill] sm:$0xff] }
 0x5f7   :  { %2890 = vmatpush.bf16.msrb.mxu2 %v6938_v22  ;;  %2903 = vmatpush.bf16.msrb.mxu3 %v6939_v35  ;;  %v6945_v22 = vld [vmem:[#allocation152_spill] sm:$0xff] }
 0x5f8   :  { %v6946_v35 = vld [vmem:[#allocation16_spill] sm:$0xff] }
 0x5f9   :  { %2866 = vmatpush.bf16.msrb.mxu0 %v6940_v17  ;;  %2879 = vmatpush.bf16.msrb.mxu1 %v6941_v47  ;;  %v6947_v17 = vld [vmem:[#allocation17_spill] sm:$0xff] }
 0x5fa   :  { %v6948_v47 = vld [vmem:[#allocation153_spill] sm:$0xff] }
 0x5fb   :  { %2891 = vmatpush.bf16.msrb.mxu2 %v5684_v23  ;;  %2904 = vmatpush.bf16.msrb.mxu3 %v5686_v60  ;;  %v6949_v23 = vld [vmem:[#allocation154_spill] sm:$0xff] }
 0x5fd   :  { %2867 = vmatpush.bf16.msrb.mxu0 %v5690_v9  ;;  %2880 = vmatpush.bf16.msrb.mxu1 %v5692_v10  ;;  %v6950_v10 = vld [vmem:[#allocation20_spill] sm:$0xff] }
 0x5ff   :  { %2892 = vmatpush.bf16.msrb.mxu2 %v6942_v14  ;;  %2905 = vmatpush.bf16.msrb.mxu3 %v6943_v13  ;;  %v6951_v14 = vld [vmem:[#allocation21_spill] sm:$0xff]  ;;  %v6952_v13 = vld [vmem:[#allocation155_spill] sm:$0xff] }
 0x601   :  { %2868 = vmatpush.bf16.msrb.mxu0 %v6944_v19  ;;  %2881 = vmatpush.bf16.msrb.mxu1 %v6945_v22  ;;  %v6953_v19 = vld [vmem:[#allocation156_spill] sm:$0xff]  ;;  %v6954_v22 = vld [vmem:[#allocation18_spill] sm:$0xff] }
 0x603   :  { %2893 = vmatpush.bf16.msrb.mxu2 %v6948_v47  ;;  %2906 = vmatpush.bf16.msrb.mxu3 %v6949_v23 }
 0x604   :  { %2869 = vmatmul.bf16.vlgmr.msrb.gmra.mxu0 %v5955_v44  ;;  %2882 = vmatmul.bf16.vlgmr.msrb.gmra.mxu1 %v5957_v46  ;;  %v6957_v44 = vld [vmem:[#allocation23_spill] sm:$0xff] }
 0x605   :  { %3138 = vmatpush.bf16.xpose.msra.mxu0 %v6946_v35  ;;  %3151 = vmatpush.bf16.xpose.msra.mxu1 %v6947_v17  ;;  %v6955_v35 = vld [vmem:[#allocation19_spill] sm:$0xff]  ;;  %v6956_v17 = vld [vmem:[#allocation22_spill] sm:$0xff] }
 0x607   :  { %2894 = vmatpush.bf16.msrb.mxu2 %v6952_v13  ;;  %2907 = vmatpush.bf16.msrb.mxu3 %v6953_v19 }
 0x60a   :  { %2895 = vmatmul.bf16.vlgmr.msrb.gmra.mxu2 %v5969_v33  ;;  %2908 = vmatmul.bf16.vlgmr.msrb.gmra.mxu3 %v5971_v50 }
 0x60b   :  { %3164 = vmatpush.bf16.xpose.msra.mxu2 %v6954_v22  ;;  %3177 = vmatpush.bf16.xpose.msra.mxu3 %v6955_v35 }
 0x60d   :  { %3204 = vmatpush.bf16.xpose.msrb.mxu0 %v6950_v10  ;;  %3217 = vmatpush.bf16.xpose.msrb.mxu1 %v6951_v14 }
 0x613   :  { %3230 = vmatpush.bf16.xpose.msrb.mxu2 %v6956_v17  ;;  %3243 = vmatpush.bf16.xpose.msrb.mxu3 %v6957_v44 }
 0x640   :  { %v2714_v46 = vpop.f32.mrf.mxu0  ;;  %v2727_v10 = vpop.f32.mrf.mxu1 }
 0x641   :  { %v2728_v23 = vadd.f32 %v2727_v10, %v2714_v46 }
 0x648   :  { %v2716_v14 = vpop.f32.mrf.mxu0  ;;  %v2729_v47 = vpop.f32.mrf.mxu1 }
 0x64d   :  { %v2740_v13 = vpop.f32.mrf.mxu2  ;;  %v2753_v9 = vpop.f32.mrf.mxu3 }
 0x64e   :  { %v2741_v19 = vadd.f32 %v2740_v13, %v2728_v23 }
 0x650   :  { %v2754_v60 = vadd.f32 %v2753_v9, %v2741_v19 }
 0x651   :  { %v2766_v22 = vpop.f32.mrf.mxu0  ;;  %v2779_v18 = vpop.f32.mrf.mxu1 }
 0x652   :  { %v2913_v35 = vsel %vm677_vm11, %v2754_v60, 0.0  ;;  %v2780_v0 = vadd.f32 %v2779_v18, %v2766_v22 }
 0x653   :  { %v2914_v33 = vrot.slane %v2913_v35, 4 }
 0x655   :  { %v2742_v30 = vpop.f32.mrf.mxu2  ;;  %v2755_v50 = vpop.f32.mrf.mxu3  ;;  %v2915_v2 = vadd.f32 %v2914_v33, %v2913_v35 }
 0x657   :  { %v2916_v44 = vrot.slane %v2915_v2, 2 }
 0x659   :  { %v2768_v17 = vpop.f32.mrf.mxu0  ;;  %v2781_v43 = vpop.f32.mrf.mxu1  ;;  %v2917_v47 = vadd.f32 %v2916_v44, %v2915_v2 }
 0x65b   :  { %v2918_v19 = vrot.slane %v2917_v47, 1 }
 0x65d   :  { %v2792_v3 = vpop.f32.mrf.mxu2  ;;  %v2805_v46 = vpop.f32.mrf.mxu3  ;;  %v2919_v35 = vadd.f32 %v2918_v19, %v2917_v47 }
 0x65e   :  { %v2793_v10 = vadd.f32 %v2792_v3, %v2780_v0 }
 0x65f   :  { %v2941_v22 = vmul.f32 0.25, %v2919_v35 }
 0x660   :  { %v2806_v14 = vadd.f32 %v2805_v46, %v2793_v10 }
 0x661   :  { %v2818_v5 = vpop.f32.mrf.mxu0  ;;  %v2831_v13 = vpop.f32.mrf.mxu1  ;;  %v6059_v10 = vsub.f32 %v2754_v60, %v2941_v22 }
 0x662   :  { %v2920_v23 = vsel %vm677_vm11, %v2806_v14, 0.0  ;;  %v2832_v3 = vadd.f32 %v2831_v13, %v2818_v5 }
 0x663   :  { %v2921_v9 = vrot.slane %v2920_v23, 4  ;;  %v2949_v47 = vmul.f32 %v6059_v10, %v6059_v10 }
 0x665   :  { %v2922_v15 = vadd.f32 %v2921_v9, %v2920_v23  ;;  %v2794_v63 = vpop.f32.mrf.mxu2  ;;  %v2807_v30 = vpop.f32.mrf.mxu3  ;;  %v2953_v60 = vsel %vm677_vm11, %v2949_v47, 0.0 }
 0x667   :  { %v2923_v50 = vrot.slane %v2922_v15, 2 }
 0x669   :  { %v2924_v33 = vadd.f32 %v2923_v50, %v2922_v15  ;;  %v2820_v43 = vpop.f32.mrf.mxu0  ;;  %v2833_v17 = vpop.f32.mrf.mxu1 }
 0x66b   :  { %v2925_v18 = vrot.slane %v2924_v33, 1 }
 0x66d   :  { %v2926_v59 = vadd.f32 %v2925_v18, %v2924_v33  ;;  %v2844_v0 = vpop.f32.mrf.mxu2  ;;  %v2857_v2 = vpop.f32.mrf.mxu3  ;;  %v2954_v33 = vrot.slane %v2953_v60, 4 }
 0x66e   :  { %v2845_v46 = vadd.f32 %v2844_v0, %v2832_v3 }
 0x66f   :  { %v2942_v44 = vmul.f32 0.25, %v2926_v59  ;;  %v2955_v0 = vadd.f32 %v2954_v33, %v2953_v60 }
 0x670   :  { %v2858_v23 = vadd.f32 %v2857_v2, %v2845_v46 }
 0x671   :  { %v6061_v8 = vsub.f32 %v2806_v14, %v2942_v44 }
 0x672   :  { %v2927_v15 = vsel %vm677_vm11, %v2858_v23, 0.0 }
 0x673   :  { %v2950_v63 = vmul.f32 %v6061_v8, %v6061_v8  ;;  %v2928_v9 = vrot.slane %v2927_v15, 4 }
 0x675   :  { %v2960_v5 = vsel %vm677_vm11, %v2950_v63, 0.0  ;;  %v2929_v19 = vadd.f32 %v2928_v9, %v2927_v15  ;;  %v2846_v59 = vpop.f32.mrf.mxu2  ;;  %v2859_v30 = vpop.f32.mrf.mxu3  ;;  %v2956_v63 = vrot.slane %v2955_v0, 2 }
 0x676   :  { %v2961_v13 = vrot.slane %v2960_v5, 4 }
 0x677   :  { %v2930_v14 = vrot.slane %v2929_v19, 2 }
 0x678   :  { %v2962_v50 = vadd.f32 %v2961_v13, %v2960_v5 }
 0x679   :  { %v2931_v35 = vadd.f32 %v2930_v14, %v2929_v19  ;;  %v2957_v19 = vadd.f32 %v2956_v63, %v2955_v0 }
 0x67a   :  { %v2963_v17 = vrot.slane %v2962_v50, 2 }
 0x67b   :  { %v2932_v43 = vrot.slane %v2931_v35, 1  ;;  %v2958_v33 = vrot.slane %v2957_v19, 1 }
 0x67c   :  { %v2964_v44 = vadd.f32 %v2963_v17, %v2962_v50 }
 0x67d   :  { %v2933_v18 = vadd.f32 %v2932_v43, %v2931_v35  ;;  %v2959_v51 = vadd.f32 %v2958_v33, %v2957_v19 }
 0x67e   :  { %v2965_v9 = vrot.slane %v2964_v44, 1 }
 0x67f   :  { %v2943_v2 = vmul.f32 0.25, %v2933_v18 }
 0x680   :  { %v2966_v30 = vadd.f32 %v2965_v9, %v2964_v44  ;;  %v2981_v44 = vmul.f32 0.25, %v2959_v51 }
 0x681   :  { %v2870_v22 = vpop.f32.mrf.mxu0  ;;  %v2883_v3 = vpop.f32.mrf.mxu1  ;;  %v6070_v46 = vsub.f32 %v2858_v23, %v2943_v2 }
 0x682   :  { %v2884_v35 = vadd.f32 %v2883_v3, %v2870_v22  ;;  %v2982_v17 = vmul.f32 0.25, %v2966_v30 }
 0x683   :  { %v2951_v15 = vmul.f32 %v6070_v46, %v6070_v46 }
 0x685   :  { %v2967_v47 = vsel %vm677_vm11, %v2951_v15, 0.0  ;;  %v2986_v15 = vadd.f32 1e-05, %v2982_v17 }
 0x686   :  { %v2968_v59 = vrot.slane %v2967_v47, 4 }
 0x687   :  { %4838 = vrsqrt.f32 %v2986_v15  ;;  %vm3005_vm15 = vweird.f32 %v2986_v15 }
 0x688   :  { %v2969_v14 = vadd.f32 %v2968_v59, %v2967_v47  ;;  %v2985_v47 = vadd.f32 1e-05, %v2981_v44 }
 0x689   :  { %v2872_v5 = vpop.f32.mrf.mxu0  ;;  %v2885_v13 = vpop.f32.mrf.mxu1 }
 0x68a   :  { %v2970_v50 = vrot.slane %v2969_v14, 2  ;;  %4840 = vrsqrt.f32 %v2985_v47  ;;  %vm2995_vm12 = vweird.f32 %v2985_v47 }
 0x68c   :  { %v2971_v18 = vadd.f32 %v2970_v50, %v2969_v14 }
 0x68d   :  { %v2896_v43 = vpop.f32.mrf.mxu2  ;;  %v2909_v60 = vpop.f32.mrf.mxu3 }
 0x68e   :  { %v2897_v23 = vadd.f32 %v2896_v43, %v2884_v35  ;;  %v2972_v5 = vrot.slane %v2971_v18, 1  ;;  %v4839_v14 = vpop.eup %4838 }
 0x68f   :  { %vm3006_vm14 = vweird.f32 %v4839_v14 }
 0x690   :  { %v2910_v2 = vadd.f32 %v2909_v60, %v2897_v23  ;;  %v2973_v22 = vadd.f32 %v2972_v5, %v2971_v18  ;;  %v3000_v60 = vmul.f32 %v4839_v14, %v2986_v15  ;;  %v4841_v23 = vpop.eup %4840  ;;  %vm3007_vm9 = vmor %vm3005_vm15, %vm3006_vm14 }
 0x691   :  { %v2990_v17 = vmul.f32 %v4841_v23, %v2985_v47  ;;  %vm2996_vm10 = vweird.f32 %v4841_v23 }
 0x692   :  { %v2934_v16 = vsel %vm677_vm11, %v2910_v2, 0.0  ;;  %v2983_v35 = vmul.f32 0.25, %v2973_v22  ;;  %vm2997_vm13 = vmor %vm2995_vm12, %vm2996_vm10 }
 0x693   :  { %v2935_v34 = vrot.slane %v2934_v16, 4 }
 0x694   :  { %v2987_v43 = vadd.f32 1e-05, %v2983_v35 }
 0x695   :  { %v2936_v13 = vadd.f32 %v2935_v34, %v2934_v16  ;;  %v2898_v0 = vpop.f32.mrf.mxu2  ;;  %v2911_v63 = vpop.f32.mrf.mxu3  ;;  %v3001_v34 = vmul.f32 %v4839_v14, %v3000_v60 }
 0x696   :  { %4842 = vrsqrt.f32 %v2987_v43  ;;  %v2991_v63 = vmul.f32 %v4841_v23, %v2990_v17  ;;  %vm3015_vm14 = vweird.f32 %v2987_v43 }
 0x697   :  { %v2937_v9 = vrot.slane %v2936_v13, 2  ;;  %v3002_v5 = vmul.f32 0.5, %v3001_v34 }
 0x699   :  { %v2938_v3 = vadd.f32 %v2937_v9, %v2936_v13  ;;  %v3003_v9 = vsub.f32 1.5, %v3002_v5 }
 0x69b   :  { %v2939_v59 = vrot.slane %v2938_v3, 1 }
 0x69c   :  { %v4843_v13 = vpop.eup %4842 }
 0x69d   :  { %v2940_v30 = vadd.f32 %v2939_v59, %v2938_v3  ;;  %v3010_v22 = vmul.f32 %v4843_v13, %v2987_v43  ;;  %v2992_v59 = vmul.f32 0.5, %v2991_v63  ;;  %vm3016_vm8 = vweird.f32 %v4843_v13 }
 0x69e   :  { %vm3017_vm15 = vmor %vm3015_vm14, %vm3016_vm8 }
 0x69f   :  { %v2944_v19 = vmul.f32 0.25, %v2940_v30  ;;  %v3011_v30 = vmul.f32 %v4843_v13, %v3010_v22  ;;  %v2993_v60 = vsub.f32 1.5, %v2992_v59 }
 0x6a1   :  { %v2948_v33 = vsub.f32 %v2910_v2, %v2944_v19  ;;  %v3004_v2 = vmul.f32 %v4839_v14, %v3003_v9  ;;  %v2994_v34 = vmul.f32 %v4841_v23, %v2993_v60 }
 0x6a3   :  { %v2952_v50 = vmul.f32 %v2948_v33, %v2948_v33  ;;  %v3008_v7 = vsel %vm3007_vm9, %v4839_v14, %v3004_v2 }
 0x6a5   :  { %v2974_v16 = vsel %vm677_vm11, %v2952_v50, 0.0 }
 0x6a6   :  { %v2975_v51 = vrot.slane %v2974_v16, 4 }
 0x6a8   :  { %v2976_v18 = vadd.f32 %v2975_v51, %v2974_v16  ;;  %v3012_v16 = vmul.f32 0.5, %v3011_v30  ;;  %v3030_v51 = vmul.f32 %v3008_v7, %v6061_v8 }
 0x6aa   :  { %v2977_v0 = vrot.slane %v2976_v18, 2  ;;  %v3013_v17 = vsub.f32 1.5, %v3012_v16  ;;  %v6958_v16 = vld [vmem:[#allocation157_spill] sm:$0xff] }
 0x6ac   :  { %v2978_v44 = vadd.f32 %v2977_v0, %v2976_v18  ;;  %v2998_v18 = vsel %vm2997_vm13, %v4841_v23, %v2994_v34  ;;  %v3034_v0 = vmul.f32 %v3030_v51, %v5759_v62  ;;  %v3014_v63 = vmul.f32 %v4843_v13, %v3013_v17  ;;  %v6959_v51 = vld [vmem:[#allocation158_spill] sm:$0xff] }
 0x6ad   :  { %v3029_v15 = vmul.f32 %v2998_v18, %v6059_v10 }
 0x6ae   :  { %v2979_v3 = vrot.slane %v2978_v44, 1  ;;  %v3038_v9 = vadd.f32 %v3034_v0, %v5762_v1  ;;  %v3018_v22 = vsel %vm3017_vm15, %v4843_v13, %v3014_v63  ;;  %v6960_v63 = vld [vmem:[#allocation159_spill] sm:$0xff] }
 0x6af   :  { %v3033_v7 = vmul.f32 %v3029_v15, %v5765_v32  ;;  %v3031_v23 = vmul.f32 %v3018_v22, %v6070_v46 }
 0x6b0   :  { %v2980_v35 = vadd.f32 %v2979_v3, %v2978_v44  ;;  %v3042_v47 = vmax.f32 %v3038_v9, 0.0 }
 0x6b1   :  { %v3035_v2 = vmul.f32 %v3031_v23, %v5772_v29 }
 0x6b2   :  { %v2984_v19 = vmul.f32 0.25, %v2980_v35  ;;  %v3037_v35 = vadd.f32 %v3033_v7, %v5769_v45  ;;  %v3049_v43 = vrot.slane %v3042_v47, 4 }
 0x6b3   :  { %v3039_v34 = vadd.f32 %v3035_v2, %v6958_v16 }
 0x6b4   :  { %v2988_v50 = vadd.f32 1e-05, %v2984_v19  ;;  %v3041_v19 = vmax.f32 %v3037_v35, 0.0 }
 0x6b5   :  { %v3043_v18 = vmax.f32 %v3039_v34, 0.0 }
 0x6b6   :  { %4844 = vrsqrt.f32 %v2988_v50  ;;  %vm3025_vm10 = vweird.f32 %v2988_v50  ;;  %v3051_v60 = vsel %vm677_vm11, %v3041_v19, %v3049_v43 }
 0x6bc   :  { %v4845_v5 = vpop.eup %4844 }
 0x6bd   :  { %v3020_v44 = vmul.f32 %v4845_v5, %v2988_v50  ;;  %vm3026_vm9 = vweird.f32 %v4845_v5  ;;  %v6090_v50 = vadd.f32 %v3051_v60, %v5787_v11 }
 0x6be   :  { %vm3027_vm12 = vmor %vm3025_vm10, %vm3026_vm9  ;;  %vm6972_vm10 = vcmask 64512  }
 0x6bf   :  { %v3021_v14 = vmul.f32 %v4845_v5, %v3020_v44 }
 0x6c1   :  { %v3022_v3 = vmul.f32 0.5, %v3021_v14 }
 0x6c3   :  { %v3023_v8 = vsub.f32 1.5, %v3022_v3 }
 0x6c5   :  { %v3024_v59 = vmul.f32 %v4845_v5, %v3023_v8 }
 0x6c7   :  { %v3028_v10 = vsel %vm3027_vm12, %v4845_v5, %v3024_v59  ;;  %vm6973_vm12 = vmmov %vm6972_vm10 }
 0x6c8   :  { %v3032_v30 = vmul.f32 %v3028_v10, %v2948_v33  ;;  %v6097_v33 = vrot.slane %v6090_v50, 3 }
 0x6ca   :  { %v3036_v13 = vmul.f32 %v3032_v30, %v5775_v6  ;;  %v3062_v11 = vsel %vm239_vm0, %v6090_v50, %v6097_v33  ;;  %v3065_v59 = vsel %vm245_vm3, %v6090_v50, %v6097_v33  ;;  %vm6961_vm0 = vcmask 1045509  }
 0x6cc   :  { %v3040_v17 = vadd.f32 %v3036_v13, %v6959_v51 }
 0x6ce   :  { %v3044_v46 = vmax.f32 %v3040_v17, 0.0 }
 0x6d0   :  { %v3050_v0 = vrot.slane %v3044_v46, 4 }
 0x6d2   :  { %v3052_v5 = vsel %vm677_vm11, %v3043_v18, %v3050_v0 }
 0x6d3   :  { %v6094_v44 = vadd.f32 %v3052_v5, %v6960_v63 }
 0x6d5   :  { %v6100_v15 = vrot.slane %v6094_v44, 6  ;;  %v6103_v14 = vrot.slane %v6094_v44, 1 }
 0x6d7   :  { %v3063_v9 = vsel %vm241_vm1, %v6100_v15, %v6103_v14  ;;  %v3066_v3 = vsel %vm247_vm4, %v6100_v15, %v6103_v14 }
 0x6d8   :  { %v3064_v22 = vsel %vm243_vm2, %v3062_v11, %v3063_v9  ;;  %v3067_v43 = vsel %vm249_vm5, %v3065_v59, %v3066_v3  ;;  %v3070_v3 = vsel %vm253_vm6, %v6100_v15, %v6103_v14  ;;  %vm6962_vm2 = vcmask 1044483  }
 0x6d9   :  { %v3077_v7 = vperm.slane %v3064_v22, 0  ;;  %v3078_v8 = vperm.slane %v3064_v22, 1  ;;  %v3079_v47 = vperm.slane %v3064_v22, 2  ;;  %v3080_v23 = vperm.slane %v3064_v22, 3 }
 0x6da   :  { %v3068_v60 = vrot.slane %v3067_v43, 1  ;;  %vm6964_vm5 = vcmask 57344  }
 0x6db   :  { %v3109_v35 = vpack.c.bf16 %v3078_v8, %v3077_v7  ;;  %v3110_v10 = vpack.c.bf16 %v3080_v23, %v3079_v47  ;;  %vm6965_vm6 = vmmov %vm6964_vm5 }
 0x6dc   :  { %v3081_v0 = vperm.slane %v3068_v60, 0  ;;  %v3082_v5 = vperm.slane %v3068_v60, 1  ;;  %v3083_v63 = vperm.slane %v3068_v60, 2  ;;  %v3084_v11 = vperm.slane %v3068_v60, 3  ;;  %vm6967_vm8 = vmmov %vm6964_vm5 }
 0x6dd   :  { %v3119_v2 = vunpack.c.l.b16 %v3109_v35  ;;  %v3120_v30 = vunpack.c.h.b16 %v3109_v35  ;;  %v3121_v19 = vunpack.c.l.b16 %v3110_v10  ;;  %v3122_v13 = vunpack.c.h.b16 %v3110_v10  ;;  %vm6968_vm13 = vmmov %vm6964_vm5 }
 0x6de   :  { %v3111_v9 = vpack.c.bf16 %v3082_v5, %v3081_v0  ;;  %v3112_v22 = vpack.c.bf16 %v3084_v11, %v3083_v63  ;;  %vm6969_vm14 = vmmov %vm6964_vm5 }
 0x6df   :  { %v3123_v34 = vpack.c.b16 %v3119_v2, %v3119_v2  ;;  %v3124_v17 = vpack.c.b16 %v3120_v30, %v3120_v30  ;;  %v3125_v46 = vpack.c.b16 %v3121_v19, %v3121_v19  ;;  %v3126_v18 = vpack.c.b16 %v3122_v13, %v3122_v13  ;;  %vm6970_vm15 = vmmov %vm6964_vm5 }
 0x6e0   :  { %v3185_v7 = vunpack.c.l.b16 %v3111_v9  ;;  %v3186_v8 = vunpack.c.h.b16 %v3111_v9  ;;  %v3187_v47 = vunpack.c.l.b16 %v3112_v22  ;;  %vm6971_vm9 = vmmov %vm6964_vm5 }
 0x6e1   :  { %3139 = vmatmul.bf16.vlgmr.msra.gmra.mxu0 %v3123_v34  ;;  %3152 = vmatmul.bf16.vlgmr.msra.gmra.mxu1 %v3124_v17  ;;  %v3074_v34 = vsel %vm6961_vm0, %v6100_v15, %v6103_v14  ;;  %vm6974_vm0 = vmmov %vm6972_vm10 }
 0x6e2   :  { %3165 = vmatmul.bf16.vlgmr.msra.gmra.mxu2 %v3125_v46  ;;  %3178 = vmatmul.bf16.vlgmr.msra.gmra.mxu3 %v3126_v18  ;;  %v3189_v59 = vpack.c.b16 %v3185_v7, %v3185_v7 }
 0x6e3   :  { %3270 = vmatpush.bf16.xpose.msra.mxu0 %v5124_v52  ;;  %3283 = vmatpush.bf16.xpose.msra.mxu1 %v5126_v53  ;;  %v3069_v52 = vsel %vm241_vm1, %v6090_v50, %v6097_v33  ;;  %v3188_v53 = vunpack.c.h.b16 %v3112_v22 }
 0x6e4   :  { %3296 = vmatpush.bf16.xpose.msra.mxu2 %v5128_v56  ;;  %3309 = vmatpush.bf16.xpose.msra.mxu3 %v5130_v57  ;;  %v3071_v23 = vsel %vm255_vm7, %v3069_v52, %v3070_v3  ;;  %v3190_v56 = vpack.c.b16 %v3186_v8, %v3186_v8  ;;  %v3191_v57 = vpack.c.b16 %v3187_v47, %v3187_v47  ;;  %vm6966_vm7 = vmmov %vm6964_vm5 }
 0x6e5   :  { %v3072_v35 = vrot.slane %v3071_v23, 2  ;;  %v3192_v10 = vpack.c.b16 %v3188_v53, %v3188_v53 }
 0x6e7   :  { %v3085_v43 = vperm.slane %v3072_v35, 0  ;;  %v3086_v2 = vperm.slane %v3072_v35, 1  ;;  %v3087_v30 = vperm.slane %v3072_v35, 2  ;;  %v3088_v19 = vperm.slane %v3072_v35, 3 }
 0x6e9   :  { %v3113_v13 = vpack.c.bf16 %v3086_v2, %v3085_v43  ;;  %v3114_v60 = vpack.c.bf16 %v3088_v19, %v3087_v30 }
 0x6eb   :  { %v3251_v17 = vunpack.c.l.b16 %v3113_v13  ;;  %v3252_v46 = vunpack.c.h.b16 %v3113_v13  ;;  %v3253_v18 = vunpack.c.l.b16 %v3114_v60 }
 0x6ed   :  { %v3255_v5 = vpack.c.b16 %v3251_v17, %v3251_v17 }
 0x6f1   :  { %3205 = vmatmul.bf16.vlgmr.msrb.gmra.mxu0 %v3189_v59  ;;  %3218 = vmatmul.bf16.vlgmr.msrb.gmra.mxu1 %v3190_v56 }
 0x6f2   :  { %3231 = vmatmul.bf16.vlgmr.msrb.gmra.mxu2 %v3191_v57  ;;  %3244 = vmatmul.bf16.vlgmr.msrb.gmra.mxu3 %v3192_v10 }
 0x6f3   :  { %3336 = vmatpush.bf16.xpose.msrb.mxu0 %v5143_v25  ;;  %3349 = vmatpush.bf16.xpose.msrb.mxu1 %v5145_v26  ;;  %v3073_v25 = vsel %vm247_vm4, %v6090_v50, %v6097_v33  ;;  %v3254_v26 = vunpack.c.h.b16 %v3114_v60 }
 0x6f4   :  { %3362 = vmatpush.bf16.xpose.msrb.mxu2 %v5147_v27  ;;  %3375 = vmatpush.bf16.xpose.msrb.mxu3 %v5149_v28  ;;  %v3075_v0 = vsel %vm6962_vm2, %v3073_v25, %v3074_v34  ;;  %v3256_v27 = vpack.c.b16 %v3252_v46, %v3252_v46  ;;  %v3257_v28 = vpack.c.b16 %v3253_v18, %v3253_v18  ;;  %vm6975_vm2 = vmmov %vm6974_vm0 }
 0x6f5   :  { %v3076_v63 = vrot.slane %v3075_v0, 3  ;;  %v3258_v11 = vpack.c.b16 %v3254_v26, %v3254_v26 }
 0x6f7   :  { %v3089_v15 = vperm.slane %v3076_v63, 0  ;;  %v3090_v14 = vperm.slane %v3076_v63, 1  ;;  %v3091_v33 = vperm.slane %v3076_v63, 2  ;;  %v3092_v9 = vperm.slane %v3076_v63, 3 }
 0x6f9   :  { %v3115_v22 = vpack.c.bf16 %v3090_v14, %v3089_v15  ;;  %v3116_v3 = vpack.c.bf16 %v3092_v9, %v3091_v33 }
 0x6fb   :  { %v3317_v7 = vunpack.c.l.b16 %v3115_v22  ;;  %v3318_v8 = vunpack.c.h.b16 %v3115_v22  ;;  %v3319_v52 = vunpack.c.l.b16 %v3116_v3  ;;  %v3320_v47 = vunpack.c.h.b16 %v3116_v3 }
 0x6fd   :  { %v3321_v53 = vpack.c.b16 %v3317_v7, %v3317_v7  ;;  %v3322_v23 = vpack.c.b16 %v3318_v8, %v3318_v8  ;;  %v3323_v59 = vpack.c.b16 %v3319_v52, %v3319_v52  ;;  %v3324_v56 = vpack.c.b16 %v3320_v47, %v3320_v47 }
 0x701   :  { %3271 = vmatmul.bf16.vlgmr.msra.gmra.mxu0 %v3255_v5  ;;  %3284 = vmatmul.bf16.vlgmr.msra.gmra.mxu1 %v3256_v27 }
 0x702   :  { %3297 = vmatmul.bf16.vlgmr.msra.gmra.mxu2 %v3257_v28  ;;  %3310 = vmatmul.bf16.vlgmr.msra.gmra.mxu3 %v3258_v11 }
 0x703   :  { %3465 = vmatpush.bf16.msra.mxu2 %v5186_v38  ;;  %3439 = vmatpush.bf16.msra.mxu0 %v5178_v36  ;;  %v6963_v36 = vld [vmem:[#allocation24_spill] sm:$0xff] }
 0x704   :  { %3452 = vmatpush.bf16.msra.mxu1 %v5182_v37  ;;  %3478 = vmatpush.bf16.msra.mxu3 %v5190_v39 }
 0x711   :  { %3337 = vmatmul.bf16.vlgmr.msrb.gmra.mxu0 %v3321_v53  ;;  %3350 = vmatmul.bf16.vlgmr.msrb.gmra.mxu1 %v3322_v23 }
 0x712   :  { %3363 = vmatmul.bf16.vlgmr.msrb.gmra.mxu2 %v3323_v59  ;;  %3376 = vmatmul.bf16.vlgmr.msrb.gmra.mxu3 %v3324_v56 }
 0x713   :  { %3520 = vmatpush.bf16.msrb.mxu2 %v5206_v42  ;;  %3494 = vmatpush.bf16.msrb.mxu0 %v5198_v40 }
 0x714   :  { %3507 = vmatpush.bf16.msrb.mxu1 %v5202_v41  ;;  %3533 = vmatpush.bf16.msrb.mxu3 %v6963_v36 }
 0x75e   :  { %v3140_v37 = vpop.f32.mrf.mxu0  ;;  %v3153_v38 = vpop.f32.mrf.mxu1 }
 0x75f   :  { %v3154_v39 = vadd.f32 %v3153_v38, %v3140_v37 }
 0x765   :  { %v3166_v35 = vpop.f32.mrf.mxu2  ;;  %v3179_v57 = vpop.f32.mrf.mxu3 }
 0x766   :  { %v3167_v10 = vadd.f32 %v3166_v35, %v3154_v39  ;;  %v3142_v43 = vpop.f32.mrf.mxu0  ;;  %v3155_v2 = vpop.f32.mrf.mxu1 }
 0x768   :  { %v3180_v30 = vadd.f32 %v3179_v57, %v3167_v10 }
 0x76a   :  { %v3381_v19 = vsel %vm6964_vm5, %v3180_v30, -inf  ;;  %vm6980_vm5 = vmmov %vm6974_vm0 }
 0x76b   :  { %3382 = vmax.xlane.f32.xlu1 %v3381_v19 }
 0x76d   :  { %v3168_v13 = vpop.f32.mrf.mxu2  ;;  %v3181_v42 = vpop.f32.mrf.mxu3 }
 0x76e   :  { %v3206_v60 = vpop.f32.mrf.mxu0  ;;  %v3219_v40 = vpop.f32.mrf.mxu1 }
 0x76f   :  { %v3220_v34 = vadd.f32 %v3219_v40, %v3206_v60 }
 0x775   :  { %v3232_v41 = vpop.f32.mrf.mxu2  ;;  %v3245_v17 = vpop.f32.mrf.mxu3 }
 0x776   :  { %v3233_v46 = vadd.f32 %v3232_v41, %v3220_v34  ;;  %v3208_v25 = vpop.f32.mrf.mxu0  ;;  %v3221_v18 = vpop.f32.mrf.mxu1 }
 0x778   :  { %v3246_v26 = vadd.f32 %v3245_v17, %v3233_v46 }
 0x77a   :  { %v3384_v0 = vsel %vm6965_vm6, %v3246_v26, -inf  ;;  %vm6981_vm6 = vmmov %vm6974_vm0 }
 0x77b   :  { %3385 = vmax.xlane.f32.xlu2 %v3384_v0 }
 0x77d   :  { %v3234_v5 = vpop.f32.mrf.mxu2  ;;  %v3247_v27 = vpop.f32.mrf.mxu3 }
 0x77e   :  { %v3272_v63 = vpop.f32.mrf.mxu0  ;;  %v3285_v28 = vpop.f32.mrf.mxu1 }
 0x77f   :  { %v3286_v11 = vadd.f32 %v3285_v28, %v3272_v63 }
 0x785   :  { %v3298_v15 = vpop.f32.mrf.mxu2  ;;  %v3311_v14 = vpop.f32.mrf.mxu3 }
 0x786   :  { %v3299_v33 = vadd.f32 %v3298_v15, %v3286_v11  ;;  %v3274_v9 = vpop.f32.mrf.mxu0  ;;  %v3287_v22 = vpop.f32.mrf.mxu1 }
 0x787   :  { %v6976_v9 = vld [vmem:[#allocation27_spill] sm:$0xff]  ;;  %v6977_v22 = vld [vmem:[#allocation25_spill] sm:$0xff] }
 0x788   :  { %v3312_v3 = vadd.f32 %v3311_v14, %v3299_v33 }
 0x78a   :  { %v3387_v7 = vsel %vm6966_vm7, %v3312_v3, -inf  ;;  %vm6982_vm7 = vmmov %vm6974_vm0 }
 0x78b   :  { %3388 = vmax.xlane.f32.xlu0 %v3387_v7  ;;  %v6979_v7 = vld [vmem:[#allocation28_spill] sm:$0xff] }
 0x78d   :  { %v3300_v8 = vpop.f32.mrf.mxu2  ;;  %v3313_v52 = vpop.f32.mrf.mxu3 }
 0x78e   :  { %v3338_v47 = vpop.f32.mrf.mxu0  ;;  %v3351_v53 = vpop.f32.mrf.mxu1 }
 0x78f   :  { %v3352_v23 = vadd.f32 %v3351_v53, %v3338_v47 }
 0x795   :  { %v3364_v59 = vpop.f32.mrf.mxu2  ;;  %v3377_v56 = vpop.f32.mrf.mxu3 }
 0x796   :  { %v3365_v36 = vadd.f32 %v3364_v59, %v3352_v23  ;;  %v3340_v37 = vpop.f32.mrf.mxu0  ;;  %v3353_v38 = vpop.f32.mrf.mxu1  ;;  %v6984_v23 = vld [vmem:[#allocation31_spill] sm:$0xff]  ;;  %v6985_v59 = vld [vmem:[#allocation29_spill] sm:$0xff] }
 0x798   :  { %v3378_v39 = vadd.f32 %v3377_v56, %v3365_v36  ;;  %v6986_v56 = vld [vmem:[#allocation30_spill] sm:$0xff]  ;;  %v6987_v36 = vld [vmem:[#allocation32_spill] sm:$0xff] }
 0x79a   :  { %v3390_v35 = vsel %vm6967_vm8, %v3378_v39, -inf  ;;  %vm6983_vm8 = vmmov %vm6974_vm0 }
 0x79b   :  { %3391 = vmax.xlane.f32.xlu1 %v3390_v35 }
 0x79d   :  { %v3366_v57 = vpop.f32.mrf.mxu2  ;;  %v3379_v10 = vpop.f32.mrf.mxu3 }
 0x79e   :  { %v6992_v57 = vld [vmem:[#allocation33_spill] sm:$0xff]  ;;  %v6993_v10 = vld [vmem:[#allocation34_spill] sm:$0xff] }
 0x7de   :  { %v3383_v43 = vpop.xlane.xlu1 %3382 }
 0x7df   :  { %v3393_v2 = vsub.f32 %v3180_v30, %v3383_v43  ;;  %v6994_v43 = vld [vmem:[#allocation37_spill] sm:$0xff] }
 0x7e1   :  { %v3397_v19 = vmul.f32 1.442695, %v3393_v2  ;;  %v6995_v2 = vld [vmem:[#allocation38_spill] sm:$0xff] }
 0x7e3   :  { %4846 = vpow2.f32 %v3397_v19 }
 0x7e9   :  { %v4847_v13 = vpop.eup %4846 }
 0x7ea   :  { %v3405_v42 = vsel %vm6968_vm13, %v4847_v13, 0.0  ;;  %vm6988_vm13 = vmmov %vm6974_vm0 }
 0x7eb   :  { %3406 = vadd.xlane.f32.xlu2 %v3405_v42  ;;  %v6997_v42 = vld [vmem:[#allocation36_spill] sm:$0xff] }
 0x7ee   :  { %v3386_v60 = vpop.xlane.xlu2 %3385 }
 0x7ef   :  { %v3394_v40 = vsub.f32 %v3246_v26, %v3386_v60  ;;  %v6998_v60 = vld [vmem:[#allocation41_spill] sm:$0xff] }
 0x7f1   :  { %v3399_v34 = vmul.f32 1.442695, %v3394_v40  ;;  %v6999_v40 = vld [vmem:[#allocation42_spill] sm:$0xff] }
 0x7f3   :  { %4848 = vpow2.f32 %v3399_v34  ;;  %v7000_v34 = vld [vmem:[#allocation39_spill] sm:$0xff] }
 0x7f9   :  { %v4849_v41 = vpop.eup %4848 }
 0x7fa   :  { %v3408_v17 = vsel %vm6969_vm14, %v4849_v41, 0.0  ;;  %vm6989_vm14 = vmmov %vm6974_vm0 }
 0x7fb   :  { %3409 = vadd.xlane.f32.xlu0 %v3408_v17 }
 0x7fe   :  { %v3389_v46 = vpop.xlane.xlu0 %3388 }
 0x7ff   :  { %v3395_v25 = vsub.f32 %v3312_v3, %v3389_v46  ;;  %v6978_v3 = vld [vmem:[#allocation26_spill] sm:$0xff]  ;;  %v7002_v46 = vld [vmem:[#allocation45_spill] sm:$0xff] }
 0x801   :  { %v3401_v18 = vmul.f32 1.442695, %v3395_v25  ;;  %v7003_v25 = vld [vmem:[#allocation46_spill] sm:$0xff] }
 0x803   :  { %4850 = vpow2.f32 %v3401_v18 }
 0x809   :  { %v4851_v0 = vpop.eup %4850 }
 0x80a   :  { %v3411_v30 = vsel %vm6970_vm15, %v4851_v0, 0.0  ;;  %vm6990_vm15 = vmmov %vm6974_vm0 }
 0x80b   :  { %3412 = vadd.xlane.f32.xlu1 %v3411_v30  ;;  %v7004_v30 = vld [vmem:[#allocation43_spill] sm:$0xff] }
 0x80e   :  { %v3392_v5 = vpop.xlane.xlu1 %3391 }
 0x80f   :  { %v3396_v27 = vsub.f32 %v3378_v39, %v3392_v5  ;;  %v7005_v5 = vld [vmem:[#allocation44_spill] sm:$0xff] }
 0x811   :  { %v3403_v63 = vmul.f32 1.442695, %v3396_v27  ;;  %v7006_v27 = vld [vmem:[#allocation49_spill] sm:$0xff] }
 0x813   :  { %4852 = vpow2.f32 %v3403_v63  ;;  %v7007_v63 = vld [vmem:[#allocation50_spill] sm:$0xff] }
 0x819   :  { %v4853_v28 = vpop.eup %4852 }
 0x81a   :  { %v3414_v26 = vsel %vm6971_vm9, %v4853_v28, 0.0  ;;  %vm6991_vm9 = vmmov %vm6974_vm0 }
 0x81b   :  { %3415 = vadd.xlane.f32.xlu2 %v3414_v26  ;;  %v7011_v26 = vld [vmem:[#allocation47_spill] sm:$0xff] }
 0x85e   :  { %v3407_v11 = vpop.xlane.xlu2 %3406 }
 0x85f   :  { %4854 = vrcp.f32 %v3407_v11  ;;  %v7013_v11 = vld [vmem:[#allocation53_spill] sm:$0xff] }
 0x865   :  { %v4855_v15 = vpop.eup %4854 }
 0x866   :  { %v3421_v14 = vmul.f32 %v4855_v15, %v4847_v13  ;;  %v6996_v13 = vld [vmem:[#allocation35_spill] sm:$0xff]  ;;  %v7014_v15 = vld [vmem:[#allocation54_spill] sm:$0xff] }
 0x868   :  { %v3425_v33 = vpack.c.bf16 %v3421_v14, %v3421_v14  ;;  %v7015_v14 = vld [vmem:[#allocation51_spill] sm:$0xff] }
 0x86a   :  { %4646 = vmatmul.msk.bf16.vlgmr.msra.gmra.mxu0 %vm6972_vm10, %v3425_v33  ;;  %4647 = vmatmul.msk.bf16.vlgmr.msra.gmra.mxu1 %vm6973_vm12, %v3425_v33  ;;  %vm7008_vm10 = vmmov %vm6974_vm0 }
 0x86b   :  { %4648 = vmatmul.msk.bf16.vlgmr.msra.gmra.mxu2 %vm6974_vm0, %v3425_v33  ;;  %4649 = vmatmul.msk.bf16.vlgmr.msra.gmra.mxu3 %vm6975_vm2, %v3425_v33  ;;  %vm7009_vm12 = vmmov %vm6974_vm0  ;;  %v7016_v33 = vld [vmem:[#allocation52_spill] sm:$0xff] }
 0x86c   :  { %3575 = vmatpush.bf16.msra.mxu2 %v6976_v9  ;;  %3549 = vmatpush.bf16.msra.mxu0 %v6977_v22  ;;  %vm7010_vm2 = vmmov %vm6974_vm0  ;;  %v7017_v9 = vld [vmem:[#allocation57_spill] sm:$0xff]  ;;  %v7018_v22 = vld [vmem:[#allocation58_spill] sm:$0xff] }
 0x86d   :  { %3562 = vmatpush.bf16.msra.mxu1 %v6978_v3  ;;  %3588 = vmatpush.bf16.msra.mxu3 %v6979_v7  ;;  %v7019_v3 = vld [vmem:[#allocation55_spill] sm:$0xff]  ;;  %v7020_v7 = vld [vmem:[#allocation56_spill] sm:$0xff] }
 0x86e   :  { %v3410_v8 = vpop.xlane.xlu0 %3409 }
 0x86f   :  { %4856 = vrcp.f32 %v3410_v8  ;;  %v7021_v8 = vld [vmem:[#allocation63_spill] sm:$0xff] }
 0x875   :  { %v4857_v52 = vpop.eup %4856 }
 0x876   :  { %v3422_v47 = vmul.f32 %v4857_v52, %v4849_v41  ;;  %v7001_v41 = vld [vmem:[#allocation40_spill] sm:$0xff] }
 0x877   :  { %v7022_v52 = vld [vmem:[#allocation64_spill] sm:$0xff] }
 0x878   :  { %v3426_v53 = vpack.c.bf16 %v3422_v47, %v3422_v47  ;;  %v7023_v47 = vld [vmem:[#allocation59_spill] sm:$0xff] }
 0x87a   :  { %4650 = vmatmul.msk.bf16.vlgmr.msrb.gmra.mxu0 %vm6980_vm5, %v3426_v53  ;;  %4651 = vmatmul.msk.bf16.vlgmr.msrb.gmra.mxu1 %vm6981_vm6, %v3426_v53 }
 0x87b   :  { %4652 = vmatmul.msk.bf16.vlgmr.msrb.gmra.mxu2 %vm6982_vm7, %v3426_v53  ;;  %4653 = vmatmul.msk.bf16.vlgmr.msrb.gmra.mxu3 %vm6983_vm8, %v3426_v53  ;;  %v7024_v53 = vld [vmem:[#allocation60_spill] sm:$0xff] }
 0x87c   :  { %3630 = vmatpush.bf16.msrb.mxu2 %v6984_v23  ;;  %3604 = vmatpush.bf16.msrb.mxu0 %v6985_v59  ;;  %v7025_v23 = vld [vmem:[#allocation61_spill] sm:$0xff]  ;;  %v7026_v59 = vld [vmem:[#allocation62_spill] sm:$0xff] }
 0x87d   :  { %3617 = vmatpush.bf16.msrb.mxu1 %v6986_v56  ;;  %3643 = vmatpush.bf16.msrb.mxu3 %v6987_v36  ;;  %v7027_v56 = vld [vmem:[#allocation67_spill] sm:$0xff]  ;;  %v7028_v36 = vld [vmem:[#allocation68_spill] sm:$0xff] }
 0x87e   :  { %v3413_v37 = vpop.xlane.xlu1 %3412 }
 0x87f   :  { %4858 = vrcp.f32 %v3413_v37  ;;  %v7029_v37 = vld [vmem:[#allocation69_spill] sm:$0xff] }
 0x885   :  { %v4859_v38 = vpop.eup %4858 }
 0x886   :  { %v3423_v39 = vmul.f32 %v4859_v38, %v4851_v0  ;;  %v7030_v38 = vld [vmem:[#allocation70_spill] sm:$0xff] }
 0x888   :  { %v3427_v35 = vpack.c.bf16 %v3423_v39, %v3423_v39  ;;  %v7031_v39 = vld [vmem:[#allocation65_spill] sm:$0xff] }
 0x88a   :  { %4654 = vmatmul.msk.bf16.vlgmr.msra.gmra.mxu0 %vm6988_vm13, %v3427_v35  ;;  %4655 = vmatmul.msk.bf16.vlgmr.msra.gmra.mxu1 %vm6989_vm14, %v3427_v35 }
 0x88b   :  { %4656 = vmatmul.msk.bf16.vlgmr.msra.gmra.mxu2 %vm6990_vm15, %v3427_v35  ;;  %4657 = vmatmul.msk.bf16.vlgmr.msra.gmra.mxu3 %vm6991_vm9, %v3427_v35  ;;  %v7032_v35 = vld [vmem:[#allocation66_spill] sm:$0xff] }
 0x88c   :  { %3729 = vmatpush.bf16.msra.mxu0 %v6992_v57  ;;  %3742 = vmatpush.bf16.msra.mxu1 %v6993_v10  ;;  %v7033_v57 = vld [vmem:[#allocation73_spill] sm:$0xff]  ;;  %v7034_v10 = vld [vmem:[#allocation74_spill] sm:$0xff] }
 0x88d   :  { %3755 = vmatpush.bf16.msra.mxu2 %v6994_v43  ;;  %3768 = vmatpush.bf16.msra.mxu3 %v6995_v2  ;;  %v7035_v43 = vld [vmem:[#allocation71_spill] sm:$0xff]  ;;  %v7036_v2 = vld [vmem:[#allocation72_spill] sm:$0xff] }
 0x88e   :  { %v3416_v19 = vpop.xlane.xlu2 %3415 }
 0x88f   :  { %4860 = vrcp.f32 %v3416_v19  ;;  %v7037_v19 = vld [vmem:[#allocation77_spill] sm:$0xff] }
 0x890   :  { %3730 = vmatpush.bf16.msra.mxu0 %v6996_v13  ;;  %3743 = vmatpush.bf16.msra.mxu1 %v6997_v42  ;;  %v7038_v13 = vld [vmem:[#allocation78_spill] sm:$0xff]  ;;  %v7039_v42 = vld [vmem:[#allocation75_spill] sm:$0xff] }
 0x891   :  { %3756 = vmatpush.bf16.msra.mxu2 %v6998_v60  ;;  %3769 = vmatpush.bf16.msra.mxu3 %v6999_v40  ;;  %v7040_v60 = vld [vmem:[#allocation76_spill] sm:$0xff]  ;;  %v7041_v40 = vld [vmem:[#allocation81_spill] sm:$0xff] }
 0x894   :  { %3731 = vmatpush.bf16.msra.mxu0 %v7000_v34  ;;  %3744 = vmatpush.bf16.msra.mxu1 %v7001_v41  ;;  %v7042_v34 = vld [vmem:[#allocation82_spill] sm:$0xff]  ;;  %v7043_v41 = vld [vmem:[#allocation79_spill] sm:$0xff] }
 0x895   :  { %v4861_v17 = vpop.eup %4860  ;;  %3757 = vmatpush.bf16.msra.mxu2 %v7002_v46  ;;  %3770 = vmatpush.bf16.msra.mxu3 %v7003_v25  ;;  %v7045_v46 = vld [vmem:[#allocation85_spill] sm:$0xff]  ;;  %v7046_v25 = vld [vmem:[#allocation86_spill] sm:$0xff] }
 0x896   :  { %v3424_v18 = vmul.f32 %v4861_v17, %v4853_v28  ;;  %v7012_v28 = vld [vmem:[#allocation48_spill] sm:$0xff] }
 0x897   :  { %v7044_v17 = vld [vmem:[#allocation80_spill] sm:$0xff] }
 0x898   :  { %v3428_v0 = vpack.c.bf16 %v3424_v18, %v3424_v18  ;;  %3732 = vmatpush.bf16.msra.mxu0 %v7004_v30  ;;  %3745 = vmatpush.bf16.msra.mxu1 %v7005_v5  ;;  %v7047_v18 = vld [vmem:[#allocation83_spill] sm:$0xff]  ;;  %v7049_v30 = vld [vmem:[#allocation89_spill] sm:$0xff]  ;;  %v7050_v5 = vld [vmem:[#allocation90_spill] sm:$0xff] }
 0x899   :  { %3758 = vmatpush.bf16.msra.mxu2 %v7006_v27  ;;  %3771 = vmatpush.bf16.msra.mxu3 %v7007_v63  ;;  %v7051_v27 = vld [vmem:[#allocation87_spill] sm:$0xff]  ;;  %v7052_v63 = vld [vmem:[#allocation88_spill] sm:$0xff] }
 0x89a   :  { %4658 = vmatmul.msk.bf16.vlgmr.msrb.gmra.mxu0 %vm7008_vm10, %v3428_v0  ;;  %4659 = vmatmul.msk.bf16.vlgmr.msrb.gmra.mxu1 %vm7009_vm12, %v3428_v0 }
 0x89b   :  { %4660 = vmatmul.msk.bf16.vlgmr.msrb.gmra.mxu2 %vm6974_vm0, %v3428_v0  ;;  %4661 = vmatmul.msk.bf16.vlgmr.msrb.gmra.mxu3 %vm7010_vm2, %v3428_v0  ;;  %v7048_v0 = vld [vmem:[#allocation84_spill] sm:$0xff] }
 0x89c   :  { %3733 = vmatpush.bf16.msra.mxu0 %v7011_v26  ;;  %3746 = vmatpush.bf16.msra.mxu1 %v7012_v28  ;;  %v7053_v26 = vld [vmem:[#allocation93_spill] sm:$0xff]  ;;  %v7054_v28 = vld [vmem:[#allocation94_spill] sm:$0xff] }
 0x89d   :  { %3759 = vmatpush.bf16.msra.mxu2 %v7013_v11  ;;  %3772 = vmatpush.bf16.msra.mxu3 %v7014_v15  ;;  %v7055_v11 = vld [vmem:[#allocation91_spill] sm:$0xff]  ;;  %v7056_v15 = vld [vmem:[#allocation92_spill] sm:$0xff] }
 0x8a0   :  { %3734 = vmatpush.bf16.msra.mxu0 %v7015_v14  ;;  %3747 = vmatpush.bf16.msra.mxu1 %v7016_v33  ;;  %v7057_v14 = vld [vmem:[#allocation95_spill] sm:$0xff]  ;;  %v7058_v33 = vld [vmem:[#allocation96_spill] sm:$0xff] }
 0x8a1   :  { %3760 = vmatpush.bf16.msra.mxu2 %v7017_v9  ;;  %3773 = vmatpush.bf16.msra.mxu3 %v7018_v22 }
 0x8a4   :  { %3735 = vmatpush.bf16.msra.mxu0 %v7019_v3  ;;  %3748 = vmatpush.bf16.msra.mxu1 %v7020_v7 }
 0x8a5   :  { %3761 = vmatpush.bf16.msra.mxu2 %v7021_v8  ;;  %3774 = vmatpush.bf16.msra.mxu3 %v7022_v52 }
 0x8a8   :  { %3736 = vmatpush.bf16.msra.mxu0 %v7023_v47  ;;  %3749 = vmatpush.bf16.msra.mxu1 %v7024_v53 }
 0x8a9   :  { %3762 = vmatpush.bf16.msra.mxu2 %v7027_v56  ;;  %3775 = vmatpush.bf16.msra.mxu3 %v7028_v36 }
 0x8ac   :  { %3781 = vmatpush.bf16.msrb.mxu0 %v7025_v23  ;;  %3794 = vmatpush.bf16.msrb.mxu1 %v7026_v59 }
 0x8ad   :  { %3807 = vmatpush.bf16.msrb.mxu2 %v7029_v37  ;;  %3820 = vmatpush.bf16.msrb.mxu3 %v7030_v38 }
 0x8b0   :  { %3782 = vmatpush.bf16.msrb.mxu0 %v7031_v39  ;;  %3795 = vmatpush.bf16.msrb.mxu1 %v7032_v35 }
 0x8b1   :  { %3808 = vmatpush.bf16.msrb.mxu2 %v7033_v57  ;;  %3821 = vmatpush.bf16.msrb.mxu3 %v7034_v10 }
 0x8b4   :  { %3783 = vmatpush.bf16.msrb.mxu0 %v7035_v43  ;;  %3796 = vmatpush.bf16.msrb.mxu1 %v7036_v2 }
 0x8b5   :  { %3809 = vmatpush.bf16.msrb.mxu2 %v7037_v19  ;;  %3822 = vmatpush.bf16.msrb.mxu3 %v7038_v13 }
 0x8b8   :  { %3784 = vmatpush.bf16.msrb.mxu0 %v7039_v42  ;;  %3797 = vmatpush.bf16.msrb.mxu1 %v7040_v60 }
 0x8b9   :  { %3810 = vmatpush.bf16.msrb.mxu2 %v7041_v40  ;;  %3823 = vmatpush.bf16.msrb.mxu3 %v7042_v34 }
 0x8bc   :  { %3785 = vmatpush.bf16.msrb.mxu0 %v7043_v41  ;;  %3798 = vmatpush.bf16.msrb.mxu1 %v7044_v17 }
 0x8bd   :  { %3811 = vmatpush.bf16.msrb.mxu2 %v7045_v46  ;;  %3824 = vmatpush.bf16.msrb.mxu3 %v7046_v25 }
 0x8c0   :  { %3786 = vmatpush.bf16.msrb.mxu0 %v7047_v18  ;;  %3799 = vmatpush.bf16.msrb.mxu1 %v7048_v0 }
 0x8c1   :  { %3812 = vmatpush.bf16.msrb.mxu2 %v7049_v30  ;;  %3825 = vmatpush.bf16.msrb.mxu3 %v7050_v5 }
 0x8c4   :  { %3787 = vmatpush.bf16.msrb.mxu0 %v7051_v27  ;;  %3800 = vmatpush.bf16.msrb.mxu1 %v7052_v63 }
 0x8c5   :  { %3813 = vmatpush.bf16.msrb.mxu2 %v7053_v26  ;;  %3826 = vmatpush.bf16.msrb.mxu3 %v7054_v28 }
 0x8c8   :  { %3788 = vmatpush.bf16.msrb.mxu0 %v7055_v11  ;;  %3801 = vmatpush.bf16.msrb.mxu1 %v7056_v15 }
 0x8c9   :  { %3814 = vmatpush.bf16.msrb.mxu2 %v7057_v14  ;;  %3827 = vmatpush.bf16.msrb.mxu3 %v7058_v33 }
 0x8e7   :  { %v3441_v9 = vpop.f32.mrf.mxu0  ;;  %v3454_v22 = vpop.f32.mrf.mxu1 }
 0x8e8   :  { %v3649_v46 = vpack.c.bf16 %v3441_v9, %v3441_v9  ;;  %v3650_v25 = vpack.c.bf16 %v3454_v22, %v3454_v22 }
 0x8ee   :  { %v6245_v3 = vpop.f32.mrf.mxu2  ;;  %v6247_v7 = vpop.f32.mrf.mxu3 }
 0x8ef   :  { %v3443_v8 = vpop.f32.mrf.mxu0  ;;  %v3456_v52 = vpop.f32.mrf.mxu1 }
 0x8f6   :  { %v3469_v47 = vpop.f32.mrf.mxu2  ;;  %v3482_v53 = vpop.f32.mrf.mxu3 }
 0x8f7   :  { %v3496_v23 = vpop.f32.mrf.mxu0  ;;  %v3509_v59 = vpop.f32.mrf.mxu1  ;;  %v3681_v47 = vunpack.c.l.b16 %v3649_v46  ;;  %v3682_v53 = vunpack.c.l.b16 %v3650_v25 }
 0x8f8   :  { %v3653_v19 = vpack.c.bf16 %v3496_v23, %v3496_v23  ;;  %v3654_v13 = vpack.c.bf16 %v3509_v59, %v3509_v59 }
 0x8fa   :  { %v3685_v41 = vunpack.c.l.b16 %v3653_v19  ;;  %v3686_v17 = vunpack.c.l.b16 %v3654_v13 }
 0x8fc   :  { %v3697_v26 = vrot.slane %v3685_v41, 7  ;;  %v3703_v28 = vrot.slane %v3686_v17, 7 }
 0x8fe   :  { %v3522_v56 = vpop.f32.mrf.mxu2  ;;  %v3535_v36 = vpop.f32.mrf.mxu3 }
 0x8ff   :  { %v3498_v37 = vpop.f32.mrf.mxu0  ;;  %v3511_v38 = vpop.f32.mrf.mxu1  ;;  %v3655_v30 = vpack.c.bf16 %v3522_v56, %v3522_v56  ;;  %v3656_v5 = vpack.c.bf16 %v3535_v36, %v3535_v36  ;;  %v3698_v56 = vsel %vm245_vm3, %v3697_v26, %v3681_v47  ;;  %v3704_v36 = vsel %vm245_vm3, %v3703_v28, %v3682_v53 }
 0x901   :  { %v3687_v9 = vunpack.c.l.b16 %v3655_v30  ;;  %v3688_v22 = vunpack.c.l.b16 %v3656_v5 }
 0x906   :  { %v3524_v39 = vpop.f32.mrf.mxu2  ;;  %v3537_v35 = vpop.f32.mrf.mxu3 }
 0x907   :  { %v3551_v57 = vpop.f32.mrf.mxu0  ;;  %v3564_v10 = vpop.f32.mrf.mxu1 }
 0x908   :  { %v3657_v40 = vpack.c.bf16 %v3551_v57, %v3551_v57  ;;  %v3658_v34 = vpack.c.bf16 %v3564_v10, %v3564_v10 }
 0x90a   :  { %v3689_v18 = vunpack.c.l.b16 %v3657_v40  ;;  %v3690_v0 = vunpack.c.l.b16 %v3658_v34 }
 0x90c   :  { %v3699_v23 = vrot.slane %v3689_v18, 6  ;;  %v3705_v59 = vrot.slane %v3690_v0, 6 }
 0x90e   :  { %v3577_v43 = vpop.f32.mrf.mxu2  ;;  %v3590_v2 = vpop.f32.mrf.mxu3  ;;  %v3700_v19 = vsel %vm241_vm1, %v3699_v23, %v3698_v56  ;;  %v3706_v13 = vsel %vm241_vm1, %v3705_v59, %v3704_v36  ;;  %v7073_v56 = vld [vmem:[#allocation119_spill] sm:$0xff]  ;;  %v7074_v36 = vld [vmem:[#allocation120_spill] sm:$0xff] }
 0x90f   :  { %v3553_v42 = vpop.f32.mrf.mxu0  ;;  %v3566_v60 = vpop.f32.mrf.mxu1  ;;  %v3659_v14 = vpack.c.bf16 %v3577_v43, %v3577_v43  ;;  %v3660_v33 = vpack.c.bf16 %v3590_v2, %v3590_v2  ;;  %v3651_v43 = vpack.c.bf16 %v6245_v3, %v6245_v3  ;;  %v3652_v2 = vpack.c.bf16 %v6247_v7, %v6247_v7 }
 0x910   :  { %v3709_v42 = vrot.slane %v3687_v9, 7  ;;  %v3715_v60 = vrot.slane %v3688_v22, 7  ;;  %v7069_v9 = vld [vmem:[#allocation115_spill] sm:$0xff]  ;;  %v7070_v22 = vld [vmem:[#allocation116_spill] sm:$0xff] }
 0x911   :  { %v3691_v39 = vunpack.c.l.b16 %v3659_v14  ;;  %v3692_v35 = vunpack.c.l.b16 %v3660_v33 }
 0x913   :  { %v3711_v30 = vrot.slane %v3691_v39, 6  ;;  %v3717_v5 = vrot.slane %v3692_v35, 6  ;;  %v7075_v39 = vld [vmem:[#allocation121_spill] sm:$0xff]  ;;  %v7076_v35 = vld [vmem:[#allocation122_spill] sm:$0xff] }
 0x916   :  { %v3579_v27 = vpop.f32.mrf.mxu2  ;;  %v3592_v63 = vpop.f32.mrf.mxu3 }
 0x917   :  { %v3606_v11 = vpop.f32.mrf.mxu0  ;;  %v3619_v15 = vpop.f32.mrf.mxu1  ;;  %v3683_v27 = vunpack.c.l.b16 %v3651_v43  ;;  %v3684_v63 = vunpack.c.l.b16 %v3652_v2  ;;  %v7079_v43 = vld [vmem:[#allocation125_spill] sm:$0xff]  ;;  %v7080_v2 = vld [vmem:[#allocation126_spill] sm:$0xff] }
 0x918   :  { %v3661_v8 = vpack.c.bf16 %v3606_v11, %v3606_v11  ;;  %v3662_v52 = vpack.c.bf16 %v3619_v15, %v3619_v15 }
 0x919   :  { %v3710_v11 = vsel %vm245_vm3, %v3709_v42, %v3683_v27  ;;  %v3716_v15 = vsel %vm245_vm3, %v3715_v60, %v3684_v63  ;;  %v7083_v42 = vld [vmem:[#allocation129_spill] sm:$0xff]  ;;  %v7084_v60 = vld [vmem:[#allocation130_spill] sm:$0xff] }
 0x91a   :  { %v3693_v37 = vunpack.c.l.b16 %v3661_v8  ;;  %v3694_v38 = vunpack.c.l.b16 %v3662_v52  ;;  %v3712_v8 = vsel %vm241_vm1, %v3711_v30, %v3710_v11  ;;  %v3718_v52 = vsel %vm241_vm1, %v3717_v5, %v3716_v15  ;;  %v7093_v30 = vld [vmem:[#allocation139_spill] sm:$0xff]  ;;  %v7094_v5 = vld [vmem:[#allocation140_spill] sm:$0xff]  ;;  %v7095_v27 = vld [vmem:[#allocation141_spill] sm:$0xff] }
 0x91b   :  { %v7096_v63 = vld [vmem:[#allocation142_spill] sm:$0xff]  ;;  %v7099_v11 = vld [vmem:[#allocation145_spill] sm:$0xff] }
 0x91c   :  { %v3701_v57 = vrot.slane %v3693_v37, 5  ;;  %v3707_v10 = vrot.slane %v3694_v38, 5  ;;  %v7071_v37 = vld [vmem:[#allocation117_spill] sm:$0xff]  ;;  %v7072_v38 = vld [vmem:[#allocation118_spill] sm:$0xff] }
 0x91d   :  { %v7100_v15 = vld [vmem:[#allocation146_spill] sm:$0xff] }
 0x91e   :  { %v3702_v40 = vsel %vm247_vm4, %v3701_v57, %v3700_v19  ;;  %v3708_v34 = vsel %vm247_vm4, %v3707_v10, %v3706_v13  ;;  %v3632_v41 = vpop.f32.mrf.mxu2  ;;  %v3645_v17 = vpop.f32.mrf.mxu3  ;;  %v7077_v57 = vld [vmem:[#allocation123_spill] sm:$0xff]  ;;  %v7078_v10 = vld [vmem:[#allocation124_spill] sm:$0xff] }
 0x91f   :  { %v6259_v46 = vpack.c.b16 %v3702_v40, %v3702_v40  ;;  %v6261_v25 = vpack.c.b16 %v3708_v34, %v3708_v34  ;;  %v3663_v3 = vpack.c.bf16 %v3632_v41, %v3632_v41  ;;  %v3664_v18 = vpack.c.bf16 %v3645_v17, %v3645_v17  ;;  %v3608_v0 = vpop.f32.mrf.mxu0  ;;  %v3621_v7 = vpop.f32.mrf.mxu1  ;;  %v7081_v19 = vld [vmem:[#allocation127_spill] sm:$0xff]  ;;  %v7082_v13 = vld [vmem:[#allocation128_spill] sm:$0xff]  ;;  %v7087_v41 = vld [vmem:[#allocation133_spill] sm:$0xff] }
 0x920   :  { %v7085_v40 = vld [vmem:[#allocation131_spill] sm:$0xff]  ;;  %v7086_v34 = vld [vmem:[#allocation132_spill] sm:$0xff]  ;;  %v7088_v17 = vld [vmem:[#allocation134_spill] sm:$0xff] }
 0x921   :  { %v3695_v26 = vunpack.c.l.b16 %v3663_v3  ;;  %v3696_v28 = vunpack.c.l.b16 %v3664_v18  ;;  %3737 = vmatmul.bf16.vlgmr.msra.gmra.mxu0 %v6259_v46  ;;  %3750 = vmatmul.bf16.vlgmr.msra.gmra.mxu1 %v6261_v25  ;;  %v7089_v3 = vld [vmem:[#allocation135_spill] sm:$0xff]  ;;  %v7090_v18 = vld [vmem:[#allocation136_spill] sm:$0xff]  ;;  %v7091_v0 = vld [vmem:[#allocation137_spill] sm:$0xff] }
 0x922   :  { %3833 = vmatpush.bf16.msra.mxu0 %v5502_v21  ;;  %3846 = vmatpush.bf16.msra.mxu1 %v6896_v12  ;;  %v7092_v7 = vld [vmem:[#allocation138_spill] sm:$0xff] }
 0x923   :  { %v3713_v14 = vrot.slane %v3695_v26, 5  ;;  %v3719_v33 = vrot.slane %v3696_v28, 5  ;;  %v7097_v26 = vld [vmem:[#allocation143_spill] sm:$0xff]  ;;  %v7098_v28 = vld [vmem:[#allocation144_spill] sm:$0xff] }
 0x925   :  { %v3714_v47 = vsel %vm247_vm4, %v3713_v14, %v3712_v8  ;;  %v3720_v53 = vsel %vm247_vm4, %v3719_v33, %v3718_v52  ;;  %v7101_v14 = vld [vmem:[#allocation147_spill] sm:$0xff]  ;;  %v7102_v33 = vld [vmem:[#allocation148_spill] sm:$0xff]  ;;  %v7103_v8 = vld [vmem:[#allocation149_spill] sm:$0xff] }
 0x926   :  { %v6273_v23 = vpack.c.b16 %v3714_v47, %v3714_v47  ;;  %v6275_v59 = vpack.c.b16 %v3720_v53, %v3720_v53  ;;  %v3634_v21 = vpop.f32.mrf.mxu2  ;;  %v3647_v12 = vpop.f32.mrf.mxu3  ;;  %3834 = vmatpush.bf16.msra.mxu0 %v5516_v24  ;;  %3847 = vmatpush.bf16.msra.mxu1 %v5518_v4  ;;  %v7059_v24 = vld [vmem:[#allocation105_spill] sm:$0xff]  ;;  %v7060_v4 = vld [vmem:[#allocation106_spill] sm:$0xff]  ;;  %v7105_v47 = vld [vmem:[#allocation151_spill] sm:$0xff] }
 0x927   :  { %v7104_v52 = vld [vmem:[#allocation150_spill] sm:$0xff]  ;;  %v7106_v53 = vld [vmem:[#allocation152_spill] sm:$0xff]  ;;  %v7107_v21 = vld [vmem:[#allocation153_spill] sm:$0xff] }
 0x928   :  { %3763 = vmatmul.bf16.vlgmr.msra.gmra.mxu2 %v6273_v23  ;;  %3776 = vmatmul.bf16.vlgmr.msra.gmra.mxu3 %v6275_v59  ;;  %v7108_v12 = vld [vmem:[#allocation154_spill] sm:$0xff] }
 0x929   :  { %3859 = vmatpush.bf16.msra.mxu2 %v5524_v61  ;;  %3872 = vmatpush.bf16.msra.mxu3 %v6897_v54  ;;  %v7061_v61 = vld [vmem:[#allocation107_spill] sm:$0xff]  ;;  %v7062_v54 = vld [vmem:[#allocation108_spill] sm:$0xff] }
 0x92a   :  { %3835 = vmatpush.bf16.msra.mxu0 %v6898_v55  ;;  %3848 = vmatpush.bf16.msra.mxu1 %v6899_v58  ;;  %v7063_v55 = vld [vmem:[#allocation109_spill] sm:$0xff]  ;;  %v7064_v58 = vld [vmem:[#allocation110_spill] sm:$0xff] }
 0x92d   :  { %3860 = vmatpush.bf16.msra.mxu2 %v6900_v49  ;;  %3873 = vmatpush.bf16.msra.mxu3 %v6901_v48  ;;  %v7065_v49 = vld [vmem:[#allocation111_spill] sm:$0xff]  ;;  %v7066_v48 = vld [vmem:[#allocation112_spill] sm:$0xff] }
 0x92e   :  { %3836 = vmatpush.bf16.msra.mxu0 %v6902_v20  ;;  %3849 = vmatpush.bf16.msra.mxu1 %v6903_v31  ;;  %v7067_v20 = vld [vmem:[#allocation113_spill] sm:$0xff]  ;;  %v7068_v31 = vld [vmem:[#allocation114_spill] sm:$0xff] }
 0x931   :  { %3861 = vmatpush.bf16.msra.mxu2 %v7059_v24  ;;  %3874 = vmatpush.bf16.msra.mxu3 %v7060_v4  ;;  %v7109_v24 = vld [vmem:[#allocation155_spill] sm:$0xff]  ;;  %v7110_v4 = vld [vmem:[#allocation156_spill] sm:$0xff] }
 0x932   :  { %3789 = vmatmul.bf16.vlgmr.msrb.gmra.mxu0 %v6259_v46  ;;  %3802 = vmatmul.bf16.vlgmr.msrb.gmra.mxu1 %v6261_v25 }
 0x933   :  { %3837 = vmatpush.bf16.msra.mxu0 %v7061_v61  ;;  %3850 = vmatpush.bf16.msra.mxu1 %v7062_v54 }
 0x935   :  { %3862 = vmatpush.bf16.msra.mxu2 %v7063_v55  ;;  %3875 = vmatpush.bf16.msra.mxu3 %v7064_v58 }
 0x937   :  { %3838 = vmatpush.bf16.msra.mxu0 %v7065_v49  ;;  %3851 = vmatpush.bf16.msra.mxu1 %v7066_v48 }
 0x938   :  { %3815 = vmatmul.bf16.vlgmr.msrb.gmra.mxu2 %v6273_v23  ;;  %3828 = vmatmul.bf16.vlgmr.msrb.gmra.mxu3 %v6275_v59 }
 0x939   :  { %3863 = vmatpush.bf16.msra.mxu2 %v7067_v20  ;;  %3876 = vmatpush.bf16.msra.mxu3 %v7068_v31 }
 0x93b   :  { %3839 = vmatpush.bf16.msra.mxu0 %v7069_v9  ;;  %3852 = vmatpush.bf16.msra.mxu1 %v7070_v22 }
 0x93d   :  { %3864 = vmatpush.bf16.msra.mxu2 %v7071_v37  ;;  %3877 = vmatpush.bf16.msra.mxu3 %v7072_v38 }
 0x93f   :  { %3840 = vmatpush.bf16.msra.mxu0 %v7073_v56  ;;  %3853 = vmatpush.bf16.msra.mxu1 %v7074_v36 }
 0x941   :  { %3865 = vmatpush.bf16.msra.mxu2 %v7077_v57  ;;  %3878 = vmatpush.bf16.msra.mxu3 %v7078_v10 }
 0x942   :  { %3841 = vmatmul.bf16.vlgmr.msra.gmra.mxu0 %v6259_v46  ;;  %3854 = vmatmul.bf16.vlgmr.msra.gmra.mxu1 %v6261_v25 }
 0x943   :  { %3885 = vmatpush.bf16.msrb.mxu0 %v7075_v39  ;;  %3898 = vmatpush.bf16.msrb.mxu1 %v7076_v35 }
 0x945   :  { %3866 = vmatpush.bf16.msra.mxu2 %v7081_v19  ;;  %3879 = vmatpush.bf16.msra.mxu3 %v7082_v13 }
 0x947   :  { %3886 = vmatpush.bf16.msrb.mxu0 %v7079_v43  ;;  %3899 = vmatpush.bf16.msrb.mxu1 %v7080_v2 }
 0x948   :  { %3867 = vmatmul.bf16.vlgmr.msra.gmra.mxu2 %v6273_v23  ;;  %3880 = vmatmul.bf16.vlgmr.msra.gmra.mxu3 %v6275_v59 }
 0x949   :  { %3911 = vmatpush.bf16.msrb.mxu2 %v7083_v42  ;;  %3924 = vmatpush.bf16.msrb.mxu3 %v7084_v60 }
 0x94b   :  { %3887 = vmatpush.bf16.msrb.mxu0 %v7085_v40  ;;  %3900 = vmatpush.bf16.msrb.mxu1 %v7086_v34 }
 0x94d   :  { %3912 = vmatpush.bf16.msrb.mxu2 %v7087_v41  ;;  %3925 = vmatpush.bf16.msrb.mxu3 %v7088_v17 }
 0x94f   :  { %3888 = vmatpush.bf16.msrb.mxu0 %v7089_v3  ;;  %3901 = vmatpush.bf16.msrb.mxu1 %v7090_v18 }
 0x951   :  { %3913 = vmatpush.bf16.msrb.mxu2 %v7091_v0  ;;  %3926 = vmatpush.bf16.msrb.mxu3 %v7092_v7 }
 0x953   :  { %3889 = vmatpush.bf16.msrb.mxu0 %v7093_v30  ;;  %3902 = vmatpush.bf16.msrb.mxu1 %v7094_v5 }
 0x955   :  { %3914 = vmatpush.bf16.msrb.mxu2 %v7095_v27  ;;  %3927 = vmatpush.bf16.msrb.mxu3 %v7096_v63 }
 0x957   :  { %3890 = vmatpush.bf16.msrb.mxu0 %v7097_v26  ;;  %3903 = vmatpush.bf16.msrb.mxu1 %v7098_v28 }
 0x959   :  { %3915 = vmatpush.bf16.msrb.mxu2 %v7099_v11  ;;  %3928 = vmatpush.bf16.msrb.mxu3 %v7100_v15 }
 0x95b   :  { %3891 = vmatpush.bf16.msrb.mxu0 %v7101_v14  ;;  %3904 = vmatpush.bf16.msrb.mxu1 %v7102_v33 }
 0x95d   :  { %3916 = vmatpush.bf16.msrb.mxu2 %v7103_v8  ;;  %3929 = vmatpush.bf16.msrb.mxu3 %v7104_v52 }
 0x95f   :  { %3892 = vmatpush.bf16.msrb.mxu0 %v7105_v47  ;;  %3905 = vmatpush.bf16.msrb.mxu1 %v7106_v53 }
 0x961   :  { %3917 = vmatpush.bf16.msrb.mxu2 %v7107_v21  ;;  %3930 = vmatpush.bf16.msrb.mxu3 %v7108_v12 }
 0x962   :  { %3893 = vmatmul.bf16.vlgmr.msrb.gmra.mxu0 %v6259_v46  ;;  %3906 = vmatmul.bf16.vlgmr.msrb.gmra.mxu1 %v6261_v25 }
 0x965   :  { %3918 = vmatpush.bf16.msrb.mxu2 %v7109_v24  ;;  %3931 = vmatpush.bf16.msrb.mxu3 %v7110_v4 }
 0x968   :  { %3919 = vmatmul.bf16.vlgmr.msrb.gmra.mxu2 %v6273_v23  ;;  %3932 = vmatmul.bf16.vlgmr.msrb.gmra.mxu3 %v6275_v59 }
 0x99e   :  { %v3738_v61 = vpop.f32.mrf.mxu0  ;;  %v3751_v54 = vpop.f32.mrf.mxu1 }
 0x99f   :  { %v3752_v49 = vadd.f32 %v3751_v54, %v3738_v61 }
 0x9a6   :  { %v3740_v55 = vpop.f32.mrf.mxu0  ;;  %v3753_v58 = vpop.f32.mrf.mxu1 }
 0x9ab   :  { %v3764_v48 = vpop.f32.mrf.mxu2  ;;  %v3777_v20 = vpop.f32.mrf.mxu3 }
 0x9ac   :  { %v3765_v31 = vadd.f32 %v3764_v48, %v3752_v49 }
 0x9ae   :  { %v3778_v9 = vadd.f32 %v3777_v20, %v3765_v31 }
 0x9af   :  { %v3790_v46 = vpop.f32.mrf.mxu0  ;;  %v3803_v22 = vpop.f32.mrf.mxu1 }
 0x9b0   :  { %v3937_v25 = vsel %vm677_vm11, %v3778_v9, 0.0  ;;  %v3804_v10 = vadd.f32 %v3803_v22, %v3790_v46 }
 0x9b1   :  { %v3938_v37 = vrot.slane %v3937_v25, 4 }
 0x9b3   :  { %v3939_v38 = vadd.f32 %v3938_v37, %v3937_v25  ;;  %v3766_v56 = vpop.f32.mrf.mxu2  ;;  %v3779_v36 = vpop.f32.mrf.mxu3 }
 0x9b5   :  { %v3940_v23 = vrot.slane %v3939_v38, 2 }
 0x9b7   :  { %v3941_v39 = vadd.f32 %v3940_v23, %v3939_v38  ;;  %v3792_v59 = vpop.f32.mrf.mxu0  ;;  %v3805_v35 = vpop.f32.mrf.mxu1 }
 0x9b9   :  { %v3942_v57 = vrot.slane %v3941_v39, 1 }
 0x9bb   :  { %v3943_v43 = vadd.f32 %v3942_v57, %v3941_v39  ;;  %v3816_v2 = vpop.f32.mrf.mxu2  ;;  %v3829_v19 = vpop.f32.mrf.mxu3 }
 0x9bc   :  { %v3817_v13 = vadd.f32 %v3816_v2, %v3804_v10 }
 0x9bd   :  { %v3965_v42 = vmul.f32 0.25, %v3943_v43 }
 0x9be   :  { %v3830_v60 = vadd.f32 %v3829_v19, %v3817_v13 }
 0x9bf   :  { %v6354_v40 = vsub.f32 %v3778_v9, %v3965_v42  ;;  %v3842_v34 = vpop.f32.mrf.mxu0  ;;  %v3855_v41 = vpop.f32.mrf.mxu1 }
 0x9c0   :  { %v3944_v17 = vsel %vm677_vm11, %v3830_v60, 0.0  ;;  %v3856_v47 = vadd.f32 %v3855_v41, %v3842_v34 }
 0x9c1   :  { %v3973_v3 = vmul.f32 %v6354_v40, %v6354_v40  ;;  %v3945_v18 = vrot.slane %v3944_v17, 4 }
 0x9c3   :  { %v3977_v0 = vsel %vm677_vm11, %v3973_v3, 0.0  ;;  %v3946_v7 = vadd.f32 %v3945_v18, %v3944_v17  ;;  %v3818_v30 = vpop.f32.mrf.mxu2  ;;  %v3831_v5 = vpop.f32.mrf.mxu3 }
 0x9c4   :  { %v3978_v27 = vrot.slane %v3977_v0, 4 }
 0x9c5   :  { %v3947_v63 = vrot.slane %v3946_v7, 2 }
 0x9c6   :  { %v3979_v26 = vadd.f32 %v3978_v27, %v3977_v0 }
 0x9c7   :  { %v3948_v28 = vadd.f32 %v3947_v63, %v3946_v7  ;;  %v3844_v11 = vpop.f32.mrf.mxu0  ;;  %v3857_v15 = vpop.f32.mrf.mxu1 }
 0x9c8   :  { %v3980_v14 = vrot.slane %v3979_v26, 2 }
 0x9c9   :  { %v3949_v33 = vrot.slane %v3948_v28, 1 }
 0x9ca   :  { %v3981_v8 = vadd.f32 %v3980_v14, %v3979_v26 }
 0x9cb   :  { %v3950_v52 = vadd.f32 %v3949_v33, %v3948_v28  ;;  %v3868_v21 = vpop.f32.mrf.mxu2  ;;  %v3881_v12 = vpop.f32.mrf.mxu3 }
 0x9cc   :  { %v3982_v53 = vrot.slane %v3981_v8, 1  ;;  %v3869_v4 = vadd.f32 %v3868_v21, %v3856_v47 }
 0x9cd   :  { %v3966_v24 = vmul.f32 0.25, %v3950_v52 }
 0x9ce   :  { %v3983_v61 = vadd.f32 %v3982_v53, %v3981_v8  ;;  %v3882_v55 = vadd.f32 %v3881_v12, %v3869_v4 }
 0x9cf   :  { %v6360_v54 = vsub.f32 %v3830_v60, %v3966_v24 }
 0x9d0   :  { %v4005_v58 = vmul.f32 0.25, %v3983_v61  ;;  %v3951_v48 = vsel %vm677_vm11, %v3882_v55, 0.0 }
 0x9d1   :  { %v3974_v49 = vmul.f32 %v6360_v54, %v6360_v54  ;;  %v3952_v31 = vrot.slane %v3951_v48, 4 }
 0x9d2   :  { %v4009_v20 = vadd.f32 1e-05, %v4005_v58 }
 0x9d3   :  { %v3984_v9 = vsel %vm677_vm11, %v3974_v49, 0.0  ;;  %v3953_v22 = vadd.f32 %v3952_v31, %v3951_v48  ;;  %v3870_v25 = vpop.f32.mrf.mxu2  ;;  %v3883_v37 = vpop.f32.mrf.mxu3 }
 0x9d4   :  { %4862 = vrsqrt.f32 %v4009_v20  ;;  %v3985_v46 = vrot.slane %v3984_v9, 4  ;;  %vm4019_vm3 = vweird.f32 %v4009_v20 }
 0x9d5   :  { %v3954_v56 = vrot.slane %v3953_v22, 2 }
 0x9d6   :  { %v3986_v38 = vadd.f32 %v3985_v46, %v3984_v9 }
 0x9d7   :  { %v3955_v23 = vadd.f32 %v3954_v56, %v3953_v22 }
 0x9d8   :  { %v3987_v36 = vrot.slane %v3986_v38, 2 }
 0x9d9   :  { %v3956_v35 = vrot.slane %v3955_v23, 1 }
 0x9da   :  { %v4863_v39 = vpop.eup %4862  ;;  %v3988_v59 = vadd.f32 %v3987_v36, %v3986_v38 }
 0x9db   :  { %v4014_v57 = vmul.f32 %v4863_v39, %v4009_v20  ;;  %v3957_v43 = vadd.f32 %v3956_v35, %v3955_v23  ;;  %vm4020_vm1 = vweird.f32 %v4863_v39 }
 0x9dc   :  { %v3989_v10 = vrot.slane %v3988_v59, 1  ;;  %vm4021_vm4 = vmor %vm4019_vm3, %vm4020_vm1 }
 0x9dd   :  { %v3967_v42 = vmul.f32 0.25, %v3957_v43  ;;  %v4015_v60 = vmul.f32 %v4863_v39, %v4014_v57 }
 0x9de   :  { %v3990_v13 = vadd.f32 %v3989_v10, %v3988_v59 }
 0x9df   :  { %v3894_v2 = vpop.f32.mrf.mxu0  ;;  %v3907_v19 = vpop.f32.mrf.mxu1  ;;  %v6366_v41 = vsub.f32 %v3882_v55, %v3967_v42  ;;  %v4016_v18 = vmul.f32 0.5, %v4015_v60 }
 0x9e0   :  { %v4006_v34 = vmul.f32 0.25, %v3990_v13  ;;  %v3908_v26 = vadd.f32 %v3907_v19, %v3894_v2 }
 0x9e1   :  { %v3975_v3 = vmul.f32 %v6366_v41, %v6366_v41  ;;  %v4017_v27 = vsub.f32 1.5, %v4016_v18 }
 0x9e2   :  { %v4010_v17 = vadd.f32 1e-05, %v4006_v34 }
 0x9e3   :  { %v3991_v0 = vsel %vm677_vm11, %v3975_v3, 0.0  ;;  %v4018_v8 = vmul.f32 %v4863_v39, %v4017_v27 }
 0x9e4   :  { %4864 = vrsqrt.f32 %v4010_v17  ;;  %v3992_v5 = vrot.slane %v3991_v0, 4  ;;  %vm4029_vm6 = vweird.f32 %v4010_v17 }
 0x9e5   :  { %v4022_v4 = vsel %vm4021_vm4, %v4863_v39, %v4018_v8 }
 0x9e6   :  { %v3993_v63 = vadd.f32 %v3992_v5, %v3991_v0  ;;  %v4053_v9 = vmul.f32 %v4022_v4, %v6354_v40 }
 0x9e7   :  { %v3896_v7 = vpop.f32.mrf.mxu0  ;;  %v3909_v30 = vpop.f32.mrf.mxu1 }
 0x9e8   :  { %v3994_v15 = vrot.slane %v3993_v63, 2  ;;  %v4057_v38 = vmul.f32 %v4053_v9, %v5765_v32 }
 0x9ea   :  { %v4865_v33 = vpop.eup %4864  ;;  %v3995_v47 = vadd.f32 %v3994_v15, %v3993_v63  ;;  %v4061_v35 = vadd.f32 %v4057_v38, %v5769_v45 }
 0x9eb   :  { %v3920_v28 = vpop.f32.mrf.mxu2  ;;  %v3933_v11 = vpop.f32.mrf.mxu3  ;;  %v4024_v52 = vmul.f32 %v4865_v33, %v4010_v17  ;;  %vm4030_vm5 = vweird.f32 %v4865_v33 }
 0x9ec   :  { %v3921_v14 = vadd.f32 %v3920_v28, %v3908_v26  ;;  %v3996_v55 = vrot.slane %v3995_v47, 1  ;;  %vm4031_vm7 = vmor %vm4029_vm6, %vm4030_vm5  ;;  %v4065_v19 = vmax.f32 %v4061_v35, 0.0 }
 0x9ed   :  { %v4025_v21 = vmul.f32 %v4865_v33, %v4024_v52 }
 0x9ee   :  { %v3934_v53 = vadd.f32 %v3933_v11, %v3921_v14  ;;  %v3997_v25 = vadd.f32 %v3996_v55, %v3995_v47 }
 0x9ef   :  { %v4026_v61 = vmul.f32 0.5, %v4025_v21 }
 0x9f0   :  { %v3958_v12 = vsel %vm677_vm11, %v3934_v53, 0.0  ;;  %v4007_v23 = vmul.f32 0.25, %v3997_v25 }
 0x9f1   :  { %v3959_v24 = vrot.slane %v3958_v12, 4  ;;  %v4027_v31 = vsub.f32 1.5, %v4026_v61 }
 0x9f2   :  { %v4011_v10 = vadd.f32 1e-05, %v4007_v23 }
 0x9f3   :  { %v3960_v58 = vadd.f32 %v3959_v24, %v3958_v12  ;;  %v3922_v49 = vpop.f32.mrf.mxu2  ;;  %v3935_v48 = vpop.f32.mrf.mxu3  ;;  %v4028_v22 = vmul.f32 %v4865_v33, %v4027_v31 }
 0x9f4   :  { %4866 = vrsqrt.f32 %v4011_v10  ;;  %vm4039_vm13 = vweird.f32 %v4011_v10 }
 0x9f5   :  { %v3961_v46 = vrot.slane %v3960_v58, 2  ;;  %v4032_v37 = vsel %vm4031_vm7, %v4865_v33, %v4028_v22 }
 0x9f6   :  { %v4054_v56 = vmul.f32 %v4032_v37, %v6360_v54 }
 0x9f7   :  { %v3962_v20 = vadd.f32 %v3961_v46, %v3960_v58 }
 0x9f8   :  { %v4058_v39 = vmul.f32 %v4054_v56, %v5759_v62 }
 0x9f9   :  { %v3963_v36 = vrot.slane %v3962_v20, 1 }
 0x9fa   :  { %v4062_v40 = vadd.f32 %v4058_v39, %v5762_v1  ;;  %v4867_v45 = vpop.eup %4866 }
 0x9fb   :  { %v3964_v59 = vadd.f32 %v3963_v36, %v3962_v20  ;;  %v4034_v3 = vmul.f32 %v4867_v45, %v4011_v10  ;;  %vm4040_vm8 = vweird.f32 %v4867_v45 }
 0x9fc   :  { %v4066_v43 = vmax.f32 %v4062_v40, 0.0  ;;  %vm4041_vm14 = vmor %vm4039_vm13, %vm4040_vm8 }
 0x9fd   :  { %v3968_v57 = vmul.f32 0.25, %v3964_v59  ;;  %v4035_v7 = vmul.f32 %v4867_v45, %v4034_v3 }
 0x9fe   :  { %v4073_v13 = vrot.slane %v4066_v43, 4 }
 0x9ff   :  { %v3972_v2 = vsub.f32 %v3934_v53, %v3968_v57  ;;  %v4036_v27 = vmul.f32 0.5, %v4035_v7 }
 0xa00   :  { %v4075_v54 = vsel %vm677_vm11, %v4065_v19, %v4073_v13 }
 0xa01   :  { %v3976_v42 = vmul.f32 %v3972_v2, %v3972_v2  ;;  %v4079_v62 = vadd.f32 %v4075_v54, %v6090_v50  ;;  %v4037_v63 = vsub.f32 1.5, %v4036_v27 }
 0xa03   :  { %v3998_v32 = vsel %vm677_vm11, %v3976_v42, 0.0  ;;  %4081 = vst [vmem:[#allocation11] sm:$0xff] %v4079_v62  ;;  %v4038_v28 = vmul.f32 %v4867_v45, %v4037_v63 }
 0xa04   :  { %v3999_v60 = vrot.slane %v3998_v32, 4 }
 0xa05   :  { %v4042_v15 = vsel %vm4041_vm14, %v4867_v45, %v4038_v28 }
 0xa06   :  { %v4000_v34 = vadd.f32 %v3999_v60, %v3998_v32  ;;  %v4055_v8 = vmul.f32 %v4042_v15, %v6366_v41 }
 0xa08   :  { %v4001_v17 = vrot.slane %v4000_v34, 2  ;;  %v4059_v53 = vmul.f32 %v4055_v8, %v5772_v29 }
 0xa0a   :  { %v4002_v1 = vadd.f32 %v4001_v17, %v4000_v34  ;;  %v4063_v24 = vadd.f32 %v4059_v53, %v6958_v16 }
 0xa0c   :  { %v4003_v18 = vrot.slane %v4002_v1, 1  ;;  %v4067_v55 = vmax.f32 %v4063_v24, 0.0 }
 0xa0e   :  { %v4004_v0 = vadd.f32 %v4003_v18, %v4002_v1 }
 0xa10   :  { %v4008_v30 = vmul.f32 0.25, %v4004_v0 }
 0xa12   :  { %v4012_v5 = vadd.f32 1e-05, %v4008_v30 }
 0xa14   :  { %4868 = vrsqrt.f32 %v4012_v5  ;;  %vm4049_vm9 = vweird.f32 %v4012_v5 }
 0xa1a   :  { %v4869_v26 = vpop.eup %4868 }
 0xa1b   :  { %v4044_v11 = vmul.f32 %v4869_v26, %v4012_v5  ;;  %vm4050_vm15 = vweird.f32 %v4869_v26 }
 0xa1c   :  { %vm4051_vm10 = vmor %vm4049_vm9, %vm4050_vm15 }
 0xa1d   :  { %v4045_v50 = vmul.f32 %v4869_v26, %v4044_v11 }
 0xa1f   :  { %v4046_v14 = vmul.f32 0.5, %v4045_v50 }
 0xa21   :  { %v4047_v33 = vsub.f32 1.5, %v4046_v14 }
 0xa23   :  { %v4048_v52 = vmul.f32 %v4869_v26, %v4047_v33 }
 0xa25   :  { %v4052_v47 = vsel %vm4051_vm10, %v4869_v26, %v4048_v52 }
 0xa26   :  { %v4056_v21 = vmul.f32 %v4052_v47, %v3972_v2 }
 0xa28   :  { %v4060_v12 = vmul.f32 %v4056_v21, %v5775_v6 }
 0xa2a   :  { %v4064_v4 = vadd.f32 %v4060_v12, %v6959_v51 }
 0xa2c   :  { %v4068_v61 = vmax.f32 %v4064_v4, 0.0 }
 0xa2e   :  { %v4074_v58 = vrot.slane %v4068_v61, 4 }
 0xa30   :  { %v4076_v41 = vsel %vm677_vm11, %v4067_v55, %v4074_v58 }
 0xa31   :  { %v4080_v29 = vadd.f32 %v4076_v41, %v6094_v44 }
 0xa33   :  { %4082 = vst [vmem:[#allocation11 + $0x8] sm:$0xff] %v4080_v29 }
 0xa34   :  { %4093 = dma.vmem_to_hbm [thread:$0]  %s4089_s4, 256, %s4091_s19, [#allocation4]  }
 0xa35   :  { %5022 = dma.done.wait [#allocation4], 256  }
 0xa36   :  { %5023 = vsyncadd [#allocation4], 4294967040 }
 0xa37   :  { %4098 = vsyncpa [#allocation3], 1 }
 0xa38   :  { %4099 = vsyncpa [#allocation6], 1 }
 0xa39   :  { %4100 = vsyncpa [#allocation9], 1 }
 0xa3a   :  { %4101 = vsyncpa [#allocation4], 1 }

</bundles_post_ra>
